<compile_context>
chip_gen: v7x
topology: tpu7x:2x2x1
jax: 0.10.0
libtpu: 0.0.40
codegen_flags: <defaults>
</compile_context>

<pallas_src>
import functools
import math

import jax
import jax.numpy as jnp
from jax import lax
from jax.experimental import pallas as pl
from jax.experimental.pallas import tpu as pltpu

_LOG2E = math.log2(math.e)


# ---------------------------------------------------------------------------
# Kernel 1: fused QKV projection, outputs written directly in attention layout
# ---------------------------------------------------------------------------
def _qkv_proj_kernel(x_ref, w_ref, q_ref, k_ref, v_ref, *, num_heads, head_dim):
    e = num_heads * head_dim
    # (tp, E) x (E, 3E) on the MXU, f32 accumulation.
    y = jnp.dot(x_ref[0], w_ref[...], preferred_element_type=jnp.float32)
    # Per-head static slices; K emitted pre-transposed (Dh, tp) per head so the
    # attention kernel never transposes K (and its K tiles are lane-dense).
    for h in range(num_heads):
        lo = h * head_dim
        q_ref[0, h] = y[:, lo:lo + head_dim].astype(q_ref.dtype)
        k_ref[0, h] = y[:, e + lo:e + lo + head_dim].T.astype(k_ref.dtype)
        v_ref[0, h] = y[:, 2 * e + lo:2 * e + lo + head_dim].astype(v_ref.dtype)


def _qkv_projection(x, w_qkv, *, num_heads, block_rows):
    b, t, e = x.shape
    dh = e // num_heads
    tp = min(block_rows, t)
    assert t % tp == 0, "T must be divisible by block_rows"
    assert tp % 8 == 0, "block_rows must be a multiple of 8"
    kernel = functools.partial(_qkv_proj_kernel, num_heads=num_heads, head_dim=dh)
    return pl.pallas_call(
        kernel,
        out_shape=(
            jax.ShapeDtypeStruct((b, num_heads, t, dh), jnp.bfloat16),   # Q   (B,H,T,Dh)
            jax.ShapeDtypeStruct((b, num_heads, dh, t), jnp.bfloat16),   # K^T (B,H,Dh,T)
            jax.ShapeDtypeStruct((b, num_heads, t, dh), jnp.bfloat16),   # V   (B,H,T,Dh)
        ),
        grid_spec=pltpu.PrefetchScalarGridSpec(
            num_scalar_prefetch=0,
            grid=(b, t // tp),
            in_specs=[
                pl.BlockSpec((1, tp, e), lambda b_, ti: (b_, ti, 0)),     # x rows tile
                pl.BlockSpec((e, 3 * e), lambda b_, ti: (0, 0)),          # fused QKV W
            ],
            out_specs=[
                pl.BlockSpec((1, num_heads, tp, dh), lambda b_, ti: (b_, 0, ti, 0)),
                pl.BlockSpec((1, num_heads, dh, tp), lambda b_, ti: (b_, 0, 0, ti)),
                pl.BlockSpec((1, num_heads, tp, dh), lambda b_, ti: (b_, 0, ti, 0)),
            ],
        ),
        compiler_params=pltpu.CompilerParams(
            dimension_semantics=("parallel", "parallel"),
            vmem_limit_bytes=48 * 1024 * 1024),
    )(x, w_qkv)


# ---------------------------------------------------------------------------
# Kernel 2: flash-style causal attention (triangular schedule) + fused out-proj
# ---------------------------------------------------------------------------
def _flash_attn_kernel(qi_tab_ref, ki_tab_ref,            # scalar-prefetch (SMEM)
                       q_ref, k_ref, v_ref, wo_ref, bo_ref,
                       o_ref,
                       m_ref, l_ref, acc_ref,
                       *, num_heads, block_q, block_k):
    s_idx = pl.program_id(1)
    qi = qi_tab_ref[s_idx]
    ki = ki_tab_ref[s_idx]
    is_first = ki == 0          # first scheduled KV tile for this q tile
    is_diag = ki == qi          # diagonal tile: mask + finalize

    def step(first, masked):
        q = q_ref[0]                       # (H, TQ, Dh) bf16; scale*log2e folded into Wq
        kt = k_ref[0]                      # (H, Dh, TK) bf16 (pre-transposed)
        v = v_ref[0]                       # (H, TK, Dh) bf16
        # Scores are in log2 units (exp2 below); natural MXU form, no K transpose.
        s = jnp.einsum("hqd,hdk->hqk", q, kt,
                       preferred_element_type=jnp.float32)          # (H, TQ, TK)
        if masked:
            # Local indices are valid because TQ == TK and tiles are aligned.
            row = lax.broadcasted_iota(jnp.int32, (block_q, block_k), 0)
            col = lax.broadcasted_iota(jnp.int32, (block_q, block_k), 1)
            s = jnp.where((row >= col)[None, :, :], s, -1e30)
        m_tile = jnp.max(s, axis=-1, keepdims=True)                  # (H, TQ, 1)
        if first:
            # Direct init: no exp / rescale of an -inf-initialized state.
            m_new = m_tile
            p = jnp.exp2(s - m_new)
            l_ref[...] = jnp.sum(p, axis=-1, keepdims=True)
            acc_ref[...] = jnp.einsum("hqk,hkd->hqd", p.astype(v.dtype), v,
                                      preferred_element_type=jnp.float32)
        else:
            m_prev = m_ref[...]
            m_new = jnp.maximum(m_prev, m_tile)
            alpha = jnp.exp2(m_prev - m_new)
            p = jnp.exp2(s - m_new)
            l_ref[...] = alpha * l_ref[...] + jnp.sum(p, axis=-1, keepdims=True)
            acc_ref[...] = alpha * acc_ref[...] + jnp.einsum(
                "hqk,hkd->hqd", p.astype(v.dtype), v,
                preferred_element_type=jnp.float32)
        m_ref[...] = m_new

    @pl.when(jnp.logical_and(is_first, jnp.logical_not(is_diag)))
    def _():
        step(first=True, masked=False)

    @pl.when(jnp.logical_and(jnp.logical_not(is_first), jnp.logical_not(is_diag)))
    def _():
        step(first=False, masked=False)

    @pl.when(jnp.logical_and(is_first, is_diag))
    def _():
        step(first=True, masked=True)

    @pl.when(jnp.logical_and(jnp.logical_not(is_first), is_diag))
    def _():
        step(first=False, masked=True)

    @pl.when(is_diag)
    def _finalize():
        inv_l = pl.reciprocal(l_ref[...], approx=True)               # (H, TQ, 1)
        attn = (acc_ref[...] * inv_l).astype(wo_ref.dtype)            # (H, TQ, Dh) bf16
        # Per-head MXU dots accumulated into a lane-dense (TQ, E) slab:
        # no 64-lane-offset concatenate / relayout.
        out = jnp.dot(attn[0], wo_ref[0], preferred_element_type=jnp.float32)
        for h in range(1, num_heads):
            out = out + jnp.dot(attn[h], wo_ref[h],
                                preferred_element_type=jnp.float32)
        o_ref[0] = (out + bo_ref[...]).astype(o_ref.dtype)


def _flash_attention(q, k, v, wo_hde, bo, *, block_t, out_dtype):
    b, h, t, dh = q.shape
    e = h * dh
    bt = min(block_t, t)
    assert t % bt == 0, "T must be divisible by block_t"
    assert bt % 128 == 0 or bt == t, "block_t must be a multiple of 128"
    n_t = t // bt

    # Triangular schedule: only causally-required (qi, ki) tiles are visited,
    # ki ascending within each qi so the diagonal tile is last for its q tile.
    sched = [(qi, ki) for qi in range(n_t) for ki in range(qi + 1)]
    qi_tab = jnp.asarray([p[0] for p in sched], jnp.int32)
    ki_tab = jnp.asarray([p[1] for p in sched], jnp.int32)
    n_sched = len(sched)

    kernel = functools.partial(_flash_attn_kernel, num_heads=h,
                               block_q=bt, block_k=bt)
    return pl.pallas_call(
        kernel,
        out_shape=jax.ShapeDtypeStruct((b, t, e), out_dtype),
        grid_spec=pltpu.PrefetchScalarGridSpec(
            num_scalar_prefetch=2,                      # qi_tab, ki_tab -> SMEM
            grid=(b, n_sched),
            in_specs=[
                pl.BlockSpec((1, h, bt, dh), lambda b_, s_, qt, kt: (b_, 0, qt[s_], 0)),  # Q
                pl.BlockSpec((1, h, dh, bt), lambda b_, s_, qt, kt: (b_, 0, 0, kt[s_])),  # K^T
                pl.BlockSpec((1, h, bt, dh), lambda b_, s_, qt, kt: (b_, 0, kt[s_], 0)),  # V
                pl.BlockSpec((h, dh, e),     lambda b_, s_, qt, kt: (0, 0, 0)),           # Wo
                pl.BlockSpec((1, e),         lambda b_, s_, qt, kt: (0, 0)),              # bo
            ],
            out_specs=pl.BlockSpec((1, bt, e), lambda b_, s_, qt, kt: (b_, qt[s_], 0)),
            scratch_shapes=[
                pltpu.VMEM((h, bt, 1), jnp.float32),    # running max m (log2 units)
                pltpu.VMEM((h, bt, 1), jnp.float32),    # running denom l
                pltpu.VMEM((h, bt, dh), jnp.float32),   # output accumulator
            ],
        ),
        compiler_params=pltpu.CompilerParams(
            dimension_semantics=("parallel", "arbitrary"),
            vmem_limit_bytes=48 * 1024 * 1024),
    )(qi_tab, ki_tab, q, k, v, wo_hde, bo)


# ---------------------------------------------------------------------------
# Weight prep (hoist out of the per-call path) + public wrapper
# ---------------------------------------------------------------------------
def prepare_mha_params(wq, wk, wv, wo, bo, num_heads, compute_dtype=jnp.bfloat16):
    """Fold softmax scale (and log2e for exp2) into Wq; fuse QKV; reshape Wo."""
    e = wq.shape[0]
    dh = e // num_heads
    c = _LOG2E / math.sqrt(dh)                       # scale folded into Wq
    w_qkv = jnp.concatenate([wq * c, wk, wv], axis=1).astype(compute_dtype)  # (E, 3E)
    wo_hde = wo.reshape(num_heads, dh, e).astype(compute_dtype)              # (H, Dh, E)
    bo_2d = bo.reshape(1, e).astype(jnp.float32)
    return w_qkv, wo_hde, bo_2d


def mha_forward(x, params, num_heads, *, block_t=256, block_rows=256):
    w_qkv, wo_hde, bo_2d = params
    q, k, v = _qkv_projection(x.astype(jnp.bfloat16), w_qkv,
                              num_heads=num_heads, block_rows=block_rows)
    return _flash_attention(q, k, v, wo_hde, bo_2d,
                            block_t=block_t, out_dtype=x.dtype)


def multi_head_attention(x, wq, wk, wv, wo, bo, num_heads, *,
                         block_t=256, block_rows=256):
    params = prepare_mha_params(wq, wk, wv, wo, bo, num_heads)
    return mha_forward(x, params, num_heads, block_t=block_t,
                       block_rows=block_rows)


def mha_reference(x, wq, wk, wv, wo, bo, num_heads):
    """Pure-JAX f32 reference mirroring the PyTorch forward."""
    b, t, e = x.shape
    dh = e // num_heads
    q = (x @ wq).reshape(b, t, num_heads, dh).transpose(0, 2, 1, 3)
    k = (x @ wk).reshape(b, t, num_heads, dh).transpose(0, 2, 1, 3)
    v = (x @ wv).reshape(b, t, num_heads, dh).transpose(0, 2, 1, 3)
    s = jnp.einsum("bhqd,bhkd->bhqk", q, k) / (dh ** 0.5)
    mask = jnp.tril(jnp.ones((t, t), bool))
    s = jnp.where(mask, s, -jnp.inf)
    p = jax.nn.softmax(s, axis=-1)
    o = jnp.einsum("bhqk,bhkd->bhqd", p, v)
    o = o.transpose(0, 2, 1, 3).reshape(b, t, e)
    return o @ wo + bo


if __name__ == "__main__":
    # Module config at a small batch: emb_dim=384, n_heads=6, context_length=256.
    B, E, H = 2, 384, 6
    key = jax.random.PRNGKey(0)
    kx1, kx2, k1, k2, k3, k4, k5 = jax.random.split(key, 7)

    wq = jax.random.normal(k1, (E, E), jnp.float32) * 0.02   # (in, out), qkv_bias=False
    wk = jax.random.normal(k2, (E, E), jnp.float32) * 0.02
    wv = jax.random.normal(k3, (E, E), jnp.float32) * 0.02
    wo = jax.random.normal(k4, (E, E), jnp.float32) * 0.02
    bo = jax.random.normal(k5, (E,), jnp.float32) * 0.02     # linear_layer has bias

    # (T, block_t) cases:
    #   (256, 128): triangular schedule, exercises first/diag/off-diag-first
    #   (256, 256): single fused diagonal tile (v6e/v7x default tile size)
    #   (512, 128): also exercises the non-first off-diagonal rescale branch
    cases = [(256, 128), (256, 256), (512, 128)]
    xs = {256: jax.random.normal(kx1, (B, 256, E), jnp.float32),
          512: jax.random.normal(kx2, (B, 512, E), jnp.float32)}

    for T, bt in cases:
        x = xs[T]
        out = multi_head_attention(x, wq, wk, wv, wo, bo, H, block_t=bt)
        out = jax.block_until_ready(out)
        ref = mha_reference(x, wq, wk, wv, wo, bo, H)
        assert out.shape == (B, T, E)
        err = float(jnp.max(jnp.abs(out - ref)))
        assert jnp.allclose(out, ref, atol=2e-2, rtol=2e-2), (
            f"mismatch vs reference (T={T}, block_t={bt}): max abs err = {err}")
    print("KERNEL_OK")
</pallas_src>

<mosaic_0001>
module attributes {stable_mosaic.version = 11 : i64} {
  func.func @_qkv_proj_kernel(%arg0: i32, %arg1: i32, %arg2: memref<1x256x384xbf16, #tpu.memory_space<vmem>>, %arg3: memref<384x1152xbf16, #tpu.memory_space<vmem>>, %arg4: memref<1x6x256x64xbf16, #tpu.memory_space<vmem>>, %arg5: memref<1x6x64x256xbf16, #tpu.memory_space<vmem>>, %arg6: memref<1x6x256x64xbf16, #tpu.memory_space<vmem>>) attributes {dimension_semantics = [#tpu.dimension_semantics<parallel>, #tpu.dimension_semantics<parallel>], iteration_bounds = array<i64: 2, 1>, scalar_prefetch = 0 : i64, scratch_operands = 0 : i64, tpu.core_type = #tpu.core_type<tc>, window_params = [{transform_indices = @transform_0, window_bounds = array<i64: 1, 256, 384>}, {pipeline_mode = #tpu.pipeline_mode<synchronous>, transform_indices = @transform_1, window_bounds = array<i64: 384, 1152>}, {transform_indices = @transform_2, window_bounds = array<i64: 1, 6, 256, 64>}, {transform_indices = @transform_3, window_bounds = array<i64: 1, 6, 64, 256>}, {transform_indices = @transform_4, window_bounds = array<i64: 1, 6, 256, 64>}]} {
    %c0 = arith.constant 0 : index
    %c0_0 = arith.constant 0 : index
    %c0_1 = arith.constant 0 : index
    %0 = vector.load %arg2[%c0, %c0_0, %c0_1] : memref<1x256x384xbf16, #tpu.memory_space<vmem>>, vector<1x256x384xbf16>
    %1 = vector.shape_cast %0 : vector<1x256x384xbf16> to vector<256x384xbf16>
    %c0_2 = arith.constant 0 : index
    %c0_3 = arith.constant 0 : index
    %2 = vector.load %arg3[%c0_2, %c0_3] : memref<384x1152xbf16, #tpu.memory_space<vmem>>, vector<384x1152xbf16>
    %cst = arith.constant dense<0.000000e+00> : vector<256x1152xf32>
    %3 = tpu.matmul %1, %2, %cst {dimension_numbers = #tpu.dot_dimension_numbers<[1], [0], [0], [1], [0, 0, 1, 1], [], []>} : vector<256x384xbf16>, vector<384x1152xbf16>, vector<256x1152xf32> -> vector<256x1152xf32>
    %4 = vector.extract_strided_slice %3 {offsets = [0, 0], sizes = [256, 64], strides = [1, 1]} : vector<256x1152xf32> to vector<256x64xf32>
    %5 = arith.truncf %4 : vector<256x64xf32> to vector<256x64xbf16>
    %c0_4 = arith.constant 0 : index
    %c0_5 = arith.constant 0 : index
    %c0_6 = arith.constant 0 : index
    %c0_7 = arith.constant 0 : index
    %6 = vector.load %arg4[%c0_4, %c0_5, %c0_6, %c0_7] : memref<1x6x256x64xbf16, #tpu.memory_space<vmem>>, vector<1x1x256x64xbf16>
    %7 = vector.shape_cast %6 : vector<1x1x256x64xbf16> to vector<256x64xbf16>
    %8 = vector.shape_cast %5 : vector<256x64xbf16> to vector<1x1x256x64xbf16>
    tpu.vector_store %arg4[%c0_4, %c0_5, %c0_6, %c0_7], %8 {strides = array<i32>} : memref<1x6x256x64xbf16, #tpu.memory_space<vmem>>, vector<1x1x256x64xbf16>,
    %9 = vector.extract_strided_slice %3 {offsets = [0, 384], sizes = [256, 64], strides = [1, 1]} : vector<256x1152xf32> to vector<256x64xf32>
    %10 = tpu.transpose %9, [1, 0] : vector<256x64xf32> -> vector<64x256xf32>
    %11 = arith.truncf %10 : vector<64x256xf32> to vector<64x256xbf16>
    %c0_8 = arith.constant 0 : index
    %c0_9 = arith.constant 0 : index
    %c0_10 = arith.constant 0 : index
    %c0_11 = arith.constant 0 : index
    %12 = vector.load %arg5[%c0_8, %c0_9, %c0_10, %c0_11] : memref<1x6x64x256xbf16, #tpu.memory_space<vmem>>, vector<1x1x64x256xbf16>
    %13 = vector.shape_cast %12 : vector<1x1x64x256xbf16> to vector<64x256xbf16>
    %14 = vector.shape_cast %11 : vector<64x256xbf16> to vector<1x1x64x256xbf16>
    tpu.vector_store %arg5[%c0_8, %c0_9, %c0_10, %c0_11], %14 {strides = array<i32>} : memref<1x6x64x256xbf16, #tpu.memory_space<vmem>>, vector<1x1x64x256xbf16>,
    %15 = vector.extract_strided_slice %3 {offsets = [0, 768], sizes = [256, 64], strides = [1, 1]} : vector<256x1152xf32> to vector<256x64xf32>
    %16 = arith.truncf %15 : vector<256x64xf32> to vector<256x64xbf16>
    %c0_12 = arith.constant 0 : index
    %c0_13 = arith.constant 0 : index
    %c0_14 = arith.constant 0 : index
    %c0_15 = arith.constant 0 : index
    %17 = vector.load %arg6[%c0_12, %c0_13, %c0_14, %c0_15] : memref<1x6x256x64xbf16, #tpu.memory_space<vmem>>, vector<1x1x256x64xbf16>
    %18 = vector.shape_cast %17 : vector<1x1x256x64xbf16> to vector<256x64xbf16>
    %19 = vector.shape_cast %16 : vector<256x64xbf16> to vector<1x1x256x64xbf16>
    tpu.vector_store %arg6[%c0_12, %c0_13, %c0_14, %c0_15], %19 {strides = array<i32>} : memref<1x6x256x64xbf16, #tpu.memory_space<vmem>>, vector<1x1x256x64xbf16>,
    %20 = vector.extract_strided_slice %3 {offsets = [0, 64], sizes = [256, 64], strides = [1, 1]} : vector<256x1152xf32> to vector<256x64xf32>
    %21 = arith.truncf %20 : vector<256x64xf32> to vector<256x64xbf16>
    %c0_16 = arith.constant 0 : index
    %c1 = arith.constant 1 : index
    %c0_17 = arith.constant 0 : index
    %c0_18 = arith.constant 0 : index
    %22 = vector.load %arg4[%c0_16, %c1, %c0_17, %c0_18] : memref<1x6x256x64xbf16, #tpu.memory_space<vmem>>, vector<1x1x256x64xbf16>
    %23 = vector.shape_cast %22 : vector<1x1x256x64xbf16> to vector<256x64xbf16>
    %24 = vector.shape_cast %21 : vector<256x64xbf16> to vector<1x1x256x64xbf16>
    tpu.vector_store %arg4[%c0_16, %c1, %c0_17, %c0_18], %24 {strides = array<i32>} : memref<1x6x256x64xbf16, #tpu.memory_space<vmem>>, vector<1x1x256x64xbf16>,
    %25 = vector.extract_strided_slice %3 {offsets = [0, 448], sizes = [256, 64], strides = [1, 1]} : vector<256x1152xf32> to vector<256x64xf32>
    %26 = tpu.transpose %25, [1, 0] : vector<256x64xf32> -> vector<64x256xf32>
    %27 = arith.truncf %26 : vector<64x256xf32> to vector<64x256xbf16>
    %c0_19 = arith.constant 0 : index
    %c1_20 = arith.constant 1 : index
    %c0_21 = arith.constant 0 : index
    %c0_22 = arith.constant 0 : index
    %28 = vector.load %arg5[%c0_19, %c1_20, %c0_21, %c0_22] : memref<1x6x64x256xbf16, #tpu.memory_space<vmem>>, vector<1x1x64x256xbf16>
    %29 = vector.shape_cast %28 : vector<1x1x64x256xbf16> to vector<64x256xbf16>
    %30 = vector.shape_cast %27 : vector<64x256xbf16> to vector<1x1x64x256xbf16>
    tpu.vector_store %arg5[%c0_19, %c1_20, %c0_21, %c0_22], %30 {strides = array<i32>} : memref<1x6x64x256xbf16, #tpu.memory_space<vmem>>, vector<1x1x64x256xbf16>,
    %31 = vector.extract_strided_slice %3 {offsets = [0, 832], sizes = [256, 64], strides = [1, 1]} : vector<256x1152xf32> to vector<256x64xf32>
    %32 = arith.truncf %31 : vector<256x64xf32> to vector<256x64xbf16>
    %c0_23 = arith.constant 0 : index
    %c1_24 = arith.constant 1 : index
    %c0_25 = arith.constant 0 : index
    %c0_26 = arith.constant 0 : index
    %33 = vector.load %arg6[%c0_23, %c1_24, %c0_25, %c0_26] : memref<1x6x256x64xbf16, #tpu.memory_space<vmem>>, vector<1x1x256x64xbf16>
    %34 = vector.shape_cast %33 : vector<1x1x256x64xbf16> to vector<256x64xbf16>
    %35 = vector.shape_cast %32 : vector<256x64xbf16> to vector<1x1x256x64xbf16>
    tpu.vector_store %arg6[%c0_23, %c1_24, %c0_25, %c0_26], %35 {strides = array<i32>} : memref<1x6x256x64xbf16, #tpu.memory_space<vmem>>, vector<1x1x256x64xbf16>,
    %36 = vector.extract_strided_slice %3 {offsets = [0, 128], sizes = [256, 64], strides = [1, 1]} : vector<256x1152xf32> to vector<256x64xf32>
    %37 = arith.truncf %36 : vector<256x64xf32> to vector<256x64xbf16>
    %c0_27 = arith.constant 0 : index
    %c2 = arith.constant 2 : index
    %c0_28 = arith.constant 0 : index
    %c0_29 = arith.constant 0 : index
    %38 = vector.load %arg4[%c0_27, %c2, %c0_28, %c0_29] : memref<1x6x256x64xbf16, #tpu.memory_space<vmem>>, vector<1x1x256x64xbf16>
    %39 = vector.shape_cast %38 : vector<1x1x256x64xbf16> to vector<256x64xbf16>
    %40 = vector.shape_cast %37 : vector<256x64xbf16> to vector<1x1x256x64xbf16>
    tpu.vector_store %arg4[%c0_27, %c2, %c0_28, %c0_29], %40 {strides = array<i32>} : memref<1x6x256x64xbf16, #tpu.memory_space<vmem>>, vector<1x1x256x64xbf16>,
    %41 = vector.extract_strided_slice %3 {offsets = [0, 512], sizes = [256, 64], strides = [1, 1]} : vector<256x1152xf32> to vector<256x64xf32>
    %42 = tpu.transpose %41, [1, 0] : vector<256x64xf32> -> vector<64x256xf32>
    %43 = arith.truncf %42 : vector<64x256xf32> to vector<64x256xbf16>
    %c0_30 = arith.constant 0 : index
    %c2_31 = arith.constant 2 : index
    %c0_32 = arith.constant 0 : index
    %c0_33 = arith.constant 0 : index
    %44 = vector.load %arg5[%c0_30, %c2_31, %c0_32, %c0_33] : memref<1x6x64x256xbf16, #tpu.memory_space<vmem>>, vector<1x1x64x256xbf16>
    %45 = vector.shape_cast %44 : vector<1x1x64x256xbf16> to vector<64x256xbf16>
    %46 = vector.shape_cast %43 : vector<64x256xbf16> to vector<1x1x64x256xbf16>
    tpu.vector_store %arg5[%c0_30, %c2_31, %c0_32, %c0_33], %46 {strides = array<i32>} : memref<1x6x64x256xbf16, #tpu.memory_space<vmem>>, vector<1x1x64x256xbf16>,
    %47 = vector.extract_strided_slice %3 {offsets = [0, 896], sizes = [256, 64], strides = [1, 1]} : vector<256x1152xf32> to vector<256x64xf32>
    %48 = arith.truncf %47 : vector<256x64xf32> to vector<256x64xbf16>
    %c0_34 = arith.constant 0 : index
    %c2_35 = arith.constant 2 : index
    %c0_36 = arith.constant 0 : index
    %c0_37 = arith.constant 0 : index
    %49 = vector.load %arg6[%c0_34, %c2_35, %c0_36, %c0_37] : memref<1x6x256x64xbf16, #tpu.memory_space<vmem>>, vector<1x1x256x64xbf16>
    %50 = vector.shape_cast %49 : vector<1x1x256x64xbf16> to vector<256x64xbf16>
    %51 = vector.shape_cast %48 : vector<256x64xbf16> to vector<1x1x256x64xbf16>
    tpu.vector_store %arg6[%c0_34, %c2_35, %c0_36, %c0_37], %51 {strides = array<i32>} : memref<1x6x256x64xbf16, #tpu.memory_space<vmem>>, vector<1x1x256x64xbf16>,
    %52 = vector.extract_strided_slice %3 {offsets = [0, 192], sizes = [256, 64], strides = [1, 1]} : vector<256x1152xf32> to vector<256x64xf32>
    %53 = arith.truncf %52 : vector<256x64xf32> to vector<256x64xbf16>
    %c0_38 = arith.constant 0 : index
    %c3 = arith.constant 3 : index
    %c0_39 = arith.constant 0 : index
    %c0_40 = arith.constant 0 : index
    %54 = vector.load %arg4[%c0_38, %c3, %c0_39, %c0_40] : memref<1x6x256x64xbf16, #tpu.memory_space<vmem>>, vector<1x1x256x64xbf16>
    %55 = vector.shape_cast %54 : vector<1x1x256x64xbf16> to vector<256x64xbf16>
    %56 = vector.shape_cast %53 : vector<256x64xbf16> to vector<1x1x256x64xbf16>
    tpu.vector_store %arg4[%c0_38, %c3, %c0_39, %c0_40], %56 {strides = array<i32>} : memref<1x6x256x64xbf16, #tpu.memory_space<vmem>>, vector<1x1x256x64xbf16>,
    %57 = vector.extract_strided_slice %3 {offsets = [0, 576], sizes = [256, 64], strides = [1, 1]} : vector<256x1152xf32> to vector<256x64xf32>
    %58 = tpu.transpose %57, [1, 0] : vector<256x64xf32> -> vector<64x256xf32>
    %59 = arith.truncf %58 : vector<64x256xf32> to vector<64x256xbf16>
    %c0_41 = arith.constant 0 : index
    %c3_42 = arith.constant 3 : index
    %c0_43 = arith.constant 0 : index
    %c0_44 = arith.constant 0 : index
    %60 = vector.load %arg5[%c0_41, %c3_42, %c0_43, %c0_44] : memref<1x6x64x256xbf16, #tpu.memory_space<vmem>>, vector<1x1x64x256xbf16>
    %61 = vector.shape_cast %60 : vector<1x1x64x256xbf16> to vector<64x256xbf16>
    %62 = vector.shape_cast %59 : vector<64x256xbf16> to vector<1x1x64x256xbf16>
    tpu.vector_store %arg5[%c0_41, %c3_42, %c0_43, %c0_44], %62 {strides = array<i32>} : memref<1x6x64x256xbf16, #tpu.memory_space<vmem>>, vector<1x1x64x256xbf16>,
    %63 = vector.extract_strided_slice %3 {offsets = [0, 960], sizes = [256, 64], strides = [1, 1]} : vector<256x1152xf32> to vector<256x64xf32>
    %64 = arith.truncf %63 : vector<256x64xf32> to vector<256x64xbf16>
    %c0_45 = arith.constant 0 : index
    %c3_46 = arith.constant 3 : index
    %c0_47 = arith.constant 0 : index
    %c0_48 = arith.constant 0 : index
    %65 = vector.load %arg6[%c0_45, %c3_46, %c0_47, %c0_48] : memref<1x6x256x64xbf16, #tpu.memory_space<vmem>>, vector<1x1x256x64xbf16>
    %66 = vector.shape_cast %65 : vector<1x1x256x64xbf16> to vector<256x64xbf16>
    %67 = vector.shape_cast %64 : vector<256x64xbf16> to vector<1x1x256x64xbf16>
    tpu.vector_store %arg6[%c0_45, %c3_46, %c0_47, %c0_48], %67 {strides = array<i32>} : memref<1x6x256x64xbf16, #tpu.memory_space<vmem>>, vector<1x1x256x64xbf16>,
    %68 = vector.extract_strided_slice %3 {offsets = [0, 256], sizes = [256, 64], strides = [1, 1]} : vector<256x1152xf32> to vector<256x64xf32>
    %69 = arith.truncf %68 : vector<256x64xf32> to vector<256x64xbf16>
    %c0_49 = arith.constant 0 : index
    %c4 = arith.constant 4 : index
    %c0_50 = arith.constant 0 : index
    %c0_51 = arith.constant 0 : index
    %70 = vector.load %arg4[%c0_49, %c4, %c0_50, %c0_51] : memref<1x6x256x64xbf16, #tpu.memory_space<vmem>>, vector<1x1x256x64xbf16>
    %71 = vector.shape_cast %70 : vector<1x1x256x64xbf16> to vector<256x64xbf16>
    %72 = vector.shape_cast %69 : vector<256x64xbf16> to vector<1x1x256x64xbf16>
    tpu.vector_store %arg4[%c0_49, %c4, %c0_50, %c0_51], %72 {strides = array<i32>} : memref<1x6x256x64xbf16, #tpu.memory_space<vmem>>, vector<1x1x256x64xbf16>,
    %73 = vector.extract_strided_slice %3 {offsets = [0, 640], sizes = [256, 64], strides = [1, 1]} : vector<256x1152xf32> to vector<256x64xf32>
    %74 = tpu.transpose %73, [1, 0] : vector<256x64xf32> -> vector<64x256xf32>
    %75 = arith.truncf %74 : vector<64x256xf32> to vector<64x256xbf16>
    %c0_52 = arith.constant 0 : index
    %c4_53 = arith.constant 4 : index
    %c0_54 = arith.constant 0 : index
    %c0_55 = arith.constant 0 : index
    %76 = vector.load %arg5[%c0_52, %c4_53, %c0_54, %c0_55] : memref<1x6x64x256xbf16, #tpu.memory_space<vmem>>, vector<1x1x64x256xbf16>
    %77 = vector.shape_cast %76 : vector<1x1x64x256xbf16> to vector<64x256xbf16>
    %78 = vector.shape_cast %75 : vector<64x256xbf16> to vector<1x1x64x256xbf16>
    tpu.vector_store %arg5[%c0_52, %c4_53, %c0_54, %c0_55], %78 {strides = array<i32>} : memref<1x6x64x256xbf16, #tpu.memory_space<vmem>>, vector<1x1x64x256xbf16>,
    %79 = vector.extract_strided_slice %3 {offsets = [0, 1024], sizes = [256, 64], strides = [1, 1]} : vector<256x1152xf32> to vector<256x64xf32>
    %80 = arith.truncf %79 : vector<256x64xf32> to vector<256x64xbf16>
    %c0_56 = arith.constant 0 : index
    %c4_57 = arith.constant 4 : index
    %c0_58 = arith.constant 0 : index
    %c0_59 = arith.constant 0 : index
    %81 = vector.load %arg6[%c0_56, %c4_57, %c0_58, %c0_59] : memref<1x6x256x64xbf16, #tpu.memory_space<vmem>>, vector<1x1x256x64xbf16>
    %82 = vector.shape_cast %81 : vector<1x1x256x64xbf16> to vector<256x64xbf16>
    %83 = vector.shape_cast %80 : vector<256x64xbf16> to vector<1x1x256x64xbf16>
    tpu.vector_store %arg6[%c0_56, %c4_57, %c0_58, %c0_59], %83 {strides = array<i32>} : memref<1x6x256x64xbf16, #tpu.memory_space<vmem>>, vector<1x1x256x64xbf16>,
    %84 = vector.extract_strided_slice %3 {offsets = [0, 320], sizes = [256, 64], strides = [1, 1]} : vector<256x1152xf32> to vector<256x64xf32>
    %85 = arith.truncf %84 : vector<256x64xf32> to vector<256x64xbf16>
    %c0_60 = arith.constant 0 : index
    %c5 = arith.constant 5 : index
    %c0_61 = arith.constant 0 : index
    %c0_62 = arith.constant 0 : index
    %86 = vector.load %arg4[%c0_60, %c5, %c0_61, %c0_62] : memref<1x6x256x64xbf16, #tpu.memory_space<vmem>>, vector<1x1x256x64xbf16>
    %87 = vector.shape_cast %86 : vector<1x1x256x64xbf16> to vector<256x64xbf16>
    %88 = vector.shape_cast %85 : vector<256x64xbf16> to vector<1x1x256x64xbf16>
    tpu.vector_store %arg4[%c0_60, %c5, %c0_61, %c0_62], %88 {strides = array<i32>} : memref<1x6x256x64xbf16, #tpu.memory_space<vmem>>, vector<1x1x256x64xbf16>,
    %89 = vector.extract_strided_slice %3 {offsets = [0, 704], sizes = [256, 64], strides = [1, 1]} : vector<256x1152xf32> to vector<256x64xf32>
    %90 = tpu.transpose %89, [1, 0] : vector<256x64xf32> -> vector<64x256xf32>
    %91 = arith.truncf %90 : vector<64x256xf32> to vector<64x256xbf16>
    %c0_63 = arith.constant 0 : index
    %c5_64 = arith.constant 5 : index
    %c0_65 = arith.constant 0 : index
    %c0_66 = arith.constant 0 : index
    %92 = vector.load %arg5[%c0_63, %c5_64, %c0_65, %c0_66] : memref<1x6x64x256xbf16, #tpu.memory_space<vmem>>, vector<1x1x64x256xbf16>
    %93 = vector.shape_cast %92 : vector<1x1x64x256xbf16> to vector<64x256xbf16>
    %94 = vector.shape_cast %91 : vector<64x256xbf16> to vector<1x1x64x256xbf16>
    tpu.vector_store %arg5[%c0_63, %c5_64, %c0_65, %c0_66], %94 {strides = array<i32>} : memref<1x6x64x256xbf16, #tpu.memory_space<vmem>>, vector<1x1x64x256xbf16>,
    %95 = vector.extract_strided_slice %3 {offsets = [0, 1088], sizes = [256, 64], strides = [1, 1]} : vector<256x1152xf32> to vector<256x64xf32>
    %96 = arith.truncf %95 : vector<256x64xf32> to vector<256x64xbf16>
    %c0_67 = arith.constant 0 : index
    %c5_68 = arith.constant 5 : index
    %c0_69 = arith.constant 0 : index
    %c0_70 = arith.constant 0 : index
    %97 = vector.load %arg6[%c0_67, %c5_68, %c0_69, %c0_70] : memref<1x6x256x64xbf16, #tpu.memory_space<vmem>>, vector<1x1x256x64xbf16>
    %98 = vector.shape_cast %97 : vector<1x1x256x64xbf16> to vector<256x64xbf16>
    %99 = vector.shape_cast %96 : vector<256x64xbf16> to vector<1x1x256x64xbf16>
    tpu.vector_store %arg6[%c0_67, %c5_68, %c0_69, %c0_70], %99 {strides = array<i32>} : memref<1x6x256x64xbf16, #tpu.memory_space<vmem>>, vector<1x1x256x64xbf16>,
    return
  }
  func.func @transform_0(%arg0: i32, %arg1: i32) -> (i32, i32, i32) {
    %c0_i32 = arith.constant 0 : i32
    %c0_i32_0 = arith.constant 0 : i32
    return %arg0, %arg1, %c0_i32 : i32, i32, i32
  }
  func.func @transform_1(%arg0: i32, %arg1: i32) -> (i32, i32) {
    %c0_i32 = arith.constant 0 : i32
    %c0_i32_0 = arith.constant 0 : i32
    %c0_i32_1 = arith.constant 0 : i32
    return %c0_i32, %c0_i32_0 : i32, i32
  }
  func.func @transform_2(%arg0: i32, %arg1: i32) -> (i32, i32, i32, i32) {
    %c0_i32 = arith.constant 0 : i32
    %c0_i32_0 = arith.constant 0 : i32
    %c0_i32_1 = arith.constant 0 : i32
    return %arg0, %c0_i32, %arg1, %c0_i32_0 : i32, i32, i32, i32
  }
  func.func @transform_3(%arg0: i32, %arg1: i32) -> (i32, i32, i32, i32) {
    %c0_i32 = arith.constant 0 : i32
    %c0_i32_0 = arith.constant 0 : i32
    %c0_i32_1 = arith.constant 0 : i32
    return %arg0, %c0_i32, %c0_i32_0, %arg1 : i32, i32, i32, i32
  }
  func.func @transform_4(%arg0: i32, %arg1: i32) -> (i32, i32, i32, i32) {
    %c0_i32 = arith.constant 0 : i32
    %c0_i32_0 = arith.constant 0 : i32
    %c0_i32_1 = arith.constant 0 : i32
    return %arg0, %c0_i32, %arg1, %c0_i32_0 : i32, i32, i32, i32
  }
}

</mosaic_0001>

<bundles_post_ra>
// kernel: tpu_custom_call.1
= control target key start
LH: loop header
LB: loop body
LE: loop exit
PB: predicated region body
PF: predicated region fallthrough
CT: control target
= control target key end

     0   :  { %10 = vsyncpa [#allocation3], 0  ;;  %s13242_s0 = inlined_call_operand.hbm [shape: bf16[2,256,384], index: 0, kind: input, shape index: {}]   ;;  %s13243_s1 = inlined_call_operand.hbm [shape: bf16[384,1152], index: 1, kind: input, shape index: {}]   ;;  %s13244_s2 = inlined_call_operand.vmem [shape: bf16[2,6,256,64], index: 2, kind: output, shape index: {0}]   ;;  %s13245_s3 = inlined_call_operand.hbm [shape: bf16[2,6,64,256], index: 3, kind: output, shape index: {1}]   ;;  %s13246_s4 = inlined_call_operand.vmem [shape: bf16[2,6,256,64], index: 4, kind: output, shape index: {2}]  }
   0x1   :  { %12 = vsyncpa [#allocation3 + $0x1], 0 }
   0x2   :  { %13 = vsyncpa [#allocation6], 0 }
   0x3   :  { %14 = vsyncpa [#allocation4], 0 }
   0x4   :  { %16 = vsyncpa [#allocation4 + $0x1], 0  ;;  %s9899_s15 = smov 0   ;;  %s9901_s16 = smov 0  }
   0x5   :  { %s9903_s17 = smov 0   ;;  %s9905_s18 = smov 0  }
   0x6   :  { %s9907_s19 = smov 0   ;;  %s9909_s20 = smov 0  }
   0x7 LB: > { %s6891_s21 = sadd.s32 4294967295, %s9861_s20   ;;  %s6892_s22 = sadd.s32 4294967294, %s9861_s20   ;;  %s9861_s20 = sphi %s9909_s20, %s22_s20   ;;  %s9857_s19 = sphi %s9907_s19, %s13684_s19   ;;  %s9853_s18 = sphi %s9905_s18, %s13683_s18   ;;  %s9849_s17 = sphi %s9903_s17, %s13682_s17   ;;  %s9845_s16 = sphi %s9901_s16, %s13681_s16   ;;  %s9841_s15 = sphi %s9899_s15, %s13680_s15  }
   0x8   : > { %p56_p0 = scmp.ne.s32.totalorder %s9845_s16, %s9841_s15  ;;  %p9933_p1 = scmp.eq.s32.totalorder %s6891_s21, 0 }
   0x9   : > { %p9937_p2 = scmp.eq.s32.totalorder %s6891_s21, 1  ;;  %p137_p3 = scmp.eq.s32.totalorder %s6892_s22, 1 }
   0xa   : > { %s13373_s23 = scalar_select %p9933_p1, 1, 0 }
   0xb   : > { %s13374_s24 = scalar_select %p9937_p2, 1, 0 }
   0xc   : > { %p9943_p4 = por %p9933_p1, %p56_p0  ;;  %p6893_p5 = scmp.ge.s32.totalorder %s9861_s20, 1 }
   0xd   : > { %p9948_p6 = por %p137_p3, %p56_p0  ;;  %p172_p7 = scmp.lt.s32.totalorder %s9861_s20, 3 }
   0xe   : > { %s13375_s25 = scalar_select %p9943_p4, 1, 0 }
   0xf   : > { %s13376_s26 = scalar_select %p9948_p6, 1, 0 }
  0x10   : > { %p9953_p8 = pnand %p6893_p5, %p172_p7  ;;  %s9863_s28 = smov [#allocation5]  }
  0x11   : > { %s184_s29 = sshll.u32 %s9863_s28, 4  ;;  %s34_s5 = sadd.s32 1, %s9857_s19  ;;  %s185_s29 = int_to_ptr.vmem [resolvable:$true] %s184_s29 }
  0x12   : > { %s13377_s27 = scalar_select %p9953_p8, 1, 0 }
  0x13   : > { %p8493_p9 = pneg %p9953_p8  ;;  %s9717_s8 = scalar_lea.hbm %s13243_s1, 27648 }
  0x14   : > { %p9718_p12 = scmp.ne.s32.totalorder %s13243_s1, %s9717_s8  ;;  %p9724_p5 = scmp.lt.u32.totalorder %s9717_s8, %s13243_s1 }
  0x15   : > { %p9962_p11 = pnand %p8493_p9, %p9933_p1 }
  0x17   : > { %p9719_p13 = pneg %p9962_p11 }
  0x19   : > { %p9720_p0 = pnand %p9719_p13, %p9718_p12 }
  0x1b   : > { %p9721_p3 = pneg %p9720_p0 }
  0x1d   : > { %p9726_p7 = pnand %p9724_p5, %p9721_p3 }
  0x1f   : > { %9729 = shalt.err (!%p9726_p7)
}
  0x20   : > { %s9730_s13 = scalar_lea.vmem %s185_s29, 27648  ;;  %p9738_p1 = scmp.lt.s32.totalorder %s185_s29, %s185_s29 }
  0x21   : > { %p9731_p9 = scmp.ne.s32.totalorder %s185_s29, %s9730_s13  ;;  %p9739_p4 = scmp.lt.s32.totalorder %s9730_s13, %s9730_s13 }
  0x23   : > { %p9733_p10 = pnand %p9731_p9, %p9719_p13  ;;  %p9740_p8 = por %p9739_p4, %p9738_p1 }
  0x25   : > { %p9734_p6 = pneg %p9733_p10 }
  0x27   : > { %p9741_p2 = pnand %p9740_p8, %p9734_p6 }
  0x29   : > { %9744 = shalt.err (!%p9741_p2)
}
  0x2a   : > { %s9864_s14 = smov 576   ;;  %s9865_s21 = smov 36  }
  0x2b   : > { %8496 = dma.hbm_to_vmem [thread:$0]  (!%p9962_p11), %s13243_s1, 27648, %s185_s29, [#allocation6], %s9864_s14, %s9864_s14, %s9865_s21  }
  0x2c   : > { %p36_p1 = scmp.ge.s32.totalorder %s34_s5, 2  ;;  %s43_s6 = sadd.s32 1, %s9849_s17 }
  0x2d   : > { %p50_p2 = scmp.ne.s32.totalorder %s9849_s17, %s9845_s16  ;;  %p51_p4 = scmp.eq.s32.totalorder %s9861_s20, 0 }
  0x2e   : > { %s13686_s5 = smov (%p36_p1, %s34_s5), 0  ;;  %p13379_p8 = scmp.ne.s32.totalorder %s13374_s24, 0 }
  0x2f   : > { %p52_p6 = por %p51_p4, %p50_p2  ;;  %s38_s8 = ssub.s32 %s9857_s19, %s13686_s5 }
  0x30   : > { %p9991_p10 = por %p13379_p8, %p50_p2  ;;  %p8506_p12 = scmp.lt.s32.totalorder %s9861_s20, 2 }
  0x31   : > { %p41_p13 = scmp.eq.s32.totalorder %s38_s8, 0  ;;  %s198_s30 = sand.u32 1, %s9849_s17  }
  0x32   : > { %s8480_s9 = smul.u32 384, %s198_s30  ;;  %p10003_p11 = pnand %p8506_p12, %p52_p6 }
  0x33   : > { %s10000_s10 = scalar_select %p41_p13, %s9849_s17, %s43_s6  }
  0x34   : > { %s8481_s29 = smul.u32 6144, %s9857_s19  ;;  %s202_s11 = scalar_lea.vmem [#allocation2], %s8480_s9 }
  0x35   : > { %s212_s12 = sshll.u32 %s202_s11, 4  ;;  %s10014_s22 = scalar_lea.sflag [#allocation3], %s198_s30  ;;  %s10012_s12 = int_to_ptr.vmem [resolvable:$true] %s212_s12 }
  0x36   : > { %s10010_s21 = scalar_lea.hbm %s13242_s0, %s8481_s29  ;;  %p9747_p3 = pneg %p10003_p11 }
  0x37   : > { %s9745_s28 = scalar_lea.hbm %s10010_s21, 6144  ;;  %s9750_s9 = scalar_lea.hbm %s13242_s0, 12288 }
  0x38   : > { %p9746_p0 = scmp.ne.s32.totalorder %s10010_s21, %s9745_s28  ;;  %p9751_p9 = scmp.lt.u32.totalorder %s10010_s21, %s13242_s0 }
  0x39   : > { %p9752_p1 = scmp.lt.u32.totalorder %s9750_s9, %s9745_s28  ;;  %p9754_p4 = scmp.lt.u32.totalorder %s9745_s28, %s10010_s21 }
  0x3a   : > { %p9748_p5 = pnand %p9747_p3, %p9746_p0 }
  0x3b   : > { %p9753_p2 = por %p9752_p1, %p9751_p9 }
  0x3c   : > { %p9749_p7 = pneg %p9748_p5 }
  0x3d   : > { %p9755_p6 = por %p9754_p4, %p9753_p2 }
  0x3f   : > { %p9756_p8 = pnand %p9755_p6, %p9749_p7 }
  0x41   : > { %9759 = shalt.err (!%p9756_p8)
}
  0x42   : > { %s9760_s30 = scalar_lea.vmem %s10012_s12, 6144  ;;  %s9866_s14 = smov [#allocation2]  }
  0x43   : > { %p9761_p12 = scmp.ne.s32.totalorder %s10012_s12, %s9760_s30  ;;  %s9765_s24 = sshll.u32 %s9866_s14, 4  ;;  %s9766_s24 = int_to_ptr.vmem [resolvable:$false] %s9765_s24 }
  0x44   : > { %s9767_s6 = scalar_lea.vmem %s9766_s24, 12288  ;;  %p9768_p5 = scmp.lt.s32.totalorder %s10012_s12, %s9766_s24 }
  0x45   : > { %p9763_p13 = pnand %p9761_p12, %p9747_p3  ;;  %p9769_p9 = scmp.lt.s32.totalorder %s9767_s6, %s9760_s30 }
  0x47   : > { %p9764_p0 = pneg %p9763_p13  ;;  %p9770_p1 = por %p9769_p9, %p9768_p5 }
  0x49   : > { %p9771_p2 = pnand %p9770_p1, %p9764_p0 }
  0x4b   : > { %9774 = shalt.err (!%p9771_p2)
}
  0x4c   : > { %s9867_s28 = smov 192   ;;  %s9868_s8 = smov 12  }
  0x4d   : > { %8500 = dma.hbm_to_vmem [thread:$0]  (!%p10003_p11), %s10010_s21, 6144, %s10012_s12, %s10014_s22, %s9867_s28, %s9867_s28, %s9868_s8  }
  0x4e   : > { %p13382_p3 = scmp.ne.s32.totalorder %s13377_s27, 0 }
  0x50   : > { %224 = sbr.rel (%p13382_p3) target bundleno = 1561 (0x619), region = 28 }
  0x57   : > { %s10045_s9 = sand.u32 1, %s9845_s16   ;;  %p13383_p7 = scmp.ne.s32.totalorder %s13375_s25, 0 }
  0x58   : > { %s8482_s29 = smul.u32 384, %s10045_s9  ;;  %s227_s11 = scalar_lea.sflag [#allocation3], %s10045_s9 }
  0x5a   : > { %s10051_s30 = scalar_lea.vmem [#allocation2], %s8482_s29 }
  0x5b   : > { %9828 = dma.done.wait (%p13383_p7), %s227_s11, 6144  }
  0x5c   : > { %9830 = vsyncadd (%p13383_p7), %s227_s11, 4294961152  ;;  %p13384_p11 = scmp.ne.s32.totalorder %s13373_s23, 0 }
  0x5e   : > { %9832 = dma.done.wait (%p13384_p11), [#allocation6], 27648  }
  0x5f   : > { %9834 = vsyncadd (%p13384_p11), [#allocation6], 4294939648  ;;  %v13254_v0 = vmov 0   ;;  %v9238_v1 = vld [vmem:[#allocation5 + $0x4] ss:$36 sps:$4 sm:$0xff]   ;;  %p279_p4 = scmp.lt.s32.totalorder %s9853_s18, 1 }
  0x60   : > { %2269 = vmatprep.mubr.bf16.mxu1 %v13254_v0  ;;  %v10062_v2 = vld [vmem:[#allocation5 + $0x484] ss:$36 sps:$4 sm:$0xff]   ;;  %1964 = vmatprep.subr.bf16.mxu0 %v9238_v1  ;;  %v9244_v5 = vld [vmem:[#allocation5 + $0x4c] ss:$36 sps:$4 sm:$0xff]   ;;  %v9250_v9 = vld [vmem:[#allocation5 + $0x94] ss:$36 sps:$4 sm:$0xff]  }
  0x61   : > { %v9242_v3 = vld [vmem:[#allocation5] ss:$36 sps:$4 sm:$0xff]   ;;  %8192 = vmatprep.subr.bf16.mxu1 %v10062_v2  ;;  %v10068_v6 = vld [vmem:[#allocation5 + $0x4cc] ss:$36 sps:$4 sm:$0xff]   ;;  %v10073_v10 = vld [vmem:[#allocation5 + $0x514] ss:$36 sps:$4 sm:$0xff]  }
  0x62   : > { %v10064_v4 = vld [vmem:[#allocation5 + $0x480] ss:$36 sps:$4 sm:$0xff]   ;;  %1965 = vmatpush1.bf16.msra.mxu0 %v9242_v3  ;;  %v9248_v7 = vld [vmem:[#allocation5 + $0x48] ss:$36 sps:$4 sm:$0xff]   ;;  %v9254_v11 = vld [vmem:[#allocation5 + $0x90] ss:$36 sps:$4 sm:$0xff]  }
  0x63   : > { %8200 = vmatpush1.bf16.msra.mxu1 %v10064_v4  ;;  %1966 = vmatprep.subr.bf16.mxu0 %v9244_v5  ;;  %v10070_v8 = vld [vmem:[#allocation5 + $0x4c8] ss:$36 sps:$4 sm:$0xff]   ;;  %v10075_v12 = vld [vmem:[#allocation5 + $0x510] ss:$36 sps:$4 sm:$0xff]   ;;  %v9256_v13 = vld [vmem:[#allocation5 + $0xdc] ss:$36 sps:$4 sm:$0xff]  }
  0x64   : > { %8193 = vmatprep.subr.bf16.mxu1 %v10068_v6  ;;  %v10079_v14 = vld [vmem:[#allocation5 + $0x55c] ss:$36 sps:$4 sm:$0xff]   ;;  %v9262_v17 = vld [vmem:[#allocation5 + $0x124] ss:$36 sps:$4 sm:$0xff]   ;;  %v9268_v21 = vld [vmem:[#allocation5 + $0x16c] ss:$36 sps:$4 sm:$0xff]  }
  0x65   : > { %v9260_v15 = vld [vmem:[#allocation5 + $0xd8] ss:$36 sps:$4 sm:$0xff]   ;;  %v10085_v18 = vld [vmem:[#allocation5 + $0x5a4] ss:$36 sps:$4 sm:$0xff]   ;;  %v10091_v22 = vld [vmem:[#allocation5 + $0x5ec] ss:$36 sps:$4 sm:$0xff]  }
  0x66   : > { %1967 = vmatpush1.bf16.msra.mxu0 %v9248_v7  ;;  %v10082_v16 = vld [vmem:[#allocation5 + $0x558] ss:$36 sps:$4 sm:$0xff]   ;;  %v9266_v19 = vld [vmem:[#allocation5 + $0x120] ss:$36 sps:$4 sm:$0xff]   ;;  %v9272_v23 = vld [vmem:[#allocation5 + $0x168] ss:$36 sps:$4 sm:$0xff]  }
  0x67   : > { %8201 = vmatpush1.bf16.msra.mxu1 %v10070_v8  ;;  %1968 = vmatprep.subr.bf16.mxu0 %v9250_v9  ;;  %v10087_v20 = vld [vmem:[#allocation5 + $0x5a0] ss:$36 sps:$4 sm:$0xff]   ;;  %v10094_v24 = vld [vmem:[#allocation5 + $0x5e8] ss:$36 sps:$4 sm:$0xff]   ;;  %v9274_v25 = vld [vmem:[#allocation5 + $0x1b4] ss:$36 sps:$4 sm:$0xff]  }
  0x68   : > { %8194 = vmatprep.subr.bf16.mxu1 %v10073_v10  ;;  %v10097_v26 = vld [vmem:[#allocation5 + $0x634] ss:$36 sps:$4 sm:$0xff]   ;;  %v9280_v29 = vld [vmem:[#allocation5 + $0x1fc] ss:$36 sps:$4 sm:$0xff]   ;;  %v9286_v33 = vld [vmem:[#allocation5 + $0x244] ss:$36 sps:$4 sm:$0xff]  }
  0x69   : > { %v9278_v27 = vld [vmem:[#allocation5 + $0x1b0] ss:$36 sps:$4 sm:$0xff]   ;;  %v10103_v30 = vld [vmem:[#allocation5 + $0x67c] ss:$36 sps:$4 sm:$0xff]   ;;  %v9289_v36 = vld [vmem:[#allocation5 + $0x8] ss:$36 sps:$4 sm:$0xff]  }
  0x6a   : > { %1969 = vmatpush1.bf16.msra.mxu0 %v9254_v11  ;;  %v10100_v28 = vld [vmem:[#allocation5 + $0x630] ss:$36 sps:$4 sm:$0xff]   ;;  %v9284_v31 = vld [vmem:[#allocation5 + $0x1f8] ss:$36 sps:$4 sm:$0xff]   ;;  %v9292_v37 = vld [vmem:[#allocation5 + $0x240] ss:$36 sps:$4 sm:$0xff]  }
  0x6b   : > { %8202 = vmatpush1.bf16.msra.mxu1 %v10075_v12  ;;  %1970 = vmatprep.subr.bf16.mxu0 %v9256_v13  ;;  %v10105_v32 = vld [vmem:[#allocation5 + $0x678] ss:$36 sps:$4 sm:$0xff]   ;;  %v9291_v34 = vld [vmem:[#allocation5 + $0xc] ss:$36 sps:$4 sm:$0xff]   ;;  %v9288_v35 = vld [vmem:[%s10051_s30 + $0xc8] ss:$12 sps:$4 sm:$0xff]  }
  0x6c   : > { %8195 = vmatprep.subr.bf16.mxu1 %v10079_v14  ;;  %v9293_v38 = vld [vmem:[#allocation5 + $0x28c] ss:$36 sps:$4 sm:$0xff]   ;;  %v9297_v39 = vld [vmem:[#allocation5 + $0x54] ss:$36 sps:$4 sm:$0xff]   ;;  %v9304_v43 = vld [vmem:[#allocation5 + $0x9c] ss:$36 sps:$4 sm:$0xff]  }
  0x6d   : > { %v9295_v40 = vld [vmem:[#allocation5 + $0x50] ss:$36 sps:$4 sm:$0xff]   ;;  %v9298_v41 = vld [vmem:[#allocation5 + $0x288] ss:$36 sps:$4 sm:$0xff]   ;;  %v9302_v45 = vld [vmem:[#allocation5 + $0x98] ss:$36 sps:$4 sm:$0xff]  }
  0x6e   : > { %1971 = vmatpush1.bf16.msra.mxu0 %v9260_v15  ;;  %v9299_v42 = vld [vmem:[#allocation5 + $0x2d4] ss:$36 sps:$4 sm:$0xff]   ;;  %v9301_v44 = vld [vmem:[%s10051_s30 + $0xe0] ss:$12 sps:$4 sm:$0xff]   ;;  %v9310_v48 = vld [vmem:[#allocation5 + $0xe4] ss:$36 sps:$4 sm:$0xff]  }
  0x6f   : > { %8203 = vmatpush1.bf16.msra.mxu1 %v10082_v16  ;;  %1972 = vmatprep.subr.bf16.mxu0 %v9262_v17  ;;  %v9305_v46 = vld [vmem:[#allocation5 + $0x2d0] ss:$36 sps:$4 sm:$0xff]   ;;  %v9306_v47 = vld [vmem:[#allocation5 + $0x31c] ss:$36 sps:$4 sm:$0xff]   ;;  %v9312_v51 = vld [vmem:[#allocation5 + $0x364] ss:$36 sps:$4 sm:$0xff]  }
  0x70   : > { %8196 = vmatprep.subr.bf16.mxu1 %v10085_v18  ;;  %v9308_v49 = vld [vmem:[#allocation5 + $0xe0] ss:$36 sps:$4 sm:$0xff]   ;;  %v9311_v50 = vld [vmem:[#allocation5 + $0x318] ss:$36 sps:$4 sm:$0xff]   ;;  %v9317_v52 = vld [vmem:[#allocation5 + $0x12c] ss:$36 sps:$4 sm:$0xff]  }
  0x71   : > { %v9314_v53 = vld [vmem:[%s10051_s30 + $0xf8] ss:$12 sps:$4 sm:$0xff]   ;;  %v9315_v54 = vld [vmem:[#allocation5 + $0x128] ss:$36 sps:$4 sm:$0xff]   ;;  %v9321_v59 = vld [vmem:[#allocation5 + $0x170] ss:$36 sps:$4 sm:$0xff]  }
  0x72   : > { %1973 = vmatpush1.bf16.msra.mxu0 %v9266_v19  ;;  %v9318_v55 = vld [vmem:[#allocation5 + $0x360] ss:$36 sps:$4 sm:$0xff]   ;;  %v9319_v57 = vld [vmem:[#allocation5 + $0x3ac] ss:$36 sps:$4 sm:$0xff]   ;;  %v9323_v58 = vld [vmem:[#allocation5 + $0x174] ss:$36 sps:$4 sm:$0xff]  }
  0x73   : > { %8204 = vmatpush1.bf16.msra.mxu1 %v10087_v20  ;;  %1974 = vmatprep.subr.bf16.mxu0 %v9268_v21  ;;  %v10116_v56 = vld [vmem:[%s10051_s30 + $0x4] ss:$12 sps:$4 sm:$0xff]   ;;  %v9324_v60 = vld [vmem:[#allocation5 + $0x3a8] ss:$36 sps:$4 sm:$0xff]   ;;  %v9325_v61 = vld [vmem:[#allocation5 + $0x3f4] ss:$36 sps:$4 sm:$0xff]  }
  0x74   : > { %8197 = vmatprep.subr.bf16.mxu1 %v10091_v22  ;;  %1996 = vmatprep.mubr.bf16.mxu0 %v10116_v56  ;;  %v9330_v62 = vld [vmem:[#allocation5 + $0x1bc] ss:$36 sps:$4 sm:$0xff]   ;;  %v9331_v3 = vld [vmem:[#allocation5 + $0x3f0] ss:$36 sps:$4 sm:$0xff]   ;;  %v9336_v7 = vld [vmem:[#allocation5 + $0x204] ss:$36 sps:$4 sm:$0xff]  }
  0x75   : > { %v9327_v63 = vld [vmem:[%s10051_s30 + $0x110] ss:$12 sps:$4 sm:$0xff]   ;;  %v9334_v9 = vld [vmem:[#allocation5 + $0x200] ss:$36 sps:$4 sm:$0xff]   ;;  %v9341_v17 = vld [vmem:[%s10051_s30 + $0x128] ss:$12 sps:$4 sm:$0xff]  }
  0x76   : > { %1975 = vmatpush1.bf16.msra.mxu0 %v9272_v23  ;;  %v9328_v1 = vld [vmem:[#allocation5 + $0x1b8] ss:$36 sps:$4 sm:$0xff]   ;;  %v9344_v13 = vld [vmem:[#allocation5 + $0x24c] ss:$36 sps:$4 sm:$0xff]   ;;  %s10499_s23 = scalar_select %p279_p4, %s9853_s18, 1  ;;  %vm3958_vm0 = vcmask 519168  }
  0x77   : > { %8205 = vmatpush1.bf16.msra.mxu1 %v10094_v24  ;;  %1976 = vmatprep.subr.bf16.mxu0 %v9274_v25  ;;  %v9332_v5 = vld [vmem:[#allocation5 + $0x43c] ss:$36 sps:$4 sm:$0xff]   ;;  %v9342_v19 = vld [vmem:[#allocation5 + $0x248] ss:$36 sps:$4 sm:$0xff]   ;;  %v9347_v21 = vld [vmem:[#allocation5 + $0x294] ss:$36 sps:$4 sm:$0xff]  }
  0x78   : > { %8198 = vmatprep.subr.bf16.mxu1 %v10097_v26  ;;  %v9337_v11 = vld [vmem:[#allocation5 + $0x438] ss:$36 sps:$4 sm:$0xff]   ;;  %v10123_v15 = vld [vmem:[%s10051_s30] ss:$12 sps:$4 sm:$0xff]   ;;  %v9345_v25 = vld [vmem:[#allocation5 + $0x290] ss:$36 sps:$4 sm:$0xff]  }
  0x79   : > { %v10128_v23 = vld [vmem:[%s10051_s30 + $0x1c] ss:$12 sps:$4 sm:$0xff]   ;;  %s8483_s25 = smul.u32 768, %s10499_s23  ;;  %s9870_s21 = smov 64  }
  0x7a   : > { %1977 = vmatpush1.bf16.msra.mxu0 %v9278_v27  ;;  %v9354_v27 = vld [vmem:[#allocation5 + $0x2dc] ss:$36 sps:$4 sm:$0xff]   ;;  %s12194_s6 = scalar_lea.vmem [#allocation7], %s8482_s29  ;;  %s8484_s28 = smul.u32 6144, %s9853_s18 }
  0x7b   : > { %8206 = vmatpush1.bf16.msra.mxu1 %v10100_v28  ;;  %1978 = vmatprep.subr.bf16.mxu0 %v9280_v29  ;;  %v10135_v29 = vld [vmem:[%s10051_s30 + $0x18] ss:$12 sps:$4 sm:$0xff]   ;;  %s10512_s13 = scalar_lea.vmem %s13244_s2, %s8483_s25  ;;  %s11682_s24 = scalar_lea.vmem %s13246_s4, %s8483_s25 }
  0x7c   : > { %8199 = vmatprep.subr.bf16.mxu1 %v10103_v30  ;;  %s6716_s8 = sshll.u32 %s12194_s6, 4  ;;  %s6688_s23 = scalar_lea.sflag [#allocation4], %s10045_s9  ;;  %s13123_s8 = int_to_ptr.vmem [resolvable:$true] %s6716_s8 }
  0x7d   : > { %s9775_s25 = scalar_lea.vmem %s13123_s8, 6144  ;;  %s9871_s18 = smov [#allocation7]  }
  0x7e   : > { %1979 = vmatpush1.bf16.msra.mxu0 %v9284_v31  ;;  %v9352_v31 = vld [vmem:[#allocation5 + $0x2d8] ss:$36 sps:$4 sm:$0xff]   ;;  %p9776_p6 = scmp.ne.s32.totalorder %s13123_s8, %s9775_s25  ;;  %s9779_s27 = sshll.u32 %s9871_s18, 4  ;;  %s9780_s27 = int_to_ptr.vmem [resolvable:$false] %s9779_s27 }
  0x7f   : > { %8207 = vmatpush1.bf16.msra.mxu1 %v10105_v32  ;;  %1980 = vmatprep.subr.bf16.mxu0 %v9286_v33  ;;  %v10140_v33 = vld [vmem:[%s10051_s30 + $0x34] ss:$12 sps:$4 sm:$0xff]   ;;  %s9781_s12 = scalar_lea.vmem %s9780_s27, 12288  ;;  %p9782_p13 = scmp.lt.s32.totalorder %s13123_s8, %s9780_s27 }
  0x80   : > { %2350 = vmatprep.subr.bf16.mxu1 %v9291_v34  ;;  %v9355_v34 = vld [vmem:[#allocation5 + $0x320] ss:$36 sps:$4 sm:$0xff]   ;;  %p9777_p8 = pnand %p9776_p6, %p9991_p10  ;;  %p9783_p0 = scmp.lt.s32.totalorder %s9781_s12, %s9775_s25 }
  0x82   : > { %2270 = vmatmul.mubr.bf16.vlgmr.msra.gmra.mrb[0].mxu1 %v9288_v35  ;;  %1981 = vmatpush1.bf16.msra.mxu0 %v9292_v37  ;;  %v10148_v35 = vld [vmem:[%s10051_s30 + $0x30] ss:$12 sps:$4 sm:$0xff]   ;;  %v9367_v37 = vld [vmem:[#allocation5 + $0x3b4] ss:$36 sps:$4 sm:$0xff]   ;;  %p9778_p12 = pneg %p9777_p8  ;;  %p9784_p5 = por %p9783_p0, %p9782_p13 }
  0x83   : > { %2351 = vmatpush1.bf16.msra.mxu1 %v9289_v36  ;;  %1982 = vmatprep.subr.bf16.mxu0 %v9293_v38  ;;  %v9362_v36 = vld [vmem:[#allocation5 + $0x368] ss:$36 sps:$4 sm:$0xff]   ;;  %v9365_v38 = vld [vmem:[#allocation5 + $0x3b0] ss:$36 sps:$4 sm:$0xff]  }
  0x84   : > { %2352 = vmatprep.subr.bf16.mxu1 %v9297_v39  ;;  %2279 = vmatprep.mubr.bf16.mxu1 %v13254_v0  ;;  %v9371_v39 = vld [vmem:[%s10051_s30 + $0x170] ss:$12 sps:$4 sm:$0xff]   ;;  %p9785_p9 = pnand %p9784_p5, %p9778_p12 }
  0x86   : > { %1983 = vmatpush1.bf16.msra.mxu0 %v9298_v41  ;;  %v9377_v41 = vld [vmem:[#allocation5 + $0x444] ss:$36 sps:$4 sm:$0xff]  }
  0x87   : > { %2353 = vmatpush1.bf16.msra.mxu1 %v9295_v40  ;;  %1984 = vmatprep.subr.bf16.mxu0 %v9299_v42  ;;  %v9372_v40 = vld [vmem:[#allocation5 + $0x3f8] ss:$36 sps:$4 sm:$0xff]   ;;  %v9375_v42 = vld [vmem:[#allocation5 + $0x440] ss:$36 sps:$4 sm:$0xff]  }
  0x88   : > { %2354 = vmatprep.subr.bf16.mxu1 %v9304_v43  ;;  %v9381_v43 = vld [vmem:[#allocation5 + $0x488] ss:$36 sps:$4 sm:$0xff]  }
  0x8a   : > { %2280 = vmatmul.mubr.bf16.gmra.mrb[4].mxu1 %v9301_v44  ;;  %1985 = vmatpush1.bf16.msra.mxu0 %v9305_v46  ;;  %v9392_v44 = vld [vmem:[#allocation5 + $0x4d4] ss:$36 sps:$4 sm:$0xff]  }
  0x8b   : > { %2355 = vmatpush1.bf16.msra.mxu1 %v9302_v45  ;;  %1986 = vmatprep.subr.bf16.mxu0 %v9306_v47  ;;  %v9390_v45 = vld [vmem:[#allocation5 + $0x4d0] ss:$36 sps:$4 sm:$0xff]   ;;  %v10188_v46 = vld [vmem:[%s10051_s30 + $0x78] ss:$12 sps:$4 sm:$0xff]  }
  0x8c   : > { %2356 = vmatprep.subr.bf16.mxu1 %v9310_v48  ;;  %2289 = vmatprep.mubr.bf16.mxu1 %v13254_v0  ;;  %v9399_v47 = vld [vmem:[#allocation5 + $0x518] ss:$36 sps:$4 sm:$0xff]   ;;  %v9410_v48 = vld [vmem:[#allocation5 + $0x564] ss:$36 sps:$4 sm:$0xff]  }
  0x8e   : > { %1987 = vmatpush1.bf16.msra.mxu0 %v9311_v50  ;;  %v10202_v50 = vld [vmem:[%s10051_s30 + $0xac] ss:$12 sps:$4 sm:$0xff]  }
  0x8f   : > { %2357 = vmatpush1.bf16.msra.mxu1 %v9308_v49  ;;  %1988 = vmatprep.subr.bf16.mxu0 %v9312_v51  ;;  %v10199_v49 = vld [vmem:[%s10051_s30 + $0x90] ss:$12 sps:$4 sm:$0xff]   ;;  %v9417_v51 = vld [vmem:[#allocation5 + $0x5a8] ss:$36 sps:$4 sm:$0xff]  }
  0x90   : > { %2358 = vmatprep.subr.bf16.mxu1 %v9317_v52  ;;  %v9428_v52 = vld [vmem:[#allocation5 + $0x5f4] ss:$36 sps:$4 sm:$0xff]  }
  0x92   : > { %2290 = vmatmul.mubr.bf16.gmra.mrb[8].mxu1 %v9314_v53  ;;  %1989 = vmatpush1.bf16.msra.mxu0 %v9318_v55  ;;  %v9426_v53 = vld [vmem:[#allocation5 + $0x5f0] ss:$36 sps:$4 sm:$0xff]  }
  0x93   : > { %2359 = vmatpush1.bf16.msra.mxu1 %v9315_v54  ;;  %1990 = vmatprep.subr.bf16.mxu0 %v9319_v57  ;;  %v9438_v54 = vld [vmem:[#allocation5 + $0x63c] ss:$36 sps:$4 sm:$0xff]   ;;  %v10209_v55 = vld [vmem:[%s10051_s30 + $0xa8] ss:$12 sps:$4 sm:$0xff]  }
  0x94   : > { %2360 = vmatprep.subr.bf16.mxu1 %v9323_v58  ;;  %2299 = vmatprep.mubr.bf16.mxu1 %v13254_v0  ;;  %v9436_v57 = vld [vmem:[#allocation5 + $0x638] ss:$36 sps:$4 sm:$0xff]   ;;  %v9455_v58 = vld [vmem:[#allocation5 + $0x684] ss:$36 sps:$4 sm:$0xff]  }
  0x96   : > { %1991 = vmatpush1.bf16.msra.mxu0 %v9324_v60  ;;  %v9472_v60 = vld [vmem:[#allocation5 + $0x1c] ss:$36 sps:$4 sm:$0xff]  }
  0x97   : > { %2361 = vmatpush1.bf16.msra.mxu1 %v9321_v59  ;;  %1992 = vmatprep.subr.bf16.mxu0 %v9325_v61  ;;  %v9453_v59 = vld [vmem:[#allocation5 + $0x680] ss:$36 sps:$4 sm:$0xff]  }
  0x98   : > { %2362 = vmatprep.subr.bf16.mxu1 %v9330_v62  ;;  %v10219_v61 = vld [vmem:[%s10051_s30 + $0xc0] ss:$12 sps:$4 sm:$0xff]   ;;  %v10222_v62 = vld [vmem:[%s10051_s30 + $0xdc] ss:$12 sps:$4 sm:$0xff]  }
  0x9a   : > { %2300 = vmatmul.mubr.bf16.gmra.mrb[12].mxu1 %v9327_v63  ;;  %1993 = vmatpush1.bf16.msra.mxu0 %v9331_v3  ;;  %v10229_v63 = vld [vmem:[%s10051_s30 + $0xd8] ss:$12 sps:$4 sm:$0xff]   ;;  %v10239_v3 = vld [vmem:[%s10051_s30 + $0xf0] ss:$12 sps:$4 sm:$0xff]  }
  0x9b   : > { %2363 = vmatpush1.bf16.msra.mxu1 %v9328_v1  ;;  %1994 = vmatprep.subr.bf16.mxu0 %v9332_v5  ;;  %v10232_v1 = vld [vmem:[%s10051_s30 + $0xf4] ss:$12 sps:$4 sm:$0xff]   ;;  %v10242_v5 = vld [vmem:[%s10051_s30 + $0x10c] ss:$12 sps:$4 sm:$0xff]  }
  0x9c   : > { %2364 = vmatprep.subr.bf16.mxu1 %v9336_v7  ;;  %2309 = vmatprep.mubr.bf16.mxu1 %v13254_v0  ;;  %v10249_v7 = vld [vmem:[%s10051_s30 + $0x108] ss:$12 sps:$4 sm:$0xff]  }
  0x9e   : > { %1995 = vmatpush1.bf16.msra.mxu0 %v9337_v11  ;;  %v10259_v11 = vld [vmem:[%s10051_s30 + $0x120] ss:$12 sps:$4 sm:$0xff]  }
  0x9f   : > { %2365 = vmatpush1.bf16.msra.mxu1 %v9334_v9  ;;  %2157 = vmatprep.subr.bf16.mxu0 %v10062_v2  ;;  %v9351_v2 = vld [vmem:[%s10051_s30 + $0x140] ss:$12 sps:$4 sm:$0xff]   ;;  %v10252_v9 = vld [vmem:[%s10051_s30 + $0x124] ss:$12 sps:$4 sm:$0xff]  }
  0xa0   : > { %2366 = vmatprep.subr.bf16.mxu1 %v9344_v13  ;;  %v10262_v13 = vld [vmem:[%s10051_s30 + $0x13c] ss:$12 sps:$4 sm:$0xff]  }
  0xa1   : > { %1997 = vmatmul.mubr.bf16.vlgmr.msra.gmra.mrb[0].mxu0 %v10123_v15 }
  0xa2   : > { %2310 = vmatmul.mubr.bf16.gmra.mrb[16].mxu1 %v9341_v17  ;;  %2158 = vmatpush1.bf16.msra.mxu0 %v10064_v4  ;;  %v9357_v4 = vld [vmem:[#allocation5 + $0x324] ss:$36 sps:$4 sm:$0xff]   ;;  %v10272_v17 = vld [vmem:[%s10051_s30 + $0x154] ss:$12 sps:$4 sm:$0xff]  }
  0xa3   : > { %2367 = vmatpush1.bf16.msra.mxu1 %v9342_v19  ;;  %2006 = vmatprep.mubr.bf16.mxu0 %v10128_v23  ;;  %v10279_v19 = vld [vmem:[%s10051_s30 + $0x150] ss:$12 sps:$4 sm:$0xff]  }
  0xa4   : > { %2368 = vmatprep.subr.bf16.mxu1 %v9347_v21  ;;  %2319 = vmatprep.mubr.bf16.mxu1 %v13254_v0  ;;  %v10282_v21 = vld [vmem:[%s10051_s30 + $0x16c] ss:$12 sps:$4 sm:$0xff]  }
  0xa5   : > { %2159 = vmatprep.subr.bf16.mxu0 %v10068_v6  ;;  %v9364_v6 = vld [vmem:[#allocation5 + $0x36c] ss:$36 sps:$4 sm:$0xff]  }
  0xa6   : > { %2160 = vmatpush1.bf16.msra.mxu0 %v10070_v8  ;;  %v9361_v8 = vld [vmem:[%s10051_s30 + $0x158] ss:$12 sps:$4 sm:$0xff]  }
  0xa7   : > { %2369 = vmatpush1.bf16.msra.mxu1 %v9345_v25  ;;  %2161 = vmatprep.subr.bf16.mxu0 %v10073_v10  ;;  %v10154_v10 = vld [vmem:[%s10051_s30 + $0x4c] ss:$12 sps:$4 sm:$0xff]   ;;  %v10296_v25 = vld [vmem:[%s10051_s30 + $0x8] ss:$12 sps:$4 sm:$0xff]  }
  0xa8   : > { %2370 = vmatprep.subr.bf16.mxu1 %v9354_v27  ;;  %13385 = vst [vmem:[#allocation11_spill] sm:$0xff] %v10296_v25  ;;  %v9433_v27 = vld [vmem:[#allocation5 + $0x10] ss:$36 sps:$4 sm:$0xff]  }
  0xa9   : > { %2007 = vmatmul.mubr.bf16.gmra.mrb[4].mxu0 %v10135_v29 }
  0xaa   : > { %2320 = vmatmul.mubr.bf16.gmra.mrb[20].mxu1 %v9351_v2  ;;  %2016 = vmatprep.mubr.bf16.mxu0 %v10140_v33  ;;  %v9439_v2 = vld [vmem:[#allocation5 + $0x58] ss:$36 sps:$4 sm:$0xff]  }
  0xab   : > { %2371 = vmatpush1.bf16.msra.mxu1 %v9352_v31  ;;  %2329 = vmatprep.mubr.bf16.mxu1 %v13254_v0  ;;  %v9445_v31 = vld [vmem:[#allocation5 + $0xa4] ss:$36 sps:$4 sm:$0xff]  }
  0xac   : > { %2372 = vmatprep.subr.bf16.mxu1 %v9357_v4  ;;  %2162 = vmatpush1.bf16.msra.mxu0 %v10075_v12  ;;  %v9374_v12 = vld [vmem:[#allocation5 + $0x3fc] ss:$36 sps:$4 sm:$0xff]  }
  0xad   : > { %2163 = vmatprep.subr.bf16.mxu0 %v10079_v14  ;;  %v10161_v14 = vld [vmem:[%s10051_s30 + $0x48] ss:$12 sps:$4 sm:$0xff]   ;;  %v9443_v4 = vld [vmem:[#allocation5 + $0xa0] ss:$36 sps:$4 sm:$0xff]  }
  0xaf   : > { %2373 = vmatpush1.bf16.msra.mxu1 %v9355_v34  ;;  %v9448_v34 = vld [vmem:[#allocation5 + $0xec] ss:$36 sps:$4 sm:$0xff]  }
  0xb0   : > { %2374 = vmatprep.subr.bf16.mxu1 %v9364_v6  ;;  %2164 = vmatpush1.bf16.msra.mxu0 %v10082_v16  ;;  %v10167_v16 = vld [vmem:[%s10051_s30 + $0x64] ss:$12 sps:$4 sm:$0xff]   ;;  %v9446_v6 = vld [vmem:[#allocation5 + $0xe8] ss:$36 sps:$4 sm:$0xff]  }
  0xb1   : > { %2017 = vmatmul.mubr.bf16.gmra.mrb[8].mxu0 %v10148_v35  ;;  %2165 = vmatprep.subr.bf16.mxu0 %v10085_v18  ;;  %v9383_v18 = vld [vmem:[#allocation5 + $0x48c] ss:$36 sps:$4 sm:$0xff]  }
  0xb2   : > { %2330 = vmatmul.mubr.bf16.gmra.mrb[24].mxu1 %v9361_v8  ;;  %2026 = vmatprep.mubr.bf16.mxu0 %v10154_v10  ;;  %v10310_v8 = vld [vmem:[%s10051_s30 + $0x38] ss:$12 sps:$4 sm:$0xff]  }
  0xb3   : > { %2375 = vmatpush1.bf16.msra.mxu1 %v9362_v36  ;;  %2339 = vmatprep.mubr.bf16.mxu1 %v13254_v0  ;;  %13387 = vst [vmem:[#allocation13_spill] sm:$0xff] %v10310_v8  ;;  %v9450_v36 = vld [vmem:[#allocation5 + $0x130] ss:$36 sps:$4 sm:$0xff]  }
  0xb4   : > { %2376 = vmatprep.subr.bf16.mxu1 %v9367_v37  ;;  %2166 = vmatpush1.bf16.msra.mxu0 %v10087_v20  ;;  %v10175_v20 = vld [vmem:[%s10051_s30 + $0x60] ss:$12 sps:$4 sm:$0xff]   ;;  %v9456_v37 = vld [vmem:[#allocation5 + $0x178] ss:$36 sps:$4 sm:$0xff]  }
  0xb5   : > { %2167 = vmatprep.subr.bf16.mxu0 %v10091_v22  ;;  %v10179_v22 = vld [vmem:[%s10051_s30 + $0x7c] ss:$12 sps:$4 sm:$0xff]  }
  0xb7   : > { %2377 = vmatpush1.bf16.msra.mxu1 %v9365_v38  ;;  %v9462_v38 = vld [vmem:[#allocation5 + $0x1c4] ss:$36 sps:$4 sm:$0xff]  }
  0xb8   : > { %2378 = vmatprep.subr.bf16.mxu1 %v9374_v12  ;;  %2168 = vmatpush1.bf16.msra.mxu0 %v10094_v24  ;;  %v9435_v24 = vld [vmem:[#allocation5 + $0x14] ss:$36 sps:$4 sm:$0xff]   ;;  %v10317_v12 = vld [vmem:[%s10051_s30 + $0x50] ss:$12 sps:$4 sm:$0xff]  }
  0xb9   : > { %2027 = vmatmul.mubr.bf16.gmra.mrb[12].mxu0 %v10161_v14  ;;  %2169 = vmatprep.subr.bf16.mxu0 %v10097_v26  ;;  %v9401_v26 = vld [vmem:[#allocation5 + $0x51c] ss:$36 sps:$4 sm:$0xff]   ;;  %13388 = vst [vmem:[#allocation14_spill] sm:$0xff] %v10317_v12 }
  0xba   : > { %2340 = vmatmul.mubr.bf16.gmra.mrb[28].mxu1 %v9371_v39  ;;  %2036 = vmatprep.mubr.bf16.mxu0 %v10167_v16  ;;  %v9465_v39 = vld [vmem:[#allocation5 + $0x20c] ss:$36 sps:$4 sm:$0xff]  }
  0xbb   : > { %2379 = vmatpush1.bf16.msra.mxu1 %v9372_v40  ;;  %2382 = vmatprep.mubr.bf16.mxu1 %v10116_v56  ;;  %v10212_v56 = vld [vmem:[%s10051_s30 + $0xc4] ss:$12 sps:$4 sm:$0xff]   ;;  %v9463_v40 = vld [vmem:[#allocation5 + $0x208] ss:$36 sps:$4 sm:$0xff]  }
  0xbc   : > { %2380 = vmatprep.subr.bf16.mxu1 %v9377_v41  ;;  %2170 = vmatpush1.bf16.msra.mxu0 %v10100_v28  ;;  %v10192_v28 = vld [vmem:[%s10051_s30 + $0x94] ss:$12 sps:$4 sm:$0xff]  }
  0xbd   : > { %2171 = vmatprep.subr.bf16.mxu0 %v10103_v30  ;;  %v9408_v30 = vld [vmem:[#allocation5 + $0x560] ss:$36 sps:$4 sm:$0xff]   ;;  %v9469_v41 = vld [vmem:[#allocation5 + $0x254] ss:$36 sps:$4 sm:$0xff]  }
  0xbf   : > { %2381 = vmatpush1.bf16.msra.mxu1 %v9375_v42  ;;  %v10324_v42 = vld [vmem:[%s10051_s30 + $0x68] ss:$12 sps:$4 sm:$0xff]  }
  0xc0   : > { %2543 = vmatprep.subr.bf16.mxu1 %v9383_v18  ;;  %2172 = vmatpush1.bf16.msra.mxu0 %v10105_v32  ;;  %v9419_v32 = vld [vmem:[#allocation5 + $0x5ac] ss:$36 sps:$4 sm:$0xff]   ;;  %13389 = vst [vmem:[#allocation15_spill] sm:$0xff] %v10324_v42 }
  0xc1   : > { %2037 = vmatmul.mubr.bf16.gmra.mrb[16].mxu0 %v10175_v20  ;;  %2736 = vmatprep.subr.bf16.mxu0 %v9435_v24  ;;  %v9467_v18 = vld [vmem:[#allocation5 + $0x250] ss:$36 sps:$4 sm:$0xff]   ;;  %v9473_v24 = vld [vmem:[#allocation5 + $0x298] ss:$36 sps:$4 sm:$0xff]  }
  0xc2   : > { %2383 = vmatmul.mubr.bf16.vlgmr.msra.gmra.mrb[32].mxu1 %v10123_v15  ;;  %2046 = vmatprep.mubr.bf16.mxu0 %v10179_v22  ;;  %v10269_v15 = vld [vmem:[%s10051_s30 + $0x138] ss:$12 sps:$4 sm:$0xff]  }
  0xc3   : > { %2544 = vmatpush1.bf16.msra.mxu1 %v9381_v43  ;;  %2392 = vmatprep.mubr.bf16.mxu1 %v10128_v23  ;;  %v10289_v23 = vld [vmem:[%s10051_s30 + $0x168] ss:$12 sps:$4 sm:$0xff]   ;;  %v9470_v43 = vld [vmem:[#allocation5 + $0x18] ss:$36 sps:$4 sm:$0xff]  }
  0xc4   : > { %2545 = vmatprep.subr.bf16.mxu1 %v9392_v44  ;;  %v9475_v44 = vld [vmem:[#allocation5 + $0x29c] ss:$36 sps:$4 sm:$0xff]  }
  0xc7   : > { %2546 = vmatpush1.bf16.msra.mxu1 %v9390_v45  ;;  %v9482_v45 = vld [vmem:[#allocation5 + $0x64] ss:$36 sps:$4 sm:$0xff]  }
  0xc8   : > { %2547 = vmatprep.subr.bf16.mxu1 %v9401_v26  ;;  %v9480_v26 = vld [vmem:[#allocation5 + $0x60] ss:$36 sps:$4 sm:$0xff]  }
  0xc9   : > { %2047 = vmatmul.mubr.bf16.gmra.mrb[20].mxu0 %v10188_v46 }
  0xca   : > { %2393 = vmatmul.mubr.bf16.gmra.mrb[36].mxu1 %v10135_v29  ;;  %2056 = vmatprep.mubr.bf16.mxu0 %v10192_v28  ;;  %v9441_v29 = vld [vmem:[#allocation5 + $0x5c] ss:$36 sps:$4 sm:$0xff]  }
  0xcb   : > { %2402 = vmatprep.mubr.bf16.mxu1 %v10140_v33  ;;  %2548 = vmatpush1.bf16.msra.mxu1 %v9399_v47  ;;  %v10303_v33 = vld [vmem:[%s10051_s30 + $0x20] ss:$12 sps:$4 sm:$0xff]   ;;  %v9479_v47 = vld [vmem:[#allocation5 + $0x2e4] ss:$36 sps:$4 sm:$0xff]  }
  0xcc   : > { %2549 = vmatprep.subr.bf16.mxu1 %v9410_v48  ;;  %13386 = vst [vmem:[#allocation12_spill] sm:$0xff] %v10303_v33  ;;  %v9492_v48 = vld [vmem:[#allocation5 + $0xac] ss:$36 sps:$4 sm:$0xff]  }
  0xcf   : > { %2550 = vmatpush1.bf16.msra.mxu1 %v9408_v30  ;;  %v10331_v30 = vld [vmem:[%s10051_s30 + $0x80] ss:$12 sps:$4 sm:$0xff]  }
  0xd0   : > { %2551 = vmatprep.subr.bf16.mxu1 %v9419_v32  ;;  %13390 = vst [vmem:[#allocation16_spill] sm:$0xff] %v10331_v30  ;;  %v9477_v32 = vld [vmem:[#allocation5 + $0x2e0] ss:$36 sps:$4 sm:$0xff]  }
  0xd1   : > { %2057 = vmatmul.mubr.bf16.gmra.mrb[24].mxu0 %v10199_v49 }
  0xd2   : > { %2403 = vmatmul.mubr.bf16.gmra.mrb[40].mxu1 %v10148_v35  ;;  %2066 = vmatprep.mubr.bf16.mxu0 %v10202_v50  ;;  %v9452_v35 = vld [vmem:[#allocation5 + $0x134] ss:$36 sps:$4 sm:$0xff]  }
  0xd3   : > { %2412 = vmatprep.mubr.bf16.mxu1 %v10154_v10  ;;  %2552 = vmatpush1.bf16.msra.mxu1 %v9417_v51  ;;  %v9458_v10 = vld [vmem:[#allocation5 + $0x17c] ss:$36 sps:$4 sm:$0xff]   ;;  %v9485_v51 = vld [vmem:[#allocation5 + $0x32c] ss:$36 sps:$4 sm:$0xff]  }
  0xd4   : > { %2553 = vmatprep.subr.bf16.mxu1 %v9428_v52  ;;  %v9490_v52 = vld [vmem:[#allocation5 + $0xa8] ss:$36 sps:$4 sm:$0xff]  }
  0xd7   : > { %2554 = vmatpush1.bf16.msra.mxu1 %v9426_v53  ;;  %v9502_v53 = vld [vmem:[#allocation5 + $0xf4] ss:$36 sps:$4 sm:$0xff]  }
  0xd8   : > { %2555 = vmatprep.subr.bf16.mxu1 %v9438_v54  ;;  %v9483_v54 = vld [vmem:[#allocation5 + $0x328] ss:$36 sps:$4 sm:$0xff]  }
  0xd9   : > { %2067 = vmatmul.mubr.bf16.gmra.mrb[28].mxu0 %v10209_v55 }
  0xda   : > { %2413 = vmatmul.mubr.bf16.gmra.mrb[44].mxu1 %v10161_v14  ;;  %2076 = vmatprep.mubr.bf16.mxu0 %v10212_v56  ;;  %v9460_v14 = vld [vmem:[#allocation5 + $0x1c0] ss:$36 sps:$4 sm:$0xff]  }
  0xdb   : > { %2422 = vmatprep.mubr.bf16.mxu1 %v10167_v16  ;;  %2556 = vmatpush1.bf16.msra.mxu1 %v9436_v57  ;;  %v9489_v57 = vld [vmem:[#allocation5 + $0x374] ss:$36 sps:$4 sm:$0xff]  }
  0xdc   : > { %2557 = vmatprep.subr.bf16.mxu1 %v9455_v58  ;;  %v9500_v58 = vld [vmem:[#allocation5 + $0xf0] ss:$36 sps:$4 sm:$0xff]  }
  0xdf   : > { %2558 = vmatpush1.bf16.msra.mxu1 %v9453_v59  ;;  %v10338_v59 = vld [vmem:[%s10051_s30 + $0x98] ss:$12 sps:$4 sm:$0xff]  }
  0xe0   : > { %3122 = vmatprep.subr.bf16.mxu1 %v9472_v60  ;;  %13391 = vst [vmem:[#allocation17_spill] sm:$0xff] %v10338_v59  ;;  %v9487_v60 = vld [vmem:[#allocation5 + $0x370] ss:$36 sps:$4 sm:$0xff]  }
  0xe1   : > { %2077 = vmatmul.mubr.bf16.gmra.mrb[32].mxu0 %v10219_v61 }
  0xe2   : > { %2423 = vmatmul.mubr.bf16.gmra.mrb[48].mxu1 %v10175_v20  ;;  %2086 = vmatprep.mubr.bf16.mxu0 %v10222_v62 }
  0xe3   : > { %2432 = vmatprep.mubr.bf16.mxu1 %v10179_v22 }
  0xe9   : > { %2087 = vmatmul.mubr.bf16.gmra.mrb[36].mxu0 %v10229_v63 }
  0xea   : > { %2433 = vmatmul.mubr.bf16.gmra.mrb[52].mxu1 %v10188_v46  ;;  %2096 = vmatprep.mubr.bf16.mxu0 %v10232_v1 }
  0xeb   : > { %2442 = vmatprep.mubr.bf16.mxu1 %v10192_v28 }
  0xf1   : > { %2097 = vmatmul.mubr.bf16.gmra.mrb[40].mxu0 %v10239_v3 }
  0xf2   : > { %2443 = vmatmul.mubr.bf16.gmra.mrb[56].mxu1 %v10199_v49  ;;  %2106 = vmatprep.mubr.bf16.mxu0 %v10242_v5 }
  0xf3   : > { %2452 = vmatprep.mubr.bf16.mxu1 %v10202_v50 }
  0xf9   : > { %2107 = vmatmul.mubr.bf16.gmra.mrb[44].mxu0 %v10249_v7 }
  0xfa   : > { %2453 = vmatmul.mubr.bf16.gmra.mrb[60].mxu1 %v10209_v55  ;;  %2116 = vmatprep.mubr.bf16.mxu0 %v10252_v9 }
  0xfb   : > { %2462 = vmatprep.mubr.bf16.mxu1 %v10212_v56 }
 0x101   : > { %2117 = vmatmul.mubr.bf16.gmra.mrb[48].mxu0 %v10259_v11 }
 0x102   : > { %2463 = vmatmul.mubr.bf16.gmra.mrb[64].mxu1 %v10219_v61  ;;  %2126 = vmatprep.mubr.bf16.mxu0 %v10262_v13 }
 0x103   : > { %2472 = vmatprep.mubr.bf16.mxu1 %v10222_v62 }
 0x109   : > { %2127 = vmatmul.mubr.bf16.gmra.mrb[52].mxu0 %v10269_v15 }
 0x10a   : > { %2473 = vmatmul.mubr.bf16.gmra.mrb[68].mxu1 %v10229_v63  ;;  %2136 = vmatprep.mubr.bf16.mxu0 %v10272_v17 }
 0x10b   : > { %2482 = vmatprep.mubr.bf16.mxu1 %v10232_v1 }
 0x111   : > { %2137 = vmatmul.mubr.bf16.gmra.mrb[56].mxu0 %v10279_v19 }
 0x112   : > { %2483 = vmatmul.mubr.bf16.gmra.mrb[72].mxu1 %v10239_v3  ;;  %2146 = vmatprep.mubr.bf16.mxu0 %v10282_v21 }
 0x113   : > { %2492 = vmatprep.mubr.bf16.mxu1 %v10242_v5 }
 0x119   : > { %2147 = vmatmul.mubr.bf16.gmra.mrb[60].mxu0 %v10289_v23 }
 0x11a   : > { %2493 = vmatmul.mubr.bf16.gmra.mrb[76].mxu1 %v10249_v7  ;;  %2189 = vmatprep.mubr.bf16.mxu0 %v13254_v0 }
 0x11b   : > { %2502 = vmatprep.mubr.bf16.mxu1 %v10252_v9 }
 0x121   : > { %2190 = vmatmul.mubr.bf16.vlgmr.msra.gmra.mrb[0].mxu0 %v10296_v25 }
 0x122   : > { %2503 = vmatmul.mubr.bf16.gmra.mrb[80].mxu1 %v10259_v11  ;;  %2737 = vmatpush1.bf16.msra.mxu0 %v9433_v27  ;;  %v9495_v27 = vld [vmem:[#allocation5 + $0x3bc] ss:$36 sps:$4 sm:$0xff]  }
 0x123   : > { %2199 = vmatprep.mubr.bf16.mxu0 %v13254_v0  ;;  %2738 = vmatprep.subr.bf16.mxu0 %v9441_v29  ;;  %v9511_v29 = vld [vmem:[#allocation5 + $0x13c] ss:$36 sps:$4 sm:$0xff]  }
 0x124   : > { %2512 = vmatprep.mubr.bf16.mxu1 %v10262_v13 }
 0x126   : > { %2739 = vmatpush1.bf16.msra.mxu0 %v9439_v2  ;;  %v9509_v2 = vld [vmem:[#allocation5 + $0x138] ss:$36 sps:$4 sm:$0xff]  }
 0x127   : > { %2740 = vmatprep.subr.bf16.mxu0 %v9445_v31  ;;  %v9493_v31 = vld [vmem:[#allocation5 + $0x3b8] ss:$36 sps:$4 sm:$0xff]  }
 0x129   : > { %2200 = vmatmul.mubr.bf16.gmra.mrb[4].mxu0 %v10303_v33 }
 0x12a   : > { %2513 = vmatmul.mubr.bf16.gmra.mrb[84].mxu1 %v10269_v15  ;;  %2741 = vmatpush1.bf16.msra.mxu0 %v9443_v4  ;;  %v9514_v4 = vld [vmem:[#allocation5 + $0x184] ss:$36 sps:$4 sm:$0xff]  }
 0x12b   : > { %2209 = vmatprep.mubr.bf16.mxu0 %v13254_v0  ;;  %2742 = vmatprep.subr.bf16.mxu0 %v9448_v34  ;;  %v9499_v34 = vld [vmem:[#allocation5 + $0x404] ss:$36 sps:$4 sm:$0xff]  }
 0x12c   : > { %2522 = vmatprep.mubr.bf16.mxu1 %v10272_v17 }
 0x12e   : > { %2743 = vmatpush1.bf16.msra.mxu0 %v9446_v6 }
 0x12f   : > { %2744 = vmatprep.subr.bf16.mxu0 %v9452_v35 }
 0x131   : > { %2210 = vmatmul.mubr.bf16.gmra.mrb[8].mxu0 %v10310_v8 }
 0x132   : > { %2523 = vmatmul.mubr.bf16.gmra.mrb[88].mxu1 %v10279_v19  ;;  %2745 = vmatpush1.bf16.msra.mxu0 %v9450_v36  ;;  %v10349_v36 = vld [vmem:[%s10051_s30 + $0xb0] ss:$12 sps:$4 sm:$0xff]  }
 0x133   : > { %2219 = vmatprep.mubr.bf16.mxu0 %v13254_v0  ;;  %2746 = vmatprep.subr.bf16.mxu0 %v9458_v10  ;;  %13392 = vst [vmem:[#allocation18_spill] sm:$0xff] %v10349_v36 }
 0x134   : > { %2532 = vmatprep.mubr.bf16.mxu1 %v10282_v21 }
 0x136   : > { %2747 = vmatpush1.bf16.msra.mxu0 %v9456_v37  ;;  %v9497_v37 = vld [vmem:[#allocation5 + $0x400] ss:$36 sps:$4 sm:$0xff]  }
 0x137   : > { %2748 = vmatprep.subr.bf16.mxu0 %v9462_v38 }
 0x139   : > { %2220 = vmatmul.mubr.bf16.gmra.mrb[12].mxu0 %v10317_v12 }
 0x13a   : > { %2533 = vmatmul.mubr.bf16.gmra.mrb[92].mxu1 %v10289_v23  ;;  %2749 = vmatpush1.bf16.msra.mxu0 %v9460_v14  ;;  %v9505_v14 = vld [vmem:[#allocation5 + $0x44c] ss:$36 sps:$4 sm:$0xff]  }
 0x13b   : > { %2229 = vmatprep.mubr.bf16.mxu0 %v13254_v0  ;;  %2750 = vmatprep.subr.bf16.mxu0 %v9465_v39  ;;  %v9512_v39 = vld [vmem:[#allocation5 + $0x180] ss:$36 sps:$4 sm:$0xff]  }
 0x13c   : > { %2575 = vmatprep.mubr.bf16.mxu1 %v13254_v0 }
 0x13e   : > { %2751 = vmatpush1.bf16.msra.mxu0 %v9463_v40  ;;  %v9520_v40 = vld [vmem:[#allocation5 + $0x1cc] ss:$36 sps:$4 sm:$0xff]  }
 0x13f   : > { %2752 = vmatprep.subr.bf16.mxu0 %v9469_v41  ;;  %v9503_v41 = vld [vmem:[#allocation5 + $0x448] ss:$36 sps:$4 sm:$0xff]  }
 0x141   : > { %2230 = vmatmul.mubr.bf16.gmra.mrb[16].mxu0 %v10324_v42 }
 0x142   : > { %2576 = vmatmul.mubr.bf16.vlgmr.msra.gmra.mrb[32].mxu1 %v10296_v25  ;;  %2753 = vmatpush1.bf16.msra.mxu0 %v9467_v18  ;;  %v10359_v18 = vld [vmem:[%s10051_s30 + $0x4] ss:$12 sps:$4 sm:$0xff]  }
 0x143   : > { %3123 = vmatpush1.bf16.msra.mxu1 %v9470_v43  ;;  %2754 = vmatprep.subr.bf16.mxu0 %v9475_v44  ;;  %v9508_v43 = vld [vmem:[#allocation5 + $0x494] ss:$36 sps:$4 sm:$0xff]  }
 0x144   : > { %2239 = vmatprep.mubr.bf16.mxu0 %v13254_v0  ;;  %2585 = vmatprep.mubr.bf16.mxu1 %v13254_v0 }
 0x145   : > { %3124 = vmatprep.subr.bf16.mxu1 %v9482_v45  ;;  %v9518_v45 = vld [vmem:[#allocation5 + $0x1c8] ss:$36 sps:$4 sm:$0xff]  }
 0x146   : > { %2755 = vmatpush1.bf16.msra.mxu0 %v9473_v24 }
 0x147   : > { %3125 = vmatpush1.bf16.msra.mxu1 %v9480_v26  ;;  %2756 = vmatprep.subr.bf16.mxu0 %v9479_v47  ;;  %v9506_v47 = vld [vmem:[#allocation5 + $0x490] ss:$36 sps:$4 sm:$0xff]  }
 0x148   : > { %3126 = vmatprep.subr.bf16.mxu1 %v9492_v48 }
 0x149   : > { %2240 = vmatmul.mubr.bf16.gmra.mrb[20].mxu0 %v10331_v30 }
 0x14a   : > { %2586 = vmatmul.mubr.bf16.gmra.mrb[36].mxu1 %v10303_v33  ;;  %2757 = vmatpush1.bf16.msra.mxu0 %v9477_v32  ;;  %v9517_v32 = vld [vmem:[#allocation5 + $0x4dc] ss:$36 sps:$4 sm:$0xff]  }
 0x14b   : > { %2249 = vmatprep.mubr.bf16.mxu0 %v13254_v0  ;;  %2758 = vmatprep.subr.bf16.mxu0 %v9485_v51  ;;  %v9523_v51 = vld [vmem:[#allocation5 + $0x214] ss:$36 sps:$4 sm:$0xff]  }
 0x14c   : > { %2595 = vmatprep.mubr.bf16.mxu1 %v13254_v0  ;;  %3127 = vmatpush1.bf16.msra.mxu1 %v9490_v52  ;;  %v10372_v52 = vld [vmem:[%s10051_s30] ss:$12 sps:$4 sm:$0xff]  }
 0x14d   : > { %3128 = vmatprep.subr.bf16.mxu1 %v9502_v53  ;;  %v9521_v53 = vld [vmem:[#allocation5 + $0x210] ss:$36 sps:$4 sm:$0xff]  }
 0x14e   : > { %2759 = vmatpush1.bf16.msra.mxu0 %v9483_v54  ;;  %v9515_v54 = vld [vmem:[#allocation5 + $0x4d8] ss:$36 sps:$4 sm:$0xff]  }
 0x14f   : > { %2760 = vmatprep.subr.bf16.mxu0 %v9489_v57  ;;  %v9529_v57 = vld [vmem:[#allocation5 + $0x25c] ss:$36 sps:$4 sm:$0xff]  }
 0x150   : > { %3129 = vmatpush1.bf16.msra.mxu1 %v9500_v58  ;;  %v10377_v58 = vld [vmem:[%s10051_s30 + $0x1c] ss:$12 sps:$4 sm:$0xff]  }
 0x151   : > { %2250 = vmatmul.mubr.bf16.gmra.mrb[24].mxu0 %v10338_v59  ;;  %3130 = vmatprep.subr.bf16.mxu1 %v9511_v29 }
 0x152   : > { %2596 = vmatmul.mubr.bf16.gmra.mrb[40].mxu1 %v10310_v8  ;;  %2761 = vmatpush1.bf16.msra.mxu0 %v9487_v60  ;;  %v9526_v60 = vld [vmem:[#allocation5 + $0x524] ss:$36 sps:$4 sm:$0xff]   ;;  %v9568_v8 = vld [vmem:[#allocation5 + $0x68c] ss:$36 sps:$4 sm:$0xff]  }
 0x153   : > { %2259 = vmatprep.mubr.bf16.mxu0 %v13254_v0  ;;  %2762 = vmatprep.subr.bf16.mxu0 %v9495_v27 }
 0x154   : > { %2605 = vmatprep.mubr.bf16.mxu1 %v13254_v0  ;;  %3131 = vmatpush1.bf16.msra.mxu1 %v9509_v2 }
 0x155   : > { %v10344_v6 = vpop.f32.mrb[0].mxu1  ;;  %3132 = vmatprep.subr.bf16.mxu1 %v9514_v4  ;;  %v9524_v4 = vld [vmem:[#allocation5 + $0x520] ss:$36 sps:$4 sm:$0xff]  }
 0x156   : > { %v10346_v35 = vpop.f32.mrb[1].mxu1  ;;  %2763 = vmatpush1.bf16.msra.mxu0 %v9493_v31 }
 0x157   : > { %v10351_v10 = vpop.f32.mrb[2].mxu1  ;;  %2764 = vmatprep.subr.bf16.mxu0 %v9499_v34  ;;  %v9527_v34 = vld [vmem:[#allocation5 + $0x258] ss:$36 sps:$4 sm:$0xff]  }
 0x158   : > { %v10353_v38 = vpop.f32.mrb[3].mxu1  ;;  %3133 = vmatpush1.bf16.msra.mxu1 %v9512_v39  ;;  %v10390_v39 = vld [vmem:[%s10051_s30 + $0x18] ss:$12 sps:$4 sm:$0xff]  }
 0x159   : > { %2260 = vmatmul.mubr.bf16.gmra.mrb[28].mxu0 %v10349_v36  ;;  %3134 = vmatprep.subr.bf16.mxu1 %v9520_v40  ;;  %v10395_v40 = vld [vmem:[%s10051_s30 + $0x34] ss:$12 sps:$4 sm:$0xff]  }
 0x15a   : > { %2606 = vmatmul.mubr.bf16.gmra.mrb[44].mxu1 %v10317_v12  ;;  %2765 = vmatpush1.bf16.msra.mxu0 %v9497_v37  ;;  %v9532_v37 = vld [vmem:[#allocation5 + $0x2a4] ss:$36 sps:$4 sm:$0xff]   ;;  %v9545_v12 = vld [vmem:[#allocation5 + $0x378] ss:$36 sps:$4 sm:$0xff]  }
 0x15b   : > { %2615 = vmatprep.mubr.bf16.mxu1 %v13254_v0  ;;  %2766 = vmatprep.subr.bf16.mxu0 %v9505_v14  ;;  %v9535_v14 = vld [vmem:[#allocation5 + $0x56c] ss:$36 sps:$4 sm:$0xff]  }
 0x15c   : > { %2768 = vmatprep.mubr.bf16.mxu0 %v10359_v18  ;;  %3135 = vmatpush1.bf16.msra.mxu1 %v9518_v45 }
 0x15d   : > { %v10362_v44 = vpop.f32.mrb[4].mxu1  ;;  %3136 = vmatprep.subr.bf16.mxu1 %v9523_v51 }
 0x15e   : > { %v10364_v24 = vpop.f32.mrb[5].mxu1  ;;  %2767 = vmatpush1.bf16.msra.mxu0 %v9503_v41  ;;  %v9530_v41 = vld [vmem:[#allocation5 + $0x2a0] ss:$36 sps:$4 sm:$0xff]  }
 0x15f   : > { %v10366_v26 = vpop.f32.mrb[6].mxu1  ;;  %2929 = vmatprep.subr.bf16.mxu0 %v9508_v43  ;;  %v9533_v43 = vld [vmem:[#allocation5 + $0x568] ss:$36 sps:$4 sm:$0xff]  }
 0x160   : > { %v10368_v48 = vpop.f32.mrb[7].mxu1  ;;  %3137 = vmatpush1.bf16.msra.mxu1 %v9521_v53 }
 0x161   : > { %2769 = vmatmul.mubr.bf16.vlgmr.msra.gmra.mrb[64].mxu0 %v10372_v52  ;;  %3138 = vmatprep.subr.bf16.mxu1 %v9529_v57  ;;  %v9536_v57 = vld [vmem:[#allocation5 + $0x2e8] ss:$36 sps:$4 sm:$0xff]  }
 0x162   : > { %2616 = vmatmul.mubr.bf16.gmra.mrb[48].mxu1 %v10324_v42  ;;  %2930 = vmatpush1.bf16.msra.mxu0 %v9506_v47  ;;  %v9538_v47 = vld [vmem:[#allocation5 + $0x2ec] ss:$36 sps:$4 sm:$0xff]  }
 0x163   : > { %2625 = vmatprep.mubr.bf16.mxu1 %v13254_v0  ;;  %2778 = vmatprep.mubr.bf16.mxu0 %v10377_v58 }
 0x164   : > { %2931 = vmatprep.subr.bf16.mxu0 %v9517_v32  ;;  %3139 = vmatpush1.bf16.msra.mxu1 %v9527_v34  ;;  %v9544_v32 = vld [vmem:[#allocation5 + $0x5b4] ss:$36 sps:$4 sm:$0xff]   ;;  %v9553_v34 = vld [vmem:[#allocation5 + $0x5fc] ss:$36 sps:$4 sm:$0xff]  }
 0x165   : > { %v10380_v27 = vpop.f32.mrb[8].mxu1  ;;  %3140 = vmatprep.subr.bf16.mxu1 %v9532_v37  ;;  %v10408_v37 = vld [vmem:[%s10051_s30 + $0x30] ss:$12 sps:$4 sm:$0xff]  }
 0x166   : > { %v10382_v29 = vpop.f32.mrb[9].mxu1  ;;  %2932 = vmatpush1.bf16.msra.mxu0 %v9515_v54 }
 0x167   : > { %v10384_v2 = vpop.f32.mrb[10].mxu1  ;;  %2933 = vmatprep.subr.bf16.mxu0 %v9526_v60  ;;  %v9542_v60 = vld [vmem:[#allocation5 + $0x5b0] ss:$36 sps:$4 sm:$0xff]  }
 0x168   : > { %v10386_v31 = vpop.f32.mrb[11].mxu1  ;;  %3141 = vmatpush1.bf16.msra.mxu1 %v9530_v41  ;;  %v9539_v41 = vld [vmem:[#allocation5 + $0x330] ss:$36 sps:$4 sm:$0xff]  }
 0x169   : > { %2779 = vmatmul.mubr.bf16.gmra.mrb[68].mxu0 %v10390_v39  ;;  %3142 = vmatprep.subr.bf16.mxu1 %v9538_v47 }
 0x16a   : > { %2626 = vmatmul.mubr.bf16.gmra.mrb[52].mxu1 %v10331_v30  ;;  %2788 = vmatprep.mubr.bf16.mxu0 %v10395_v40 }
 0x16b   : > { %2635 = vmatprep.mubr.bf16.mxu1 %v13254_v0  ;;  %2934 = vmatpush1.bf16.msra.mxu0 %v9524_v4  ;;  %v9541_v4 = vld [vmem:[#allocation5 + $0x334] ss:$36 sps:$4 sm:$0xff]  }
 0x16c   : > { %2935 = vmatprep.subr.bf16.mxu0 %v9535_v14  ;;  %v10413_v14 = vld [vmem:[%s10051_s30 + $0x4c] ss:$12 sps:$4 sm:$0xff]   ;;  %3143 = vmatpush1.bf16.msra.mxu1 %v9536_v57  ;;  %v9560_v57 = vld [vmem:[#allocation5 + $0x640] ss:$36 sps:$4 sm:$0xff]  }
 0x16d   : > { %v10398_v45 = vpop.f32.mrb[12].mxu1  ;;  %3144 = vmatprep.subr.bf16.mxu1 %v9541_v4  ;;  %v10426_v4 = vld [vmem:[%s10051_s30 + $0x48] ss:$12 sps:$4 sm:$0xff]  }
 0x16e   : > { %v10400_v51 = vpop.f32.mrb[13].mxu1  ;;  %13393 = vst [vmem:[#allocation19_spill] sm:$0xff] %v10426_v4 }
 0x16f   : > { %v10402_v53 = vpop.f32.mrb[14].mxu1  ;;  %2936 = vmatpush1.bf16.msra.mxu0 %v9533_v43  ;;  %v9551_v43 = vld [vmem:[#allocation5 + $0x5f8] ss:$36 sps:$4 sm:$0xff]  }
 0x170   : > { %v10404_v54 = vpop.f32.mrb[15].mxu1  ;;  %2937 = vmatprep.subr.bf16.mxu0 %v9544_v32  ;;  %v9547_v32 = vld [vmem:[#allocation5 + $0x37c] ss:$36 sps:$4 sm:$0xff]   ;;  %3145 = vmatpush1.bf16.msra.mxu1 %v9539_v41 }
 0x171   : > { %2789 = vmatmul.mubr.bf16.gmra.mrb[72].mxu0 %v10408_v37  ;;  %3146 = vmatprep.subr.bf16.mxu1 %v9547_v32  ;;  %v9548_v41 = vld [vmem:[#allocation5 + $0x3c0] ss:$36 sps:$4 sm:$0xff]  }
 0x172   : > { %2636 = vmatmul.mubr.bf16.gmra.mrb[56].mxu1 %v10338_v59  ;;  %2798 = vmatprep.mubr.bf16.mxu0 %v10413_v14  ;;  %v9562_v59 = vld [vmem:[#allocation5 + $0x644] ss:$36 sps:$4 sm:$0xff]  }
 0x173   : > { %2645 = vmatprep.mubr.bf16.mxu1 %v13254_v0  ;;  %2938 = vmatpush1.bf16.msra.mxu0 %v9542_v60  ;;  %v9550_v60 = vld [vmem:[#allocation5 + $0x3c4] ss:$36 sps:$4 sm:$0xff]  }
 0x174   : > { %2939 = vmatprep.subr.bf16.mxu0 %v9553_v34  ;;  %v13394_v34 = vmov 0   ;;  %3147 = vmatpush1.bf16.msra.mxu1 %v9545_v12  ;;  %v10440_v12 = vld [vmem:[%s10051_s30 + $0xc8] ss:$12 sps:$4 sm:$0xff]  }
 0x175   : > { %v10416_v47 = vpop.f32.mrb[16].mxu1  ;;  %3148 = vmatprep.subr.bf16.mxu1 %v9550_v60  ;;  %v9565_v60 = vld [vmem:[#allocation5 + $0x49c] ss:$36 sps:$4 sm:$0xff]  }
 0x176   : > { %v10418_v30 = vpop.f32.mrb[17].mxu1 }
 0x177   : > { %v10420_v42 = vpop.f32.mrb[18].mxu1  ;;  %2940 = vmatpush1.bf16.msra.mxu0 %v9551_v43  ;;  %v9566_v43 = vld [vmem:[#allocation5 + $0x688] ss:$36 sps:$4 sm:$0xff]  }
 0x178   : > { %v10422_v0 = vpop.f32.mrb[19].mxu1  ;;  %2941 = vmatprep.subr.bf16.mxu0 %v9562_v59  ;;  %v9556_v59 = vld [vmem:[#allocation5 + $0x40c] ss:$36 sps:$4 sm:$0xff]   ;;  %3149 = vmatpush1.bf16.msra.mxu1 %v9548_v41 }
 0x179   : > { %2799 = vmatmul.mubr.bf16.gmra.mrb[76].mxu0 %v10426_v4  ;;  %v9554_v4 = vld [vmem:[#allocation5 + $0x408] ss:$36 sps:$4 sm:$0xff]   ;;  %3150 = vmatprep.subr.bf16.mxu1 %v9556_v59 }
 0x17a   : > { %2646 = vmatmul.mubr.bf16.gmra.mrb[60].mxu1 %v10349_v36  ;;  %2808 = vmatprep.mubr.bf16.mxu0 %v10167_v16  ;;  %v9559_v16 = vld [vmem:[#allocation5 + $0x454] ss:$36 sps:$4 sm:$0xff]  }
 0x17b   : > { %2655 = vmatprep.mubr.bf16.mxu1 %v13394_v34  ;;  %2942 = vmatpush1.bf16.msra.mxu0 %v9560_v57 }
 0x17c   : > { %2943 = vmatprep.subr.bf16.mxu0 %v9568_v8  ;;  %3151 = vmatpush1.bf16.msra.mxu1 %v9554_v4  ;;  %v9557_v8 = vld [vmem:[#allocation5 + $0x450] ss:$36 sps:$4 sm:$0xff]  }
 0x17d   : > { %v10431_v33 = vpop.f32.mrb[20].mxu1  ;;  %3152 = vmatprep.subr.bf16.mxu1 %v9559_v16 }
 0x17e   : > { %v10433_v32 = vpop.f32.mrb[21].mxu1 }
 0x17f   : > { %v10435_v36 = vpop.f32.mrb[22].mxu1  ;;  %2944 = vmatpush1.bf16.msra.mxu0 %v9566_v43 }
 0x180   : > { %v10437_v25 = vpop.f32.mrb[23].mxu1  ;;  %3153 = vmatpush1.bf16.msra.mxu1 %v9557_v8 }
 0x181   : > { %2809 = vmatmul.mubr.bf16.gmra.mrb[80].mxu0 %v10175_v20  ;;  %3315 = vmatprep.subr.bf16.mxu1 %v9565_v60  ;;  %v10455_v20 = vld [vmem:[%s10051_s30 + $0xe0] ss:$12 sps:$4 sm:$0xff]   ;;  %v10470_v60 = vld [vmem:[%s10051_s30 + $0xf8] ss:$12 sps:$4 sm:$0xff]  }
 0x182   : > { %2656 = vmatmul.mubr.bf16.gmra.mrb[64].mxu1 %v10440_v12  ;;  %2818 = vmatprep.mubr.bf16.mxu0 %v10179_v22 }
 0x183   : > { %2665 = vmatprep.mubr.bf16.mxu1 %v13394_v34 }
 0x185   : > { %v10446_v57 = vpop.f32.mrb[24].mxu1 }
 0x186   : > { %v10448_v41 = vpop.f32.mrb[25].mxu1 }
 0x187   : > { %v10450_v43 = vpop.f32.mrb[26].mxu1 }
 0x188   : > { %v10452_v59 = vpop.f32.mrb[27].mxu1 }
 0x189   : > { %2819 = vmatmul.mubr.bf16.gmra.mrb[84].mxu0 %v10188_v46  ;;  %v10477_v46 = vld [vmem:[%s10051_s30 + $0x110] ss:$12 sps:$4 sm:$0xff]  }
 0x18a   : > { %2666 = vmatmul.mubr.bf16.gmra.mrb[68].mxu1 %v10455_v20  ;;  %2828 = vmatprep.mubr.bf16.mxu0 %v10192_v28  ;;  %v10484_v28 = vld [vmem:[%s10051_s30 + $0x128] ss:$12 sps:$4 sm:$0xff]  }
 0x18b   : > { %2675 = vmatprep.mubr.bf16.mxu1 %v13394_v34 }
 0x18d   : > { %v10461_v22 = vpop.f32.mrb[28].mxu1 }
 0x18e   : > { %v10463_v4 = vpop.f32.mrb[29].mxu1 }
 0x18f   : > { %v10465_v16 = vpop.f32.mrb[30].mxu1 }
 0x190   : > { %v10467_v8 = vpop.f32.mrb[31].mxu1 }
 0x191   : > { %2829 = vmatmul.mubr.bf16.gmra.mrb[88].mxu0 %v10199_v49  ;;  %v10491_v49 = vld [vmem:[%s10051_s30 + $0x140] ss:$12 sps:$4 sm:$0xff]  }
 0x192   : > { %2676 = vmatmul.mubr.bf16.gmra.mrb[72].mxu1 %v10470_v60  ;;  %2838 = vmatprep.mubr.bf16.mxu0 %v10202_v50  ;;  %13395 = vst [vmem:[#allocation20_spill] sm:$0xff] %v10491_v49  ;;  %v9628_v50 = vld [vmem:[%s10051_s30 + $0x158] ss:$12 sps:$4 sm:$0xff]  }
 0x193   : > { %2685 = vmatprep.mubr.bf16.mxu1 %v13394_v34 }
 0x199   : > { %2839 = vmatmul.mubr.bf16.gmra.mrb[92].mxu0 %v10209_v55 }
 0x19a   : > { %2686 = vmatmul.mubr.bf16.gmra.mrb[76].mxu1 %v10477_v46  ;;  %2848 = vmatprep.mubr.bf16.mxu0 %v10212_v56 }
 0x19b   : > { %2695 = vmatprep.mubr.bf16.mxu1 %v13394_v34 }
 0x1a1   : > { %2849 = vmatmul.mubr.bf16.gmra.mrb[96].mxu0 %v10219_v61 }
 0x1a2   : > { %2696 = vmatmul.mubr.bf16.gmra.mrb[80].mxu1 %v10484_v28  ;;  %2858 = vmatprep.mubr.bf16.mxu0 %v10222_v62 }
 0x1a3   : > { %2705 = vmatprep.mubr.bf16.mxu1 %v13394_v34 }
 0x1a9   : > { %2859 = vmatmul.mubr.bf16.gmra.mrb[100].mxu0 %v10229_v63 }
 0x1aa   : > { %2706 = vmatmul.mubr.bf16.gmra.mrb[84].mxu1 %v10491_v49  ;;  %2868 = vmatprep.mubr.bf16.mxu0 %v10232_v1  ;;  %v9629_v49 = vld [vmem:[%s10051_s30 + $0x170] ss:$12 sps:$4 sm:$0xff]  }
 0x1ab   : > { %2715 = vmatprep.mubr.bf16.mxu1 %v13394_v34 }
 0x1b1   : > { %2869 = vmatmul.mubr.bf16.gmra.mrb[104].mxu0 %v10239_v3 }
 0x1b2   : > { %2716 = vmatmul.mubr.bf16.gmra.mrb[88].mxu1 %v9628_v50  ;;  %2878 = vmatprep.mubr.bf16.mxu0 %v10242_v5 }
 0x1b3   : > { %2725 = vmatprep.mubr.bf16.mxu1 %v13394_v34 }
 0x1b4   : > { %v2078_v55 = vpop.f32.mrb[32].mxu0 }
 0x1b5   : > { %v2272_v56 = vadd.f32 %v10344_v6, %v2078_v55  ;;  %v2080_v61 = vpop.f32.mrb[33].mxu0 }
 0x1b6   : > { %v2274_v62 = vadd.f32 %v10346_v35, %v2080_v61  ;;  %v2082_v63 = vpop.f32.mrb[34].mxu0 }
 0x1b7   : > { %v7784_v1 = vpack.c.bf16 %v2272_v56, %v2272_v56  ;;  %v2276_v3 = vadd.f32 %v10351_v10, %v2082_v63  ;;  %v2084_v5 = vpop.f32.mrb[35].mxu0  ;;  %v9563_v63 = vld [vmem:[#allocation5 + $0x498] ss:$36 sps:$4 sm:$0xff]  }
 0x1b8   : > { %v7864_v6 = vpack.c.bf16 %v2274_v62, %v2274_v62  ;;  %v2278_v50 = vadd.f32 %v10353_v38, %v2084_v5 }
 0x1b9   : > { %3975 = vst.msk [vmem:[%s10512_s13 + $0x40] sm:$0xf] %vm3958_vm0, %v7784_v1  ;;  %v7785_v55 = vpack.c.bf16 %v2276_v3, %v2276_v3  ;;  %2879 = vmatmul.mubr.bf16.gmra.mrb[108].mxu0 %v10249_v7  ;;  %4303 = vrot.lane.b32.xlu0 %v7784_v1, %s9870_s21  ;;  %v9571_v3 = vld [vmem:[#allocation5 + $0x4e4] ss:$36 sps:$4 sm:$0xff]  }
 0x1ba   : > { %2726 = vmatmul.mubr.bf16.gmra.mrb[92].mxu1 %v9629_v49  ;;  %7365 = vst.msk [vmem:[%s10512_s13 + $0x140] sm:$0xf] %vm3958_vm0, %v7864_v6  ;;  %v7865_v35 = vpack.c.bf16 %v2278_v50, %v2278_v50  ;;  %2888 = vmatprep.mubr.bf16.mxu0 %v10252_v9 }
 0x1bb   : > { %3976 = vst.msk [vmem:[%s10512_s13 + $0x44] sm:$0xf] %vm3958_vm0, %v7785_v55  ;;  %4305 = vrot.lane.b32.xlu1 %v7785_v55, %s9870_s21  ;;  %3154 = vmatprep.mubr.bf16.mxu1 %v10359_v18 }
 0x1bc   : > { %7366 = vst.msk [vmem:[%s10512_s13 + $0x144] sm:$0xf] %vm3958_vm0, %v7865_v35  ;;  %v2088_v10 = vpop.f32.mrb[36].mxu0 }
 0x1bd   : > { %v2282_v7 = vadd.f32 %v10362_v44, %v2088_v10  ;;  %v2090_v38 = vpop.f32.mrb[37].mxu0  ;;  %5253 = vrot.lane.b32.xlu0 %v7864_v6, %s9870_s21 }
 0x1be   : > { %v2284_v49 = vadd.f32 %v10364_v24, %v2090_v38  ;;  %v2092_v56 = vpop.f32.mrb[38].mxu0 }
 0x1bf   : > { %v7786_v9 = vpack.c.bf16 %v2282_v7, %v2282_v7  ;;  %v2286_v61 = vadd.f32 %v10366_v26, %v2092_v56  ;;  %v2094_v62 = vpop.f32.mrb[39].mxu0  ;;  %v9569_v26 = vld [vmem:[#allocation5 + $0x4e0] ss:$36 sps:$4 sm:$0xff]  }
 0x1c0   : > { %v7866_v18 = vpack.c.bf16 %v2284_v49, %v2284_v49  ;;  %v2288_v1 = vadd.f32 %v10368_v48, %v2094_v62 }
 0x1c1   : > { %3977 = vst.msk [vmem:[%s10512_s13 + $0x48] sm:$0xf] %vm3958_vm0, %v7786_v9  ;;  %v7787_v44 = vpack.c.bf16 %v2286_v61, %v2286_v61  ;;  %2889 = vmatmul.mubr.bf16.gmra.mrb[112].mxu0 %v10259_v11  ;;  %5255 = vrot.lane.b32.xlu0 %v7865_v35, %s9870_s21  ;;  %v9574_v11 = vld [vmem:[#allocation5 + $0x52c] ss:$36 sps:$4 sm:$0xff]  }
 0x1c2   : > { %3155 = vmatmul.mubr.bf16.vlgmr.msra.gmra.mrb[96].mxu1 %v10372_v52  ;;  %7367 = vst.msk [vmem:[%s10512_s13 + $0x148] sm:$0xf] %vm3958_vm0, %v7866_v18  ;;  %v7867_v24 = vpack.c.bf16 %v2288_v1, %v2288_v1  ;;  %4307 = vrot.lane.b32.xlu1 %v7786_v9, %s9870_s21 }
 0x1c3   : > { %3978 = vst.msk [vmem:[%s10512_s13 + $0x4c] sm:$0xf] %vm3958_vm0, %v7787_v44  ;;  %3316 = vmatpush1.bf16.msra.mxu1 %v9563_v63  ;;  %2898 = vmatprep.mubr.bf16.mxu0 %v10262_v13 }
 0x1c4   : > { %7368 = vst.msk [vmem:[%s10512_s13 + $0x14c] sm:$0xf] %vm3958_vm0, %v7867_v24  ;;  %v2098_v48 = vpop.f32.mrb[40].mxu0  ;;  %3164 = vmatprep.mubr.bf16.mxu1 %v10377_v58  ;;  %3317 = vmatprep.subr.bf16.mxu1 %v9571_v3 }
 0x1c5   : > { %v2292_v52 = vadd.f32 %v10380_v27, %v2098_v48  ;;  %v2100_v5 = vpop.f32.mrb[41].mxu0  ;;  %5257 = vrot.lane.b32.xlu0 %v7866_v18, %s9870_s21  ;;  %v9572_v27 = vld [vmem:[#allocation5 + $0x528] ss:$36 sps:$4 sm:$0xff]  }
 0x1c6   : > { %4309 = vrot.lane.b32.xlu1 %v7787_v44, %s9870_s21  ;;  %v2294_v6 = vadd.f32 %v10382_v29, %v2100_v5  ;;  %v2102_v13 = vpop.f32.mrb[42].mxu0  ;;  %v9577_v29 = vld [vmem:[#allocation5 + $0x574] ss:$36 sps:$4 sm:$0xff]  }
 0x1c7   : > { %v7788_v50 = vpack.c.bf16 %v2292_v52, %v2292_v52  ;;  %v2296_v55 = vadd.f32 %v10384_v2, %v2102_v13  ;;  %v2104_v35 = vpop.f32.mrb[43].mxu0  ;;  %3318 = vmatpush1.bf16.msra.mxu1 %v9569_v26  ;;  %v9581_v26 = vld [vmem:[#allocation5 + $0x600] ss:$36 sps:$4 sm:$0xff]  }
 0x1c8   : > { %v7868_v58 = vpack.c.bf16 %v2294_v6, %v2294_v6  ;;  %v2298_v10 = vadd.f32 %v10386_v31, %v2104_v35  ;;  %3319 = vmatprep.subr.bf16.mxu1 %v9574_v11  ;;  %v13396_v11 = vld [vmem:[#allocation19_spill] sm:$0xff] }
 0x1c9   : > { %3979 = vst.msk [vmem:[%s10512_s13 + $0x50] sm:$0xf] %vm3958_vm0, %v7788_v50  ;;  %v7789_v7 = vpack.c.bf16 %v2296_v55, %v2296_v55  ;;  %2899 = vmatmul.mubr.bf16.gmra.mrb[116].mxu0 %v10269_v15  ;;  %5259 = vrot.lane.b32.xlu0 %v7867_v24, %s9870_s21  ;;  %v9575_v15 = vld [vmem:[#allocation5 + $0x570] ss:$36 sps:$4 sm:$0xff]  }
 0x1ca   : > { %3165 = vmatmul.mubr.bf16.gmra.mrb[100].mxu1 %v10390_v39  ;;  %7369 = vst.msk [vmem:[%s10512_s13 + $0x150] sm:$0xf] %vm3958_vm0, %v7868_v58  ;;  %v7869_v2 = vpack.c.bf16 %v2298_v10, %v2298_v10  ;;  %4311 = vrot.lane.b32.xlu1 %v7788_v50, %s9870_s21 }
 0x1cb   : > { %3980 = vst.msk [vmem:[%s10512_s13 + $0x54] sm:$0xf] %vm3958_vm0, %v7789_v7  ;;  %2908 = vmatprep.mubr.bf16.mxu0 %v10272_v17  ;;  %3174 = vmatprep.mubr.bf16.mxu1 %v10395_v40 }
 0x1cc   : > { %7370 = vst.msk [vmem:[%s10512_s13 + $0x154] sm:$0xf] %vm3958_vm0, %v7869_v2  ;;  %v2108_v31 = vpop.f32.mrb[44].mxu0  ;;  %3320 = vmatpush1.bf16.msra.mxu1 %v9572_v27  ;;  %v9589_v27 = vld [vmem:[#allocation5 + $0x694] ss:$36 sps:$4 sm:$0xff]  }
 0x1cd   : > { %v2302_v39 = vadd.f32 %v10398_v45, %v2108_v31  ;;  %v2110_v38 = vpop.f32.mrb[45].mxu0  ;;  %3321 = vmatprep.subr.bf16.mxu1 %v9577_v29  ;;  %5261 = vrot.lane.b32.xlu0 %v7868_v58, %s9870_s21  ;;  %v9580_v45 = vld [vmem:[#allocation5 + $0x5bc] ss:$36 sps:$4 sm:$0xff]  }
 0x1ce   : > { %4313 = vrot.lane.b32.xlu1 %v7789_v7, %s9870_s21  ;;  %v2304_v49 = vadd.f32 %v10400_v51, %v2110_v38  ;;  %v2112_v17 = vpop.f32.mrb[46].mxu0  ;;  %v9578_v51 = vld [vmem:[#allocation5 + $0x5b8] ss:$36 sps:$4 sm:$0xff]   ;;  %v13397_v29 = vld [vmem:[#allocation11_spill] sm:$0xff] }
 0x1cf   : > { %v7790_v56 = vpack.c.bf16 %v2302_v39, %v2302_v39  ;;  %v2306_v40 = vadd.f32 %v10402_v53, %v2112_v17  ;;  %v2114_v9 = vpop.f32.mrb[47].mxu0  ;;  %v9583_v53 = vld [vmem:[#allocation5 + $0x604] ss:$36 sps:$4 sm:$0xff]  }
 0x1d0   : > { %v7870_v61 = vpack.c.bf16 %v2304_v49, %v2304_v49  ;;  %v2308_v62 = vadd.f32 %v10404_v54, %v2114_v9  ;;  %3322 = vmatpush1.bf16.msra.mxu1 %v9575_v15 }
 0x1d1   : > { %3981 = vst.msk [vmem:[%s10512_s13 + $0x58] sm:$0xf] %vm3958_vm0, %v7790_v56  ;;  %v7791_v63 = vpack.c.bf16 %v2306_v40, %v2306_v40  ;;  %2909 = vmatmul.mubr.bf16.gmra.mrb[120].mxu0 %v10279_v19  ;;  %5263 = vrot.lane.b32.xlu0 %v7869_v2, %s9870_s21  ;;  %v9631_v2 = vld [vmem:[%s10051_s30 + $0x60] ss:$12 sps:$4 sm:$0xff]  }
 0x1d2   : > { %3175 = vmatmul.mubr.bf16.gmra.mrb[104].mxu1 %v10408_v37  ;;  %7371 = vst.msk [vmem:[%s10512_s13 + $0x158] sm:$0xf] %vm3958_vm0, %v7870_v61  ;;  %v7871_v18 = vpack.c.bf16 %v2308_v62, %v2308_v62  ;;  %4315 = vrot.lane.b32.xlu1 %v7790_v56, %s9870_s21  ;;  %v13398_v62 = vld [vmem:[#allocation12_spill] sm:$0xff] }
 0x1d3   : > { %3982 = vst.msk [vmem:[%s10512_s13 + $0x5c] sm:$0xf] %vm3958_vm0, %v7791_v63  ;;  %2918 = vmatprep.mubr.bf16.mxu0 %v10282_v21  ;;  %3184 = vmatprep.mubr.bf16.mxu1 %v10413_v14 }
 0x1d4   : > { %7372 = vst.msk [vmem:[%s10512_s13 + $0x15c] sm:$0xf] %vm3958_vm0, %v7871_v18  ;;  %v2118_v19 = vpop.f32.mrb[48].mxu0  ;;  %3323 = vmatprep.subr.bf16.mxu1 %v9580_v45  ;;  %v9633_v45 = vld [vmem:[%s10051_s30 + $0x78] ss:$12 sps:$4 sm:$0xff]  }
 0x1d5   : > { %v2312_v54 = vadd.f32 %v10416_v47, %v2118_v19  ;;  %v2120_v37 = vpop.f32.mrb[49].mxu0  ;;  %3324 = vmatpush1.bf16.msra.mxu1 %v9578_v51  ;;  %5265 = vrot.lane.b32.xlu0 %v7870_v61, %s9870_s21 }
 0x1d6   : > { %4317 = vrot.lane.b32.xlu1 %v7791_v63, %s9870_s21  ;;  %v2314_v1 = vadd.f32 %v10418_v30, %v2120_v37  ;;  %v2122_v21 = vpop.f32.mrb[50].mxu0  ;;  %3325 = vmatprep.subr.bf16.mxu1 %v9583_v53  ;;  %v9586_v30 = vld [vmem:[#allocation5 + $0x64c] ss:$36 sps:$4 sm:$0xff]  }
 0x1d7   : > { %v7792_v3 = vpack.c.bf16 %v2312_v54, %v2312_v54  ;;  %v2316_v14 = vadd.f32 %v10420_v42, %v2122_v21  ;;  %v2124_v44 = vpop.f32.mrb[51].mxu0 }
 0x1d8   : > { %v7872_v24 = vpack.c.bf16 %v2314_v1, %v2314_v1  ;;  %v2318_v47 = vadd.f32 %v10422_v0, %v2124_v44  ;;  %v9630_v0 = vld [vmem:[%s10051_s30 + $0x64] ss:$12 sps:$4 sm:$0xff]  }
 0x1d9   : > { %3983 = vst.msk [vmem:[%s10512_s13 + $0x60] sm:$0xf] %vm3958_vm0, %v7792_v3  ;;  %v7793_v48 = vpack.c.bf16 %v2316_v14, %v2316_v14  ;;  %2919 = vmatmul.mubr.bf16.gmra.mrb[124].mxu0 %v10289_v23  ;;  %5267 = vrot.lane.b32.xlu0 %v7871_v18, %s9870_s21  ;;  %v9584_v23 = vld [vmem:[#allocation5 + $0x648] ss:$36 sps:$4 sm:$0xff]   ;;  %v9635_v14 = vld [vmem:[%s10051_s30 + $0x90] ss:$12 sps:$4 sm:$0xff]  }
 0x1da   : > { %3185 = vmatmul.mubr.bf16.gmra.mrb[108].mxu1 %v13396_v11  ;;  %7373 = vst.msk [vmem:[%s10512_s13 + $0x160] sm:$0xf] %vm3958_vm0, %v7872_v24  ;;  %v7873_v52 = vpack.c.bf16 %v2318_v47, %v2318_v47  ;;  %4319 = vrot.lane.b32.xlu1 %v7792_v3, %s9870_s21  ;;  %v13399_v3 = vld [vmem:[#allocation13_spill] sm:$0xff] }
 0x1db   : > { %3984 = vst.msk [vmem:[%s10512_s13 + $0x64] sm:$0xf] %vm3958_vm0, %v7793_v48  ;;  %2961 = vmatprep.mubr.bf16.mxu0 %v13394_v34  ;;  %3194 = vmatprep.mubr.bf16.mxu1 %v9630_v0  ;;  %v9637_v0 = vld [vmem:[%s10051_s30 + $0xa8] ss:$12 sps:$4 sm:$0xff]  }
 0x1dc   : > { %7374 = vst.msk [vmem:[%s10512_s13 + $0x164] sm:$0xf] %vm3958_vm0, %v7873_v52  ;;  %v2128_v42 = vpop.f32.mrb[52].mxu0  ;;  %3326 = vmatpush1.bf16.msra.mxu1 %v9581_v26 }
 0x1dd   : > { %v2322_v5 = vadd.f32 %v10431_v33, %v2128_v42  ;;  %v2130_v6 = vpop.f32.mrb[53].mxu0  ;;  %3327 = vmatprep.subr.bf16.mxu1 %v9586_v30  ;;  %5269 = vrot.lane.b32.xlu0 %v7872_v24, %s9870_s21  ;;  %v9638_v42 = vld [vmem:[%s10051_s30 + $0xc4] ss:$12 sps:$4 sm:$0xff]  }
 0x1de   : > { %4321 = vrot.lane.b32.xlu1 %v7793_v48, %s9870_s21  ;;  %v2324_v13 = vadd.f32 %v10433_v32, %v2130_v6  ;;  %v2132_v50 = vpop.f32.mrb[54].mxu0  ;;  %v9587_v32 = vld [vmem:[#allocation5 + $0x690] ss:$36 sps:$4 sm:$0xff]  }
 0x1df   : > { %v7794_v55 = vpack.c.bf16 %v2322_v5, %v2322_v5  ;;  %v2326_v35 = vadd.f32 %v10435_v36, %v2132_v50  ;;  %v2134_v58 = vpop.f32.mrb[55].mxu0 }
 0x1e0   : > { %v7874_v10 = vpack.c.bf16 %v2324_v13, %v2324_v13  ;;  %v2328_v33 = vadd.f32 %v10437_v25, %v2134_v58  ;;  %3328 = vmatpush1.bf16.msra.mxu1 %v9584_v23  ;;  %v9632_v25 = vld [vmem:[%s10051_s30 + $0x7c] ss:$12 sps:$4 sm:$0xff]  }
 0x1e1   : > { %3985 = vst.msk [vmem:[%s10512_s13 + $0x68] sm:$0xf] %vm3958_vm0, %v7794_v55  ;;  %v7795_v7 = vpack.c.bf16 %v2326_v35, %v2326_v35  ;;  %2962 = vmatmul.mubr.bf16.vlgmr.msra.gmra.mrb[64].mxu0 %v13397_v29  ;;  %3329 = vmatprep.subr.bf16.mxu1 %v9589_v27  ;;  %v9640_v27 = vld [vmem:[%s10051_s30 + $0xdc] ss:$12 sps:$4 sm:$0xff]  }
 0x1e2   : > { %3195 = vmatmul.mubr.bf16.gmra.mrb[112].mxu1 %v9631_v2  ;;  %7375 = vst.msk [vmem:[%s10512_s13 + $0x168] sm:$0xf] %vm3958_vm0, %v7874_v10  ;;  %v7875_v36 = vpack.c.bf16 %v2328_v33, %v2328_v33  ;;  %5271 = vrot.lane.b32.xlu1 %v7873_v52, %s9870_s21  ;;  %v13400_v52 = vld [vmem:[#allocation14_spill] sm:$0xff]  ;;  %v9639_v33 = vld [vmem:[%s10051_s30 + $0xc0] ss:$12 sps:$4 sm:$0xff]  }
 0x1e3   : > { %5273 = vrot.lane.b32.xlu0 %v7874_v10, %s9870_s21  ;;  %3986 = vst.msk [vmem:[%s10512_s13 + $0x6c] sm:$0xf] %vm3958_vm0, %v7795_v7  ;;  %2971 = vmatprep.mubr.bf16.mxu0 %v13394_v34  ;;  %v13401_v10 = vld [vmem:[#allocation15_spill] sm:$0xff] }
 0x1e4   : > { %3204 = vmatprep.mubr.bf16.mxu1 %v9632_v25  ;;  %7376 = vst.msk [vmem:[%s10512_s13 + $0x16c] sm:$0xf] %vm3958_vm0, %v7875_v36  ;;  %v2138_v31 = vpop.f32.mrb[56].mxu0  ;;  %3330 = vmatpush1.bf16.msra.mxu1 %v9587_v32 }
 0x1e5   : > { %v2332_v15 = vadd.f32 %v10446_v57, %v2138_v31  ;;  %v2140_v39 = vpop.f32.mrb[57].mxu0 }
 0x1e6   : > { %4323 = vrot.lane.b32.xlu1 %v7794_v55, %s9870_s21  ;;  %v2334_v38 = vadd.f32 %v10448_v41, %v2140_v39  ;;  %v2142_v49 = vpop.f32.mrb[58].mxu0  ;;  %v13402_v39 = vld [vmem:[#allocation16_spill] sm:$0xff] }
 0x1e7   : > { %5275 = vrot.lane.b32.xlu0 %v7875_v36, %s9870_s21  ;;  %v7796_v17 = vpack.c.bf16 %v2332_v15, %v2332_v15  ;;  %v2336_v56 = vadd.f32 %v10450_v43, %v2142_v49  ;;  %v2144_v40 = vpop.f32.mrb[59].mxu0  ;;  %v9634_v43 = vld [vmem:[%s10051_s30 + $0x94] ss:$12 sps:$4 sm:$0xff]  }
 0x1e8   : > { %v7876_v9 = vpack.c.bf16 %v2334_v38, %v2334_v38  ;;  %v2338_v57 = vadd.f32 %v10452_v59, %v2144_v40  ;;  %v9641_v38 = vld [vmem:[%s10051_s30 + $0xd8] ss:$12 sps:$4 sm:$0xff]   ;;  %v9642_v49 = vld [vmem:[%s10051_s30 + $0xf4] ss:$12 sps:$4 sm:$0xff]  }
 0x1e9   : > { %3987 = vst.msk [vmem:[%s10512_s13 + $0x70] sm:$0xf] %vm3958_vm0, %v7796_v17  ;;  %v7797_v61 = vpack.c.bf16 %v2336_v56, %v2336_v56  ;;  %2972 = vmatmul.mubr.bf16.gmra.mrb[68].mxu0 %v13398_v62 }
 0x1ea   : > { %3205 = vmatmul.mubr.bf16.gmra.mrb[116].mxu1 %v9633_v45  ;;  %7377 = vst.msk [vmem:[%s10512_s13 + $0x170] sm:$0xf] %vm3958_vm0, %v7876_v9  ;;  %v7877_v41 = vpack.c.bf16 %v2338_v57, %v2338_v57  ;;  %4325 = vrot.lane.b32.xlu1 %v7795_v7, %s9870_s21 }
 0x1eb   : > { %4327 = vrot.lane.b32.xlu0 %v7796_v17, %s9870_s21  ;;  %3988 = vst.msk [vmem:[%s10512_s13 + $0x74] sm:$0xf] %vm3958_vm0, %v7797_v61  ;;  %2981 = vmatprep.mubr.bf16.mxu0 %v13394_v34 }
 0x1ec   : > { %3214 = vmatprep.mubr.bf16.mxu1 %v9634_v43  ;;  %7378 = vst.msk [vmem:[%s10512_s13 + $0x174] sm:$0xf] %vm3958_vm0, %v7877_v41  ;;  %v2148_v59 = vpop.f32.mrb[60].mxu0  ;;  %v9643_v43 = vld [vmem:[%s10051_s30 + $0xf0] ss:$12 sps:$4 sm:$0xff]  }
 0x1ed   : > { %v2342_v63 = vadd.f32 %v10461_v22, %v2148_v59  ;;  %v2150_v51 = vpop.f32.mrb[61].mxu0  ;;  %v9644_v59 = vld [vmem:[%s10051_s30 + $0x10c] ss:$12 sps:$4 sm:$0xff]  }
 0x1ee   : > { %4329 = vrot.lane.b32.xlu1 %v7797_v61, %s9870_s21  ;;  %v2344_v18 = vadd.f32 %v10463_v4, %v2150_v51  ;;  %v2152_v53 = vpop.f32.mrb[62].mxu0 }
 0x1ef   : > { %5277 = vrot.lane.b32.xlu0 %v7876_v9, %s9870_s21  ;;  %v7798_v19 = vpack.c.bf16 %v2342_v63, %v2342_v63  ;;  %v2346_v54 = vadd.f32 %v10465_v16, %v2152_v53  ;;  %v2154_v37 = vpop.f32.mrb[63].mxu0  ;;  %v9636_v16 = vld [vmem:[%s10051_s30 + $0xac] ss:$12 sps:$4 sm:$0xff]  }
 0x1f0   : > { %v7878_v1 = vpack.c.bf16 %v2344_v18, %v2344_v18  ;;  %v2348_v21 = vadd.f32 %v10467_v8, %v2154_v37 }
 0x1f1   : > { %3989 = vst.msk [vmem:[%s10512_s13 + $0x78] sm:$0xf] %vm3958_vm0, %v7798_v19  ;;  %v7799_v22 = vpack.c.bf16 %v2346_v54, %v2346_v54  ;;  %2982 = vmatmul.mubr.bf16.gmra.mrb[72].mxu0 %v13399_v3 }
 0x1f2   : > { %3215 = vmatmul.mubr.bf16.gmra.mrb[120].mxu1 %v9635_v14  ;;  %7379 = vst.msk [vmem:[%s10512_s13 + $0x178] sm:$0xf] %vm3958_vm0, %v7878_v1  ;;  %v7879_v4 = vpack.c.bf16 %v2348_v21, %v2348_v21  ;;  %2991 = vmatprep.mubr.bf16.mxu0 %v13394_v34 }
 0x1f3   : > { %5279 = vrot.lane.b32.xlu0 %v7877_v41, %s9870_s21  ;;  %3990 = vst.msk [vmem:[%s10512_s13 + $0x7c] sm:$0xf] %vm3958_vm0, %v7799_v22  ;;  %4333 = vrot.lane.b32.xlu1 %v7799_v22, %s9870_s21  ;;  %v13403_v41 = vld [vmem:[#allocation17_spill] sm:$0xff] }
 0x1f4   : > { %3224 = vmatprep.mubr.bf16.mxu1 %v9636_v16  ;;  %7380 = vst.msk [vmem:[%s10512_s13 + $0x17c] sm:$0xf] %vm3958_vm0, %v7879_v4  ;;  %v2191_v8 = vpop.f32.mrb[0].mxu0 }
 0x1f5   : > { %v7768_v44 = vpack.c.bf16 %v2191_v8, %v2191_v8  ;;  %v2193_v24 = vpop.f32.mrb[1].mxu0 }
 0x1f6   : > { %v7848_v47 = vpack.c.bf16 %v2193_v24, %v2193_v24  ;;  %v2195_v26 = vpop.f32.mrb[2].mxu0  ;;  %v9645_v24 = vld [vmem:[%s10051_s30 + $0x108] ss:$12 sps:$4 sm:$0xff]  }
 0x1f7   : > { %4331 = vrot.lane.b32.xlu0 %v7798_v19, %s9870_s21  ;;  %3959 = vst.msk [vmem:[%s10512_s13] sm:$0xf] %vm3958_vm0, %v7768_v44  ;;  %v7769_v48 = vpack.c.bf16 %v2195_v26, %v2195_v26  ;;  %4271 = vrot.lane.b32.xlu1 %v7768_v44, %s9870_s21  ;;  %v2197_v11 = vpop.f32.mrb[3].mxu0  ;;  %v13404_v44 = vld [vmem:[#allocation18_spill] sm:$0xff] }
 0x1f8   : > { %7349 = vst.msk [vmem:[%s10512_s13 + $0x100] sm:$0xf] %vm3958_vm0, %v7848_v47  ;;  %v7849_v30 = vpack.c.bf16 %v2197_v11, %v2197_v11 }
 0x1f9   : > { %3960 = vst.msk [vmem:[%s10512_s13 + $0x4] sm:$0xf] %vm3958_vm0, %v7769_v48  ;;  %2992 = vmatmul.mubr.bf16.gmra.mrb[76].mxu0 %v13400_v52 }
 0x1fa   : > { %3225 = vmatmul.mubr.bf16.gmra.mrb[124].mxu1 %v9637_v0  ;;  %7350 = vst.msk [vmem:[%s10512_s13 + $0x104] sm:$0xf] %vm3958_vm0, %v7849_v30  ;;  %3001 = vmatprep.mubr.bf16.mxu0 %v13394_v34 }
 0x1fb   : > { %5281 = vrot.lane.b32.xlu0 %v7878_v1, %s9870_s21  ;;  %4273 = vrot.lane.b32.xlu1 %v7769_v48, %s9870_s21 }
 0x1fc   : > { %3234 = vmatprep.mubr.bf16.mxu1 %v9638_v42  ;;  %v2201_v23 = vpop.f32.mrb[4].mxu0 }
 0x1fd   : > { %v7770_v5 = vpack.c.bf16 %v2201_v23, %v2201_v23  ;;  %v2203_v6 = vpop.f32.mrb[5].mxu0 }
 0x1fe   : > { %v7850_v13 = vpack.c.bf16 %v2203_v6, %v2203_v6  ;;  %v2205_v50 = vpop.f32.mrb[6].mxu0 }
 0x1ff   : > { %5283 = vrot.lane.b32.xlu0 %v7879_v4, %s9870_s21  ;;  %3961 = vst.msk [vmem:[%s10512_s13 + $0x8] sm:$0xf] %vm3958_vm0, %v7770_v5  ;;  %v7771_v55 = vpack.c.bf16 %v2205_v50, %v2205_v50  ;;  %4275 = vrot.lane.b32.xlu1 %v7770_v5, %s9870_s21  ;;  %v2207_v35 = vpop.f32.mrb[7].mxu0 }
 0x200   : > { %7351 = vst.msk [vmem:[%s10512_s13 + $0x108] sm:$0xf] %vm3958_vm0, %v7850_v13  ;;  %v7851_v58 = vpack.c.bf16 %v2207_v35, %v2207_v35 }
 0x201   : > { %3962 = vst.msk [vmem:[%s10512_s13 + $0xc] sm:$0xf] %vm3958_vm0, %v7771_v55  ;;  %3002 = vmatmul.mubr.bf16.gmra.mrb[80].mxu0 %v13401_v10  ;;  %v9647_v10 = vld [vmem:[%s10051_s30 + $0x120] ss:$12 sps:$4 sm:$0xff]  }
 0x202   : > { %3235 = vmatmul.mubr.bf16.gmra.mrb[128].mxu1 %v9639_v33  ;;  %7352 = vst.msk [vmem:[%s10512_s13 + $0x10c] sm:$0xf] %vm3958_vm0, %v7851_v58  ;;  %3011 = vmatprep.mubr.bf16.mxu0 %v13394_v34  ;;  %v9648_v33 = vld [vmem:[%s10051_s30 + $0x13c] ss:$12 sps:$4 sm:$0xff]  }
 0x203   : > { %5221 = vrot.lane.b32.xlu0 %v7848_v47, %s9870_s21  ;;  %4277 = vrot.lane.b32.xlu1 %v7771_v55, %s9870_s21  ;;  %v9646_v47 = vld [vmem:[%s10051_s30 + $0x124] ss:$12 sps:$4 sm:$0xff]  }
 0x204   : > { %3244 = vmatprep.mubr.bf16.mxu1 %v9640_v27  ;;  %v2211_v7 = vpop.f32.mrb[8].mxu0 }
 0x205   : > { %v7772_v29 = vpack.c.bf16 %v2211_v7, %v2211_v7  ;;  %v2213_v2 = vpop.f32.mrb[9].mxu0 }
 0x206   : > { %v7852_v32 = vpack.c.bf16 %v2213_v2, %v2213_v2  ;;  %v2215_v36 = vpop.f32.mrb[10].mxu0 }
 0x207   : > { %5223 = vrot.lane.b32.xlu0 %v7849_v30, %s9870_s21  ;;  %3963 = vst.msk [vmem:[%s10512_s13 + $0x10] sm:$0xf] %vm3958_vm0, %v7772_v29  ;;  %v7773_v25 = vpack.c.bf16 %v2215_v36, %v2215_v36  ;;  %4279 = vrot.lane.b32.xlu1 %v7772_v29, %s9870_s21  ;;  %v2217_v31 = vpop.f32.mrb[11].mxu0 }
 0x208   : > { %7353 = vst.msk [vmem:[%s10512_s13 + $0x110] sm:$0xf] %vm3958_vm0, %v7852_v32  ;;  %v7853_v15 = vpack.c.bf16 %v2217_v31, %v2217_v31 }
 0x209   : > { %3964 = vst.msk [vmem:[%s10512_s13 + $0x14] sm:$0xf] %vm3958_vm0, %v7773_v25  ;;  %3012 = vmatmul.mubr.bf16.gmra.mrb[84].mxu0 %v13402_v39 }
 0x20a   : > { %3245 = vmatmul.mubr.bf16.gmra.mrb[132].mxu1 %v9641_v38  ;;  %7354 = vst.msk [vmem:[%s10512_s13 + $0x114] sm:$0xf] %vm3958_vm0, %v7853_v15  ;;  %3021 = vmatprep.mubr.bf16.mxu0 %v13394_v34 }
 0x20b   : > { %5225 = vrot.lane.b32.xlu0 %v7850_v13, %s9870_s21  ;;  %4281 = vrot.lane.b32.xlu1 %v7773_v25, %s9870_s21 }
 0x20c   : > { %3254 = vmatprep.mubr.bf16.mxu1 %v9642_v49  ;;  %v2221_v17 = vpop.f32.mrb[12].mxu0 }
 0x20d   : > { %v7774_v56 = vpack.c.bf16 %v2221_v17, %v2221_v17  ;;  %v2223_v40 = vpop.f32.mrb[13].mxu0 }
 0x20e   : > { %v7854_v9 = vpack.c.bf16 %v2223_v40, %v2223_v40  ;;  %v2225_v57 = vpop.f32.mrb[14].mxu0  ;;  %v9649_v40 = vld [vmem:[%s10051_s30 + $0x138] ss:$12 sps:$4 sm:$0xff]  }
 0x20f   : > { %5227 = vrot.lane.b32.xlu0 %v7851_v58, %s9870_s21  ;;  %3965 = vst.msk [vmem:[%s10512_s13 + $0x18] sm:$0xf] %vm3958_vm0, %v7774_v56  ;;  %v7775_v61 = vpack.c.bf16 %v2225_v57, %v2225_v57  ;;  %4283 = vrot.lane.b32.xlu1 %v7774_v56, %s9870_s21  ;;  %v2227_v62 = vpop.f32.mrb[15].mxu0 }
 0x210   : > { %7355 = vst.msk [vmem:[%s10512_s13 + $0x118] sm:$0xf] %vm3958_vm0, %v7854_v9  ;;  %v7855_v45 = vpack.c.bf16 %v2227_v62, %v2227_v62 }
 0x211   : > { %3966 = vst.msk [vmem:[%s10512_s13 + $0x1c] sm:$0xf] %vm3958_vm0, %v7775_v61  ;;  %3022 = vmatmul.mubr.bf16.gmra.mrb[88].mxu0 %v13403_v41 }
 0x212   : > { %3255 = vmatmul.mubr.bf16.gmra.mrb[136].mxu1 %v9643_v43  ;;  %7356 = vst.msk [vmem:[%s10512_s13 + $0x11c] sm:$0xf] %vm3958_vm0, %v7855_v45  ;;  %3031 = vmatprep.mubr.bf16.mxu0 %v13394_v34 }
 0x213   : > { %5229 = vrot.lane.b32.xlu0 %v7852_v32, %s9870_s21  ;;  %4285 = vrot.lane.b32.xlu1 %v7775_v61, %s9870_s21 }
 0x214   : > { %3264 = vmatprep.mubr.bf16.mxu1 %v9644_v59  ;;  %v2231_v63 = vpop.f32.mrb[16].mxu0 }
 0x215   : > { %v2577_v51 = vpop.f32.mrb[32].mxu1  ;;  %v7776_v18 = vpack.c.bf16 %v2231_v63, %v2231_v63  ;;  %v2233_v19 = vpop.f32.mrb[17].mxu0 }
 0x216   : > { %v7928_v53 = vpack.c.bf16 %v2577_v51, %v2577_v51  ;;  %v10734_v54 = vpop.f32.mrb[33].mxu1  ;;  %v10736_v37 = vpack.c.bf16 %v2233_v19, %v2233_v19  ;;  %v2235_v21 = vpop.f32.mrb[18].mxu0 }
 0x217   : > { %v2581_v1 = vpop.f32.mrb[34].mxu1  ;;  %5231 = vrot.lane.b32.xlu0 %v7853_v15, %s9870_s21  ;;  %3967 = vst.msk [vmem:[%s10512_s13 + $0x20] sm:$0xf] %vm3958_vm0, %v7776_v18  ;;  %v7777_v3 = vpack.c.bf16 %v2235_v21, %v2235_v21  ;;  %4287 = vrot.lane.b32.xlu1 %v7776_v18, %s9870_s21  ;;  %v2237_v4 = vpop.f32.mrb[19].mxu0 }
 0x218   : > { %7573 = vst.msk [vmem:[%s10512_s13 + $0x200] sm:$0xf] %vm3958_vm0, %v7928_v53  ;;  %v10743_v22 = vpack.c.bf16 %v2581_v1, %v2581_v1  ;;  %v10745_v14 = vpop.f32.mrb[35].mxu1  ;;  %7357 = vst.msk [vmem:[%s10512_s13 + $0x120] sm:$0xf] %vm3958_vm0, %v10736_v37  ;;  %v10753_v8 = vpack.c.bf16 %v2237_v4, %v2237_v4 }
 0x219   : > { %v8566_v16 = vpack.i.bf16 %v10745_v14, %v10734_v54  ;;  %3968 = vst.msk [vmem:[%s10512_s13 + $0x24] sm:$0xf] %vm3958_vm0, %v7777_v3  ;;  %3032 = vmatmul.mubr.bf16.gmra.mrb[92].mxu0 %v13404_v44 }
 0x21a   : > { %7574 = vst.msk [vmem:[%s10512_s13 + $0x204] sm:$0xf] %vm3958_vm0, %v10743_v22  ;;  %3265 = vmatmul.mubr.bf16.gmra.mrb[140].mxu1 %v9645_v24  ;;  %7358 = vst.msk [vmem:[%s10512_s13 + $0x124] sm:$0xf] %vm3958_vm0, %v10753_v8  ;;  %3041 = vmatprep.mubr.bf16.mxu0 %v13394_v34 }
 0x21b   : > { %5233 = vrot.lane.b32.xlu0 %v7854_v9, %s9870_s21  ;;  %4289 = vrot.lane.b32.xlu1 %v7777_v3, %s9870_s21  ;;  %v9650_v9 = vld [vmem:[%s10051_s30 + $0x154] ss:$12 sps:$4 sm:$0xff]   ;;  %v9651_v3 = vld [vmem:[%s10051_s30 + $0x150] ss:$12 sps:$4 sm:$0xff]  }
 0x21c   : > { %3274 = vmatprep.mubr.bf16.mxu1 %v9646_v47  ;;  %v2241_v26 = vpop.f32.mrb[20].mxu0 }
 0x21d   : > { %v2587_v48 = vpop.f32.mrb[36].mxu1  ;;  %v7778_v11 = vpack.c.bf16 %v2241_v26, %v2241_v26  ;;  %v2243_v52 = vpop.f32.mrb[21].mxu0 }
 0x21e   : > { %v10769_v30 = vpack.c.bf16 %v2587_v48, %v2587_v48  ;;  %v10771_v0 = vpop.f32.mrb[37].mxu1  ;;  %v10773_v42 = vpack.c.bf16 %v2243_v52, %v2243_v52  ;;  %v2245_v5 = vpop.f32.mrb[22].mxu0 }
 0x21f   : > { %v2591_v23 = vpop.f32.mrb[38].mxu1  ;;  %5235 = vrot.lane.b32.xlu0 %v7855_v45, %s9870_s21  ;;  %3969 = vst.msk [vmem:[%s10512_s13 + $0x28] sm:$0xf] %vm3958_vm0, %v7778_v11  ;;  %v7779_v13 = vpack.c.bf16 %v2245_v5, %v2245_v5  ;;  %4291 = vrot.lane.b32.xlu1 %v7778_v11, %s9870_s21  ;;  %v2247_v55 = vpop.f32.mrb[23].mxu0 }
 0x220   : > { %7575 = vst.msk [vmem:[%s10512_s13 + $0x208] sm:$0xf] %vm3958_vm0, %v10769_v30  ;;  %v10781_v6 = vpack.c.bf16 %v2591_v23, %v2591_v23  ;;  %v10783_v50 = vpop.f32.mrb[39].mxu1  ;;  %7359 = vst.msk [vmem:[%s10512_s13 + $0x128] sm:$0xf] %vm3958_vm0, %v10773_v42  ;;  %v10791_v58 = vpack.c.bf16 %v2247_v55, %v2247_v55 }
 0x221   : > { %v8571_v35 = vpack.i.bf16 %v10783_v50, %v10771_v0  ;;  %3970 = vst.msk [vmem:[%s10512_s13 + $0x2c] sm:$0xf] %vm3958_vm0, %v7779_v13  ;;  %3042 = vmatmul.mubr.bf16.gmra.mrb[96].mxu0 %v10440_v12 }
 0x222   : > { %7576 = vst.msk [vmem:[%s10512_s13 + $0x20c] sm:$0xf] %vm3958_vm0, %v10781_v6  ;;  %3275 = vmatmul.mubr.bf16.gmra.mrb[144].mxu1 %v9647_v10  ;;  %7360 = vst.msk [vmem:[%s10512_s13 + $0x12c] sm:$0xf] %vm3958_vm0, %v10791_v58  ;;  %3051 = vmatprep.mubr.bf16.mxu0 %v13394_v34 }
 0x223   : > { %6171 = vrot.lane.b32.xlu0 %v7928_v53, %s9870_s21  ;;  %8572 = vrot.lane.b32.xlu1 %v8571_v35, %s9870_s21 }
 0x224   : > { %3284 = vmatprep.mubr.bf16.mxu1 %v9648_v33  ;;  %v2251_v27 = vpop.f32.mrb[24].mxu0 }
 0x225   : > { %v2597_v7 = vpop.f32.mrb[40].mxu1  ;;  %v7780_v29 = vpack.c.bf16 %v2251_v27, %v2251_v27  ;;  %v2253_v2 = vpop.f32.mrb[25].mxu0 }
 0x226   : > { %v10807_v12 = vpack.c.bf16 %v2597_v7, %v2597_v7  ;;  %v10809_v32 = vpop.f32.mrb[41].mxu1  ;;  %v10811_v36 = vpack.c.bf16 %v2253_v2, %v2253_v2  ;;  %v2255_v31 = vpop.f32.mrb[26].mxu0 }
 0x227   : > { %v2601_v25 = vpop.f32.mrb[42].mxu1  ;;  %8567 = vrot.lane.b32.xlu0 %v8566_v16, %s9870_s21  ;;  %3971 = vst.msk [vmem:[%s10512_s13 + $0x30] sm:$0xf] %vm3958_vm0, %v7780_v29  ;;  %v7781_v39 = vpack.c.bf16 %v2255_v31, %v2255_v31  ;;  %4293 = vrot.lane.b32.xlu1 %v7779_v13, %s9870_s21  ;;  %v2257_v49 = vpop.f32.mrb[27].mxu0  ;;  %v9652_v16 = vld [vmem:[%s10051_s30 + $0x16c] ss:$12 sps:$4 sm:$0xff]  }
 0x228   : > { %7577 = vst.msk [vmem:[%s10512_s13 + $0x210] sm:$0xf] %vm3958_vm0, %v10807_v12  ;;  %v10819_v15 = vpack.c.bf16 %v2601_v25, %v2601_v25  ;;  %v10821_v38 = vpop.f32.mrb[43].mxu1  ;;  %7361 = vst.msk [vmem:[%s10512_s13 + $0x130] sm:$0xf] %vm3958_vm0, %v10811_v36  ;;  %v10829_v56 = vpack.c.bf16 %v2257_v49, %v2257_v49 }
 0x229   : > { %v8576_v17 = vpack.i.bf16 %v10821_v38, %v10809_v32  ;;  %3972 = vst.msk [vmem:[%s10512_s13 + $0x34] sm:$0xf] %vm3958_vm0, %v7781_v39  ;;  %3052 = vmatmul.mubr.bf16.gmra.mrb[100].mxu0 %v10455_v20 }
 0x22a   : > { %7578 = vst.msk [vmem:[%s10512_s13 + $0x214] sm:$0xf] %vm3958_vm0, %v10819_v15  ;;  %3285 = vmatmul.mubr.bf16.gmra.mrb[148].mxu1 %v9649_v40  ;;  %7362 = vst.msk [vmem:[%s10512_s13 + $0x134] sm:$0xf] %vm3958_vm0, %v10829_v56  ;;  %3061 = vmatprep.mubr.bf16.mxu0 %v13394_v34 }
 0x22b   : > { %5237 = vrot.lane.b32.xlu0 %v10736_v37, %s9870_s21  ;;  %4295 = vrot.lane.b32.xlu1 %v7780_v29, %s9870_s21  ;;  %v4304_v57 = vpop.permute.xlu0 %4303 }
 0x22c   : > { %3294 = vmatprep.mubr.bf16.mxu1 %v9650_v9  ;;  %v2261_v61 = vpop.f32.mrb[28].mxu0  ;;  %7253 = vst.msk [vmem:[%s10512_s13 + $0xc0] sm:$0xf] %vm3958_vm0, %v4304_v57 }
 0x22d   : > { %v7782_v20 = vpack.c.bf16 %v2261_v61, %v2261_v61  ;;  %v2607_v62 = vpop.f32.mrb[44].mxu1  ;;  %v4306_v45 = vpop.permute.xlu1 %4305 }
 0x22e   : > { %v10848_v41 = vpack.c.bf16 %v2607_v62, %v2607_v62  ;;  %v10850_v43 = vpop.f32.mrb[45].mxu1  ;;  %7254 = vst.msk [vmem:[%s10512_s13 + $0xc4] sm:$0xf] %vm3958_vm0, %v4306_v45  ;;  %v2263_v59 = vpop.f32.mrb[29].mxu0  ;;  %v9655_v62 = vld [vmem:[%s10051_s30 + $0x20] ss:$12 sps:$4 sm:$0xff]  }
 0x22f   : > { %6173 = vrot.lane.b32.xlu0 %v10743_v22, %s9870_s21  ;;  %3973 = vst.msk [vmem:[%s10512_s13 + $0x38] sm:$0xf] %vm3958_vm0, %v7782_v20  ;;  %v10858_v63 = vpack.c.bf16 %v2263_v59, %v2263_v59  ;;  %v2611_v51 = vpop.f32.mrb[46].mxu1  ;;  %v2265_v18 = vpop.f32.mrb[30].mxu0  ;;  %4297 = vrot.lane.b32.xlu1 %v7781_v39, %s9870_s21 }
 0x230   : > { %7579 = vst.msk [vmem:[%s10512_s13 + $0x218] sm:$0xf] %vm3958_vm0, %v10848_v41  ;;  %v10864_v53 = vpack.c.bf16 %v2611_v51, %v2611_v51  ;;  %v7783_v19 = vpack.c.bf16 %v2265_v18, %v2265_v18  ;;  %v10866_v37 = vpop.f32.mrb[47].mxu1  ;;  %v5254_v1 = vpop.permute.xlu0 %5253 }
 0x231   : > { %7363 = vst.msk [vmem:[%s10512_s13 + $0x138] sm:$0xf] %vm3958_vm0, %v10858_v63  ;;  %v8581_v21 = vpack.i.bf16 %v10866_v37, %v10850_v43  ;;  %7477 = vst.msk [vmem:[%s10512_s13 + $0x1c0] sm:$0xf] %vm3958_vm0, %v5254_v1  ;;  %v2267_v22 = vpop.f32.mrb[31].mxu0  ;;  %3062 = vmatmul.mubr.bf16.gmra.mrb[104].mxu0 %v10470_v60 }
 0x232   : > { %3295 = vmatmul.mubr.bf16.gmra.mrb[152].mxu1 %v9651_v3  ;;  %7580 = vst.msk [vmem:[%s10512_s13 + $0x21c] sm:$0xf] %vm3958_vm0, %v10864_v53  ;;  %3974 = vst.msk [vmem:[%s10512_s13 + $0x3c] sm:$0xf] %vm3958_vm0, %v7783_v19  ;;  %v10882_v4 = vpack.c.bf16 %v2267_v22, %v2267_v22  ;;  %3071 = vmatprep.mubr.bf16.mxu0 %v13394_v34 }
 0x233   : > { %5239 = vrot.lane.b32.xlu0 %v10753_v8, %s9870_s21  ;;  %4299 = vrot.lane.b32.xlu1 %v7782_v20, %s9870_s21 }
 0x234   : > { %3304 = vmatprep.mubr.bf16.mxu1 %v9652_v16  ;;  %7364 = vst.msk [vmem:[%s10512_s13 + $0x13c] sm:$0xf] %vm3958_vm0, %v10882_v4  ;;  %v5256_v60 = vpop.permute.xlu0 %5255  ;;  %v4308_v44 = vpop.permute.xlu1 %4307 }
 0x235   : > { %7478 = vst.msk [vmem:[%s10512_s13 + $0x1c4] sm:$0xf] %vm3958_vm0, %v5256_v60  ;;  %7255 = vst.msk [vmem:[%s10512_s13 + $0xc8] sm:$0xf] %vm3958_vm0, %v4308_v44  ;;  %v2617_v24 = vpop.f32.mrb[48].mxu1 }
 0x236   : > { %v10896_v8 = vpack.c.bf16 %v2617_v24, %v2617_v24  ;;  %v10898_v47 = vpop.f32.mrb[49].mxu1  ;;  %v9657_v60 = vld [vmem:[%s10051_s30 + $0x38] ss:$12 sps:$4 sm:$0xff]  }
 0x237   : > { %6175 = vrot.lane.b32.xlu0 %v10769_v30, %s9870_s21  ;;  %v2621_v26 = vpop.f32.mrb[50].mxu1  ;;  %8582 = vrot.lane.b32.xlu1 %v8581_v21, %s9870_s21  ;;  %v9653_v30 = vld [vmem:[%s10051_s30 + $0x168] ss:$12 sps:$4 sm:$0xff]  }
 0x238   : > { %7581 = vst.msk [vmem:[%s10512_s13 + $0x220] sm:$0xf] %vm3958_vm0, %v10896_v8  ;;  %v10906_v48 = vpack.c.bf16 %v2621_v26, %v2621_v26  ;;  %v10908_v11 = vpop.f32.mrb[51].mxu1  ;;  %v5258_v52 = vpop.permute.xlu0 %5257 }
 0x239   : > { %v8586_v23 = vpack.i.bf16 %v10908_v11, %v10898_v47  ;;  %7479 = vst.msk [vmem:[%s10512_s13 + $0x1c8] sm:$0xf] %vm3958_vm0, %v5258_v52  ;;  %v4310_v5 = vpop.permute.xlu1 %4309  ;;  %3072 = vmatmul.mubr.bf16.gmra.mrb[108].mxu0 %v10477_v46 }
 0x23a   : > { %3305 = vmatmul.mubr.bf16.gmra.mrb[156].mxu1 %v9653_v30  ;;  %7582 = vst.msk [vmem:[%s10512_s13 + $0x224] sm:$0xf] %vm3958_vm0, %v10906_v48  ;;  %7256 = vst.msk [vmem:[%s10512_s13 + $0xcc] sm:$0xf] %vm3958_vm0, %v4310_v5  ;;  %3081 = vmatprep.mubr.bf16.mxu0 %v13394_v34 }
 0x23b   : > { %5241 = vrot.lane.b32.xlu0 %v10773_v42, %s9870_s21  ;;  %4301 = vrot.lane.b32.xlu1 %v7783_v19, %s9870_s21 }
 0x23c   : > { %3347 = vmatprep.mubr.bf16.mxu1 %v13394_v34  ;;  %v5260_v46 = vpop.permute.xlu0 %5259 }
 0x23d   : > { %v2627_v13 = vpop.f32.mrb[52].mxu1  ;;  %7480 = vst.msk [vmem:[%s10512_s13 + $0x1cc] sm:$0xf] %vm3958_vm0, %v5260_v46  ;;  %v4312_v55 = vpop.permute.xlu1 %4311 }
 0x23e   : > { %v10928_v35 = vpack.c.bf16 %v2627_v13, %v2627_v13  ;;  %v10930_v10 = vpop.f32.mrb[53].mxu1  ;;  %7257 = vst.msk [vmem:[%s10512_s13 + $0xd0] sm:$0xf] %vm3958_vm0, %v4312_v55 }
 0x23f   : > { %v2631_v42 = vpop.f32.mrb[54].mxu1  ;;  %6177 = vrot.lane.b32.xlu0 %v10781_v6, %s9870_s21  ;;  %v9654_v6 = vld [vmem:[%s10051_s30 + $0x8] ss:$12 sps:$4 sm:$0xff]  }
 0x240   : > { %7583 = vst.msk [vmem:[%s10512_s13 + $0x228] sm:$0xf] %vm3958_vm0, %v10928_v35  ;;  %v10939_v33 = vpack.c.bf16 %v2631_v42, %v2631_v42  ;;  %v10941_v27 = vpop.f32.mrb[55].mxu1  ;;  %v5262_v29 = vpop.permute.xlu0 %5261 }
 0x241   : > { %v8591_v7 = vpack.i.bf16 %v10941_v27, %v10930_v10  ;;  %7481 = vst.msk [vmem:[%s10512_s13 + $0x1d0] sm:$0xf] %vm3958_vm0, %v5262_v29  ;;  %v4314_v2 = vpop.permute.xlu1 %4313  ;;  %3082 = vmatmul.mubr.bf16.gmra.mrb[112].mxu0 %v10484_v28  ;;  %v11058_v29 = vld [vmem:[%s10051_s30 + $0x170] ss:$12 sps:$4 sm:$0xff]  }
 0x242   : > { %7584 = vst.msk [vmem:[%s10512_s13 + $0x22c] sm:$0xf] %vm3958_vm0, %v10939_v33  ;;  %3348 = vmatmul.mubr.bf16.vlgmr.msra.gmra.mrb[96].mxu1 %v9654_v6  ;;  %7258 = vst.msk [vmem:[%s10512_s13 + $0xd4] sm:$0xf] %vm3958_vm0, %v4314_v2  ;;  %3091 = vmatprep.mubr.bf16.mxu0 %v13394_v34  ;;  %v9659_v2 = vld [vmem:[%s10051_s30 + $0x50] ss:$12 sps:$4 sm:$0xff]  }
 0x243   : > { %5243 = vrot.lane.b32.xlu0 %v10791_v58, %s9870_s21  ;;  %8592 = vrot.lane.b32.xlu1 %v8591_v7, %s9870_s21  ;;  %v9660_v6 = vld [vmem:[%s10051_s30 + $0x4] ss:$12 sps:$4 sm:$0xff]  }
 0x244   : > { %3357 = vmatprep.mubr.bf16.mxu1 %v13394_v34  ;;  %v5264_v25 = vpop.permute.xlu0 %5263 }
 0x245   : > { %v2637_v31 = vpop.f32.mrb[56].mxu1  ;;  %7482 = vst.msk [vmem:[%s10512_s13 + $0x1d4] sm:$0xf] %vm3958_vm0, %v5264_v25  ;;  %v4316_v28 = vpop.permute.xlu1 %4315 }
 0x246   : > { %v10961_v39 = vpack.c.bf16 %v2637_v31, %v2637_v31  ;;  %v10963_v49 = vpop.f32.mrb[57].mxu1  ;;  %7259 = vst.msk [vmem:[%s10512_s13 + $0xd8] sm:$0xf] %vm3958_vm0, %v4316_v28 }
 0x247   : > { %13405 = vst [vmem:[#allocation19_spill] sm:$0xff] %v10963_v49  ;;  %v2641_v58 = vpop.f32.mrb[58].mxu1  ;;  %6179 = vrot.lane.b32.xlu0 %v10807_v12, %s9870_s21  ;;  %v13407_v12 = vld [vmem:[#allocation20_spill] sm:$0xff] }
 0x248   : > { %7585 = vst.msk [vmem:[%s10512_s13 + $0x230] sm:$0xf] %vm3958_vm0, %v10961_v39  ;;  %v10972_v40 = vpack.c.bf16 %v2641_v58, %v2641_v58  ;;  %v10974_v9 = vpop.f32.mrb[59].mxu1  ;;  %v5266_v61 = vpop.permute.xlu0 %5265 }
 0x249   : > { %13406 = vst [vmem:[#allocation11_spill] sm:$0xff] %v10974_v9  ;;  %v8596_v57 = vpack.i.bf16 %v10974_v9, %v10963_v49  ;;  %7483 = vst.msk [vmem:[%s10512_s13 + $0x1d8] sm:$0xf] %vm3958_vm0, %v5266_v61  ;;  %v4318_v20 = vpop.permute.xlu1 %4317  ;;  %3092 = vmatmul.mubr.bf16.gmra.mrb[116].mxu0 %v13407_v12 }
 0x24a   : > { %7586 = vst.msk [vmem:[%s10512_s13 + $0x234] sm:$0xf] %vm3958_vm0, %v10972_v40  ;;  %3358 = vmatmul.mubr.bf16.gmra.mrb[100].mxu1 %v9655_v62  ;;  %7260 = vst.msk [vmem:[%s10512_s13 + $0xdc] sm:$0xf] %vm3958_vm0, %v4318_v20  ;;  %3101 = vmatprep.mubr.bf16.mxu0 %v13394_v34 }
 0x24b   : > { %8577 = vrot.lane.b32.xlu0 %v8576_v17, %s9870_s21  ;;  %3367 = vmatprep.mubr.bf16.mxu1 %v13394_v34 }
 0x24c   : > { %v5268_v45 = vpop.permute.xlu0 %5267 }
 0x24d   : > { %v2647_v59 = vpop.f32.mrb[60].mxu1  ;;  %7484 = vst.msk [vmem:[%s10512_s13 + $0x1dc] sm:$0xf] %vm3958_vm0, %v5268_v45  ;;  %v4320_v51 = vpop.permute.xlu1 %4319 }
 0x24e   : > { %v10995_v18 = vpack.c.bf16 %v2647_v59, %v2647_v59  ;;  %v10997_v19 = vpop.f32.mrb[61].mxu1  ;;  %7261 = vst.msk [vmem:[%s10512_s13 + $0xe0] sm:$0xf] %vm3958_vm0, %v4320_v51 }
 0x24f   : > { %13408 = vst [vmem:[#allocation12_spill] sm:$0xff] %v10997_v19  ;;  %v2651_v17 = vpop.f32.mrb[62].mxu1  ;;  %5245 = vrot.lane.b32.xlu0 %v10811_v36, %s9870_s21  ;;  %v11018_v36 = vld [vmem:[%s10051_s30 + $0x158] ss:$12 sps:$4 sm:$0xff]  }
 0x250   : > { %7587 = vst.msk [vmem:[%s10512_s13 + $0x238] sm:$0xf] %vm3958_vm0, %v10995_v18  ;;  %v11006_v1 = vpack.c.bf16 %v2651_v17, %v2651_v17  ;;  %v11008_v21 = vpop.f32.mrb[63].mxu1  ;;  %v5270_v3 = vpop.permute.xlu0 %5269  ;;  %v11097_v17 = vld [vmem:[%s10051_s30 + $0x68] ss:$12 sps:$4 sm:$0xff]  }
 0x251   : > { %13409 = vst [vmem:[#allocation13_spill] sm:$0xff] %v11008_v21  ;;  %v8601_v22 = vpack.i.bf16 %v11008_v21, %v10997_v19  ;;  %7485 = vst.msk [vmem:[%s10512_s13 + $0x1e0] sm:$0xf] %vm3958_vm0, %v5270_v3  ;;  %v4322_v16 = vpop.permute.xlu1 %4321  ;;  %3102 = vmatmul.mubr.bf16.gmra.mrb[120].mxu0 %v11018_v36 }
 0x252   : > { %7588 = vst.msk [vmem:[%s10512_s13 + $0x23c] sm:$0xf] %vm3958_vm0, %v11006_v1  ;;  %3368 = vmatmul.mubr.bf16.gmra.mrb[104].mxu1 %v9657_v60  ;;  %7262 = vst.msk [vmem:[%s10512_s13 + $0xe4] sm:$0xf] %vm3958_vm0, %v4322_v16  ;;  %3111 = vmatprep.mubr.bf16.mxu0 %v13394_v34 }
 0x253   : > { %6181 = vrot.lane.b32.xlu0 %v10819_v15, %s9870_s21  ;;  %8602 = vrot.lane.b32.xlu1 %v8601_v22, %s9870_s21 }
 0x254   : > { %3377 = vmatprep.mubr.bf16.mxu1 %v13394_v34 }
 0x255   : > { %v2657_v44 = vpop.f32.mrb[64].mxu1  ;;  %v5274_v24 = vpop.permute.xlu0 %5273 }
 0x256   : > { %v5272_v26 = vpop.permute.xlu1 %5271  ;;  %v11029_v52 = vpack.c.bf16 %v2657_v44, %v2657_v44  ;;  %7487 = vst.msk [vmem:[%s10512_s13 + $0x1e8] sm:$0xf] %vm3958_vm0, %v5274_v24  ;;  %v11033_v5 = vpop.f32.mrb[65].mxu1 }
 0x257   : > { %7486 = vst.msk [vmem:[%s10512_s13 + $0x1e4] sm:$0xf] %vm3958_vm0, %v5272_v26  ;;  %v2661_v30 = vpop.f32.mrb[66].mxu1  ;;  %5247 = vrot.lane.b32.xlu0 %v10829_v56, %s9870_s21 }
 0x258   : > { %7589 = vst.msk [vmem:[%s10512_s13 + $0x240] sm:$0xf] %vm3958_vm0, %v11029_v52  ;;  %v11044_v46 = vpack.c.bf16 %v2661_v30, %v2661_v30  ;;  %v11046_v13 = vpop.f32.mrb[67].mxu1 }
 0x259   : > { %v8606_v42 = vpack.i.bf16 %v11046_v13, %v11033_v5  ;;  %v5276_v7 = vpop.permute.xlu0 %5275  ;;  %3112 = vmatmul.mubr.bf16.gmra.mrb[124].mxu0 %v11058_v29 }
 0x25a   : > { %7590 = vst.msk [vmem:[%s10512_s13 + $0x244] sm:$0xf] %vm3958_vm0, %v11044_v46  ;;  %v4324_v56 = vpop.permute.xlu1 %4323  ;;  %7488 = vst.msk [vmem:[%s10512_s13 + $0x1ec] sm:$0xf] %vm3958_vm0, %v5276_v7  ;;  %3378 = vmatmul.mubr.bf16.gmra.mrb[108].mxu1 %v9659_v2  ;;  %3540 = vmatprep.mubr.bf16.mxu0 %v9660_v6 }
 0x25b   : > { %7263 = vst.msk [vmem:[%s10512_s13 + $0xe8] sm:$0xf] %vm3958_vm0, %v4324_v56  ;;  %6183 = vrot.lane.b32.xlu0 %v10848_v41, %s9870_s21  ;;  %3387 = vmatprep.mubr.bf16.mxu1 %v13394_v34 }
 0x25d   : > { %v2667_v25 = vpop.f32.mrb[68].mxu1  ;;  %v4328_v31 = vpop.permute.xlu0 %4327 }
 0x25e   : > { %v4326_v28 = vpop.permute.xlu1 %4325  ;;  %v11068_v58 = vpack.c.bf16 %v2667_v25, %v2667_v25  ;;  %7265 = vst.msk [vmem:[%s10512_s13 + $0xf0] sm:$0xf] %vm3958_vm0, %v4328_v31  ;;  %v11072_v61 = vpop.f32.mrb[69].mxu1 }
 0x25f   : > { %7264 = vst.msk [vmem:[%s10512_s13 + $0xec] sm:$0xf] %vm3958_vm0, %v4326_v28  ;;  %v2671_v20 = vpop.f32.mrb[70].mxu1  ;;  %5249 = vrot.lane.b32.xlu0 %v10858_v63, %s9870_s21 }
 0x260   : > { %7591 = vst.msk [vmem:[%s10512_s13 + $0x248] sm:$0xf] %vm3958_vm0, %v11068_v58  ;;  %v11083_v12 = vpack.c.bf16 %v2671_v20, %v2671_v20  ;;  %v11085_v62 = vpop.f32.mrb[71].mxu1 }
 0x261   : > { %v8611_v59 = vpack.i.bf16 %v11085_v62, %v11072_v61  ;;  %v5278_v51 = vpop.permute.xlu0 %5277 }
 0x262   : > { %7592 = vst.msk [vmem:[%s10512_s13 + $0x24c] sm:$0xf] %vm3958_vm0, %v11083_v12  ;;  %v4330_v63 = vpop.permute.xlu1 %4329  ;;  %7489 = vst.msk [vmem:[%s10512_s13 + $0x1f0] sm:$0xf] %vm3958_vm0, %v5278_v51  ;;  %3388 = vmatmul.mubr.bf16.gmra.mrb[112].mxu1 %v11097_v17 }
 0x263   : > { %7266 = vst.msk [vmem:[%s10512_s13 + $0xf4] sm:$0xf] %vm3958_vm0, %v4330_v63  ;;  %6185 = vrot.lane.b32.xlu0 %v10864_v53, %s9870_s21  ;;  %8612 = vrot.lane.b32.xlu1 %v8611_v59, %s9870_s21 }
 0x264   : > { %3397 = vmatprep.mubr.bf16.mxu1 %v13394_v34 }
 0x265   : > { %v2677_v22 = vpop.f32.mrb[72].mxu1  ;;  %v5280_v3 = vpop.permute.xlu0 %5279 }
 0x266   : > { %v11106_v16 = vpack.c.bf16 %v2677_v22, %v2677_v22  ;;  %7490 = vst.msk [vmem:[%s10512_s13 + $0x1f4] sm:$0xf] %vm3958_vm0, %v5280_v3  ;;  %v11110_v60 = vpop.f32.mrb[73].mxu1  ;;  %v4334_v44 = vpop.permute.xlu1 %4333 }
 0x267   : > { %7268 = vst.msk [vmem:[%s10512_s13 + $0xfc] sm:$0xf] %vm3958_vm0, %v4334_v44  ;;  %v2681_v24 = vpop.f32.mrb[74].mxu1  ;;  %5251 = vrot.lane.b32.xlu0 %v10882_v4, %s9870_s21  ;;  %v9662_v4 = vld [vmem:[%s10051_s30 + $0x80] ss:$12 sps:$4 sm:$0xff]  }
 0x268   : > { %7593 = vst.msk [vmem:[%s10512_s13 + $0x250] sm:$0xf] %vm3958_vm0, %v11106_v16  ;;  %v11121_v26 = vpack.c.bf16 %v2681_v24, %v2681_v24  ;;  %v11123_v30 = vpop.f32.mrb[75].mxu1 }
 0x269   : > { %v8616_v56 = vpack.i.bf16 %v11123_v30, %v11110_v60  ;;  %v4332_v2 = vpop.permute.xlu0 %4331 }
 0x26a   : > { %7594 = vst.msk [vmem:[%s10512_s13 + $0x254] sm:$0xf] %vm3958_vm0, %v11121_v26  ;;  %7267 = vst.msk [vmem:[%s10512_s13 + $0xf8] sm:$0xf] %vm3958_vm0, %v4332_v2  ;;  %3398 = vmatmul.mubr.bf16.gmra.mrb[116].mxu1 %v9662_v4  ;;  %v4272_v6 = vpop.permute.xlu1 %4271 }
 0x26b   : > { %7237 = vst.msk [vmem:[%s10512_s13 + $0x80] sm:$0xf] %vm3958_vm0, %v4272_v6  ;;  %6187 = vrot.lane.b32.xlu0 %v10896_v8, %s9870_s21  ;;  %3407 = vmatprep.mubr.bf16.mxu1 %v13394_v34 }
 0x26d   : > { %v2687_v25 = vpop.f32.mrb[76].mxu1  ;;  %v5282_v31 = vpop.permute.xlu0 %5281 }
 0x26e   : > { %v11140_v28 = vpack.c.bf16 %v2687_v25, %v2687_v25  ;;  %7491 = vst.msk [vmem:[%s10512_s13 + $0x1f8] sm:$0xf] %vm3958_vm0, %v5282_v31  ;;  %v11144_v20 = vpop.f32.mrb[77].mxu1  ;;  %v4274_v59 = vpop.permute.xlu1 %4273 }
 0x26f   : > { %7238 = vst.msk [vmem:[%s10512_s13 + $0x84] sm:$0xf] %vm3958_vm0, %v4274_v59  ;;  %v2691_v8 = vpop.f32.mrb[78].mxu1  ;;  %8587 = vrot.lane.b32.xlu0 %v8586_v23, %s9870_s21  ;;  %v9663_v23 = vld [vmem:[%s10051_s30 + $0x98] ss:$12 sps:$4 sm:$0xff]  }
 0x270   : > { %7595 = vst.msk [vmem:[%s10512_s13 + $0x258] sm:$0xf] %vm3958_vm0, %v11140_v28  ;;  %v11157_v63 = vpack.c.bf16 %v2691_v8, %v2691_v8  ;;  %v11159_v22 = vpop.f32.mrb[79].mxu1 }
 0x271   : > { %v8621_v44 = vpack.i.bf16 %v11159_v22, %v11144_v20  ;;  %v5284_v24 = vpop.permute.xlu0 %5283 }
 0x272   : > { %7596 = vst.msk [vmem:[%s10512_s13 + $0x25c] sm:$0xf] %vm3958_vm0, %v11157_v63  ;;  %7492 = vst.msk [vmem:[%s10512_s13 + $0x1fc] sm:$0xf] %vm3958_vm0, %v5284_v24  ;;  %3408 = vmatmul.mubr.bf16.gmra.mrb[120].mxu1 %v9663_v23  ;;  %v4276_v2 = vpop.permute.xlu1 %4275 }
 0x273   : > { %7239 = vst.msk [vmem:[%s10512_s13 + $0x88] sm:$0xf] %vm3958_vm0, %v4276_v2  ;;  %8622 = vrot.lane.b32.xlu1 %v8621_v44, %s9870_s21  ;;  %6189 = vrot.lane.b32.xlu0 %v10906_v48, %s9870_s21 }
 0x274   : > { %3417 = vmatprep.mubr.bf16.mxu1 %v13394_v34 }
 0x275   : > { %v2697_v4 = vpop.f32.mrb[80].mxu1  ;;  %v5222_v6 = vpop.permute.xlu0 %5221 }
 0x276   : > { %v11177_v25 = vpack.c.bf16 %v2697_v4, %v2697_v4  ;;  %7461 = vst.msk [vmem:[%s10512_s13 + $0x180] sm:$0xf] %vm3958_vm0, %v5222_v6  ;;  %v11181_v31 = vpop.f32.mrb[81].mxu1  ;;  %v4278_v59 = vpop.permute.xlu1 %4277 }
 0x277   : > { %7240 = vst.msk [vmem:[%s10512_s13 + $0x8c] sm:$0xf] %vm3958_vm0, %v4278_v59  ;;  %v2701_v48 = vpop.f32.mrb[82].mxu1  ;;  %6191 = vrot.lane.b32.xlu0 %v10928_v35, %s9870_s21  ;;  %v9664_v35 = vld [vmem:[%s10051_s30 + $0xb0] ss:$12 sps:$4 sm:$0xff]  }
 0x278   : > { %7597 = vst.msk [vmem:[%s10512_s13 + $0x260] sm:$0xf] %vm3958_vm0, %v11177_v25  ;;  %v7953_v44 = vpack.c.bf16 %v2701_v48, %v2701_v48  ;;  %v11192_v24 = vpop.f32.mrb[83].mxu1 }
 0x279   : > { %v8626_v2 = vpack.i.bf16 %v11192_v24, %v11181_v31  ;;  %v5224_v4 = vpop.permute.xlu0 %5223 }
 0x27a   : > { %7598 = vst.msk [vmem:[%s10512_s13 + $0x264] sm:$0xf] %vm3958_vm0, %v7953_v44  ;;  %7462 = vst.msk [vmem:[%s10512_s13 + $0x184] sm:$0xf] %vm3958_vm0, %v5224_v4  ;;  %3418 = vmatmul.mubr.bf16.gmra.mrb[124].mxu1 %v9664_v35  ;;  %v4280_v6 = vpop.permute.xlu1 %4279  ;;  %6221 = vrot.lane.b32.xlu1 %v7953_v44, %s9870_s21 }
 0x27b   : > { %7241 = vst.msk [vmem:[%s10512_s13 + $0x90] sm:$0xf] %vm3958_vm0, %v4280_v6  ;;  %6193 = vrot.lane.b32.xlu0 %v10939_v33, %s9870_s21  ;;  %3427 = vmatprep.mubr.bf16.mxu1 %v13394_v34 }
 0x27d   : > { %v2707_v59 = vpop.f32.mrb[84].mxu1  ;;  %v5226_v48 = vpop.permute.xlu0 %5225 }
 0x27e   : > { %v11209_v23 = vpack.c.bf16 %v2707_v59, %v2707_v59  ;;  %7463 = vst.msk [vmem:[%s10512_s13 + $0x188] sm:$0xf] %vm3958_vm0, %v5226_v48  ;;  %v11213_v4 = vpop.f32.mrb[85].mxu1  ;;  %v4282_v35 = vpop.permute.xlu1 %4281 }
 0x27f   : > { %7242 = vst.msk [vmem:[%s10512_s13 + $0x94] sm:$0xf] %vm3958_vm0, %v4282_v35  ;;  %v2711_v33 = vpop.f32.mrb[86].mxu1  ;;  %6195 = vrot.lane.b32.xlu0 %v10961_v39, %s9870_s21  ;;  %v9665_v39 = vld [vmem:[%s10051_s30 + $0xc8] ss:$12 sps:$4 sm:$0xff]  }
 0x280   : > { %7599 = vst.msk [vmem:[%s10512_s13 + $0x268] sm:$0xf] %vm3958_vm0, %v11209_v23  ;;  %v11224_v6 = vpack.c.bf16 %v2711_v33, %v2711_v33  ;;  %v11226_v59 = vpop.f32.mrb[87].mxu1 }
 0x281   : > { %v8631_v44 = vpack.i.bf16 %v11226_v59, %v11213_v4  ;;  %v5228_v8 = vpop.permute.xlu0 %5227 }
 0x282   : > { %7600 = vst.msk [vmem:[%s10512_s13 + $0x26c] sm:$0xf] %vm3958_vm0, %v11224_v6  ;;  %7464 = vst.msk [vmem:[%s10512_s13 + $0x18c] sm:$0xf] %vm3958_vm0, %v5228_v8  ;;  %3428 = vmatmul.mubr.bf16.gmra.mrb[128].mxu1 %v9665_v39  ;;  %v4284_v35 = vpop.permute.xlu1 %4283 }
 0x283   : > { %7243 = vst.msk [vmem:[%s10512_s13 + $0x98] sm:$0xf] %vm3958_vm0, %v4284_v35  ;;  %8632 = vrot.lane.b32.xlu1 %v8631_v44, %s9870_s21  ;;  %8597 = vrot.lane.b32.xlu0 %v8596_v57, %s9870_s21 }
 0x284   : > { %3437 = vmatprep.mubr.bf16.mxu1 %v13394_v34 }
 0x285   : > { %v2717_v33 = vpop.f32.mrb[88].mxu1  ;;  %v5230_v48 = vpop.permute.xlu0 %5229 }
 0x286   : > { %v11246_v8 = vpack.c.bf16 %v2717_v33, %v2717_v33  ;;  %7465 = vst.msk [vmem:[%s10512_s13 + $0x190] sm:$0xf] %vm3958_vm0, %v5230_v48  ;;  %v11250_v39 = vpop.f32.mrb[89].mxu1  ;;  %v4286_v35 = vpop.permute.xlu1 %4285 }
 0x287   : > { %13410 = vst [vmem:[#allocation14_spill] sm:$0xff] %v11250_v39  ;;  %7244 = vst.msk [vmem:[%s10512_s13 + $0x9c] sm:$0xf] %vm3958_vm0, %v4286_v35  ;;  %v2721_v57 = vpop.f32.mrb[90].mxu1  ;;  %6197 = vrot.lane.b32.xlu0 %v10972_v40, %s9870_s21  ;;  %v9666_v40 = vld [vmem:[%s10051_s30 + $0xe0] ss:$12 sps:$4 sm:$0xff]  }
 0x288   : > { %7601 = vst.msk [vmem:[%s10512_s13 + $0x270] sm:$0xf] %vm3958_vm0, %v11246_v8  ;;  %v11261_v33 = vpack.c.bf16 %v2721_v57, %v2721_v57  ;;  %v11263_v48 = vpop.f32.mrb[91].mxu1 }
 0x289   : > { %13411 = vst [vmem:[#allocation15_spill] sm:$0xff] %v11263_v48  ;;  %v8636_v44 = vpack.i.bf16 %v11263_v48, %v11250_v39  ;;  %v5232_v51 = vpop.permute.xlu0 %5231 }
 0x28a   : > { %7602 = vst.msk [vmem:[%s10512_s13 + $0x274] sm:$0xf] %vm3958_vm0, %v11261_v33  ;;  %7466 = vst.msk [vmem:[%s10512_s13 + $0x194] sm:$0xf] %vm3958_vm0, %v5232_v51  ;;  %3438 = vmatmul.mubr.bf16.gmra.mrb[132].mxu1 %v9666_v40  ;;  %v4288_v35 = vpop.permute.xlu1 %4287 }
 0x28b   : > { %7245 = vst.msk [vmem:[%s10512_s13 + $0xa0] sm:$0xf] %vm3958_vm0, %v4288_v35  ;;  %6199 = vrot.lane.b32.xlu0 %v10995_v18, %s9870_s21  ;;  %3447 = vmatprep.mubr.bf16.mxu1 %v13394_v34 }
 0x28d   : > { %v2727_v57 = vpop.f32.mrb[92].mxu1  ;;  %v5234_v3 = vpop.permute.xlu0 %5233 }
 0x28e   : > { %v11280_v7 = vpack.c.bf16 %v2727_v57, %v2727_v57  ;;  %7467 = vst.msk [vmem:[%s10512_s13 + $0x198] sm:$0xf] %vm3958_vm0, %v5234_v3  ;;  %v11284_v51 = vpop.f32.mrb[93].mxu1  ;;  %v4290_v40 = vpop.permute.xlu1 %4289 }
 0x28f   : > { %13412 = vst [vmem:[#allocation16_spill] sm:$0xff] %v11284_v51  ;;  %7246 = vst.msk [vmem:[%s10512_s13 + $0xa4] sm:$0xf] %vm3958_vm0, %v4290_v40  ;;  %v2731_v18 = vpop.f32.mrb[94].mxu1  ;;  %6201 = vrot.lane.b32.xlu0 %v11006_v1, %s9870_s21  ;;  %v9667_v1 = vld [vmem:[%s10051_s30 + $0xf8] ss:$12 sps:$4 sm:$0xff]  }
 0x290   : > { %7603 = vst.msk [vmem:[%s10512_s13 + $0x278] sm:$0xf] %vm3958_vm0, %v11280_v7  ;;  %v11295_v57 = vpack.c.bf16 %v2731_v18, %v2731_v18  ;;  %v11297_v3 = vpop.f32.mrb[95].mxu1 }
 0x291   : > { %13413 = vst [vmem:[#allocation17_spill] sm:$0xff] %v11297_v3  ;;  %v8641_v35 = vpack.i.bf16 %v11297_v3, %v11284_v51  ;;  %v5236_v40 = vpop.permute.xlu0 %5235 }
 0x292   : > { %7604 = vst.msk [vmem:[%s10512_s13 + $0x27c] sm:$0xf] %vm3958_vm0, %v11295_v57  ;;  %7468 = vst.msk [vmem:[%s10512_s13 + $0x19c] sm:$0xf] %vm3958_vm0, %v5236_v40  ;;  %3448 = vmatmul.mubr.bf16.gmra.mrb[136].mxu1 %v9667_v1  ;;  %v4292_v18 = vpop.permute.xlu1 %4291 }
 0x293   : > { %7247 = vst.msk [vmem:[%s10512_s13 + $0xa8] sm:$0xf] %vm3958_vm0, %v4292_v18  ;;  %8642 = vrot.lane.b32.xlu1 %v8641_v35, %s9870_s21  ;;  %6203 = vrot.lane.b32.xlu0 %v11029_v52, %s9870_s21  ;;  %v9668_v35 = vld [vmem:[%s10051_s30 + $0x110] ss:$12 sps:$4 sm:$0xff]  }
 0x294   : > { %3457 = vmatprep.mubr.bf16.mxu1 %v13394_v34 }
 0x295   : > { %v6172_v53 = vpop.permute.xlu0 %6171 }
 0x296   : > { %7685 = vst.msk [vmem:[%s10512_s13 + $0x280] sm:$0xf] %vm3958_vm0, %v6172_v53  ;;  %v11317_v40 = vpop.permute.xlu1 %8572 }
 0x297   : > { %8607 = vrot.lane.b32.xlu0 %v8606_v42, %s9870_s21  ;;  %v8575_v55 = vunpack.i.h.bf16 %v11317_v40  ;;  %v8574_v15 = vunpack.i.l.bf16 %v11317_v40 }
 0x299   : > { %v11323_v1 = vpop.permute.xlu0 %8567 }
 0x29a   : > { %13414 = vst [vmem:[#allocation18_spill] sm:$0xff] %v11323_v1  ;;  %3458 = vmatmul.mubr.bf16.gmra.mrb[140].mxu1 %v9668_v35  ;;  %v4294_v52 = vpop.permute.xlu1 %4293  ;;  %v9669_v35 = vld [vmem:[%s10051_s30 + $0x128] ss:$12 sps:$4 sm:$0xff]  }
 0x29b   : > { %7248 = vst.msk [vmem:[%s10512_s13 + $0xac] sm:$0xf] %vm3958_vm0, %v4294_v52  ;;  %6205 = vrot.lane.b32.xlu0 %v11044_v46, %s9870_s21  ;;  %3467 = vmatprep.mubr.bf16.mxu1 %v13394_v34 }
 0x29d   : > { %v5238_v53 = vpop.permute.xlu0 %5237 }
 0x29e   : > { %7469 = vst.msk [vmem:[%s10512_s13 + $0x1a0] sm:$0xf] %vm3958_vm0, %v5238_v53  ;;  %v4296_v18 = vpop.permute.xlu1 %4295 }
 0x29f   : > { %7249 = vst.msk [vmem:[%s10512_s13 + $0xb0] sm:$0xf] %vm3958_vm0, %v4296_v18  ;;  %6207 = vrot.lane.b32.xlu0 %v11068_v58, %s9870_s21  ;;  %v9670_v18 = vld [vmem:[%s10051_s30 + $0x140] ss:$12 sps:$4 sm:$0xff]  }
 0x2a1   : > { %v6174_v42 = vpop.permute.xlu0 %6173 }
 0x2a2   : > { %7686 = vst.msk [vmem:[%s10512_s13 + $0x284] sm:$0xf] %vm3958_vm0, %v6174_v42  ;;  %3468 = vmatmul.mubr.bf16.gmra.mrb[144].mxu1 %v9669_v35  ;;  %v4298_v46 = vpop.permute.xlu1 %4297 }
 0x2a3   : > { %7250 = vst.msk [vmem:[%s10512_s13 + $0xb4] sm:$0xf] %vm3958_vm0, %v4298_v46  ;;  %6209 = vrot.lane.b32.xlu0 %v11083_v12, %s9870_s21  ;;  %3477 = vmatprep.mubr.bf16.mxu1 %v13394_v34 }
 0x2a5   : > { %v5240_v52 = vpop.permute.xlu0 %5239 }
 0x2a6   : > { %7470 = vst.msk [vmem:[%s10512_s13 + $0x1a4] sm:$0xf] %vm3958_vm0, %v5240_v52  ;;  %v4300_v58 = vpop.permute.xlu1 %4299 }
 0x2a7   : > { %7251 = vst.msk [vmem:[%s10512_s13 + $0xb8] sm:$0xf] %vm3958_vm0, %v4300_v58  ;;  %6211 = vrot.lane.b32.xlu0 %v11106_v16, %s9870_s21 }
 0x2a9   : > { %v6176_v53 = vpop.permute.xlu0 %6175 }
 0x2aa   : > { %7687 = vst.msk [vmem:[%s10512_s13 + $0x288] sm:$0xf] %vm3958_vm0, %v6176_v53  ;;  %3478 = vmatmul.mubr.bf16.gmra.mrb[148].mxu1 %v9670_v18  ;;  %v11354_v12 = vpop.permute.xlu1 %8582 }
 0x2ab   : > { %8617 = vrot.lane.b32.xlu0 %v8616_v56, %s9870_s21  ;;  %3487 = vmatprep.mubr.bf16.mxu1 %v13394_v34  ;;  %v8585_v21 = vunpack.i.h.bf16 %v11354_v12  ;;  %v8584_v3 = vunpack.i.l.bf16 %v11354_v12  ;;  %v9593_v12 = vld [vmem:[#allocation5 + $0x68] ss:$36 sps:$4 sm:$0xff]  }
 0x2ad   : > { %v5242_v42 = vpop.permute.xlu0 %5241 }
 0x2ae   : > { %7471 = vst.msk [vmem:[%s10512_s13 + $0x1a8] sm:$0xf] %vm3958_vm0, %v5242_v42  ;;  %v4302_v35 = vpop.permute.xlu1 %4301 }
 0x2af   : > { %7252 = vst.msk [vmem:[%s10512_s13 + $0xbc] sm:$0xf] %vm3958_vm0, %v4302_v35  ;;  %6213 = vrot.lane.b32.xlu0 %v11121_v26, %s9870_s21 }
 0x2b1   : > { %v6178_v16 = vpop.permute.xlu0 %6177 }
 0x2b2   : > { %7688 = vst.msk [vmem:[%s10512_s13 + $0x28c] sm:$0xf] %vm3958_vm0, %v6178_v16  ;;  %3488 = vmatmul.mubr.bf16.gmra.mrb[152].mxu1 %v11018_v36 }
 0x2b3   : > { %6215 = vrot.lane.b32.xlu0 %v11140_v28, %s9870_s21  ;;  %3497 = vmatprep.mubr.bf16.mxu1 %v13394_v34 }
 0x2b4   : > { %v11375_v46 = vpop.f32.mrb[64].mxu0 }
 0x2b5   : > { %v5244_v56 = vpop.permute.xlu0 %5243  ;;  %13415 = vst [vmem:[#allocation20_spill] sm:$0xff] %v11375_v46  ;;  %v11377_v52 = vpop.f32.mrb[65].mxu0  ;;  %v9603_v46 = vld [vmem:[#allocation5 + $0x1d0] ss:$36 sps:$4 sm:$0xff]  }
 0x2b6   : > { %7472 = vst.msk [vmem:[%s10512_s13 + $0x1ac] sm:$0xf] %vm3958_vm0, %v5244_v56  ;;  %13416 = vst [vmem:[#allocation21_spill] sm:$0xff] %v11377_v52  ;;  %v11381_v26 = vpop.f32.mrb[66].mxu0 }
 0x2b7   : > { %6217 = vrot.lane.b32.xlu0 %v11157_v63, %s9870_s21  ;;  %v11385_v58 = vpop.f32.mrb[67].mxu0 }
 0x2b9   : > { %v6180_v28 = vpop.permute.xlu0 %6179 }
 0x2ba   : > { %7689 = vst.msk [vmem:[%s10512_s13 + $0x290] sm:$0xf] %vm3958_vm0, %v6180_v28  ;;  %3498 = vmatmul.mubr.bf16.gmra.mrb[156].mxu1 %v11058_v29 }
 0x2bb   : > { %6219 = vrot.lane.b32.xlu0 %v11177_v25, %s9870_s21  ;;  %8168 = vmatprep.mubr.bf16.mxu1 %v11097_v17 }
 0x2bc   : > { %v11397_v53 = vpop.f32.mrb[68].mxu0 }
 0x2bd   : > { %v11395_v63 = vpop.permute.xlu0 %8577  ;;  %v11399_v18 = vpop.f32.mrb[69].mxu0 }
 0x2be   : > { %13417 = vst [vmem:[#allocation22_spill] sm:$0xff] %v11395_v63  ;;  %13418 = vst [vmem:[#allocation23_spill] sm:$0xff] %v11399_v18  ;;  %v11405_v42 = vpop.f32.mrb[70].mxu0 }
 0x2bf   : > { %8627 = vrot.lane.b32.xlu0 %v8626_v2, %s9870_s21  ;;  %v8728_v29 = vpack.i.bf16 %v11405_v42, %v11397_v53  ;;  %v11409_v35 = vpop.f32.mrb[71].mxu0 }
 0x2c0   : > { %13419 = vst [vmem:[#allocation24_spill] sm:$0xff] %v11409_v35  ;;  %v8733_v17 = vpack.i.bf16 %v11409_v35, %v11399_v18  ;;  %v13461_v35 = vld [vmem:[#allocation19_spill] sm:$0xff] }
 0x2c1   : > { %v5246_v25 = vpop.permute.xlu0 %5245  ;;  %8729 = vrot.lane.b32.xlu1 %v8728_v29, %s9870_s21 }
 0x2c2   : > { %7473 = vst.msk [vmem:[%s10512_s13 + $0x1b0] sm:$0xf] %vm3958_vm0, %v5246_v25 }
 0x2c3   : > { %6223 = vrot.lane.b32.xlu0 %v11209_v23, %s9870_s21 }
 0x2c4   : > { %v11420_v16 = vpop.f32.mrb[72].mxu0 }
 0x2c5   : > { %v6182_v2 = vpop.permute.xlu0 %6181  ;;  %8734 = vrot.lane.b32.xlu1 %v8733_v17, %s9870_s21  ;;  %v11423_v56 = vpop.f32.mrb[73].mxu0 }
 0x2c6   : > { %7690 = vst.msk [vmem:[%s10512_s13 + $0x294] sm:$0xf] %vm3958_vm0, %v6182_v2  ;;  %v11427_v28 = vpop.f32.mrb[74].mxu0  ;;  %v11439_v17 = vpop.permute.xlu1 %8592 }
 0x2c7   : > { %6225 = vrot.lane.b32.xlu0 %v11224_v6, %s9870_s21  ;;  %v11431_v25 = vpop.f32.mrb[75].mxu0  ;;  %13420 = vst [vmem:[#allocation25_spill] sm:$0xff] %v11439_v17 }
 0x2c9   : > { %v5248_v23 = vpop.permute.xlu0 %5247 }
 0x2ca   : > { %7474 = vst.msk [vmem:[%s10512_s13 + $0x1b4] sm:$0xf] %vm3958_vm0, %v5248_v23  ;;  %v11457_v36 = vpop.permute.xlu1 %8602 }
 0x2cb   : > { %6227 = vrot.lane.b32.xlu0 %v11246_v8, %s9870_s21  ;;  %13423 = vst [vmem:[#allocation28_spill] sm:$0xff] %v11457_v36 }
 0x2cc   : > { %v11441_v34 = vpop.f32.mrb[76].mxu0 }
 0x2cd   : > { %v6184_v6 = vpop.permute.xlu0 %6183  ;;  %v11445_v29 = vpop.f32.mrb[77].mxu0 }
 0x2ce   : > { %7691 = vst.msk [vmem:[%s10512_s13 + $0x298] sm:$0xf] %vm3958_vm0, %v6184_v6  ;;  %13421 = vst [vmem:[#allocation26_spill] sm:$0xff] %v11445_v29  ;;  %v11451_v2 = vpop.f32.mrb[78].mxu0 }
 0x2cf   : > { %8637 = vrot.lane.b32.xlu0 %v8636_v44, %s9870_s21  ;;  %v8748_v8 = vpack.i.bf16 %v11451_v2, %v11441_v34  ;;  %v11455_v23 = vpop.f32.mrb[79].mxu0 }
 0x2d0   : > { %13422 = vst [vmem:[#allocation27_spill] sm:$0xff] %v11455_v23  ;;  %v8753_v6 = vpack.i.bf16 %v11455_v23, %v11445_v29  ;;  %v9680_v29 = vld [vmem:[%s10051_s30 + $0x7c] ss:$12 sps:$4 sm:$0xff]  }
 0x2d1   : > { %v5250_v45 = vpop.permute.xlu0 %5249  ;;  %8749 = vrot.lane.b32.xlu1 %v8748_v8, %s9870_s21 }
 0x2d2   : > { %7475 = vst.msk [vmem:[%s10512_s13 + $0x1b8] sm:$0xf] %vm3958_vm0, %v5250_v45 }
 0x2d3   : > { %6229 = vrot.lane.b32.xlu0 %v11261_v33, %s9870_s21 }
 0x2d4   : > { %v11470_v63 = vpop.f32.mrb[80].mxu0 }
 0x2d5   : > { %v6186_v44 = vpop.permute.xlu0 %6185  ;;  %v8613_v41 = vpop.permute.xlu1 %8612  ;;  %8754 = vrot.lane.b32.xlu1 %v8753_v6, %s9870_s21 }
 0x2d6   : > { %7692 = vst.msk [vmem:[%s10512_s13 + $0x29c] sm:$0xf] %vm3958_vm0, %v6186_v44  ;;  %v8615_v36 = vunpack.i.h.bf16 %v8613_v41  ;;  %v8614_v17 = vunpack.i.l.bf16 %v8613_v41  ;;  %v11473_v45 = vpop.f32.mrb[81].mxu0 }
 0x2d7   : > { %6231 = vrot.lane.b32.xlu0 %v11280_v7, %s9870_s21  ;;  %v11481_v1 = vpop.f32.mrb[82].mxu0 }
 0x2d8   : > { %v11477_v33 = vpack.i.bf16 %v8615_v36, %v8575_v55  ;;  %v11479_v8 = vpack.i.bf16 %v8614_v17, %v8574_v15  ;;  %v11485_v41 = vpop.f32.mrb[83].mxu0 }
 0x2d9   : > { %v5252_v44 = vpop.permute.xlu0 %5251 }
 0x2da   : > { %13424 = vst [vmem:[#allocation29_spill] sm:$0xff] %v11477_v33  ;;  %13425 = vst [vmem:[#allocation30_spill] sm:$0xff] %v11479_v8  ;;  %v9591_v33 = vld [vmem:[#allocation5 + $0x20] ss:$36 sps:$4 sm:$0xff]  }
 0x2db   : > { %7476 = vst.msk [vmem:[%s10512_s13 + $0x1bc] sm:$0xf] %vm3958_vm0, %v5252_v44  ;;  %6233 = vrot.lane.b32.xlu0 %v11295_v57, %s9870_s21  ;;  %v9590_v57 = vld [vmem:[#allocation5 + $0x260] ss:$36 sps:$4 sm:$0xff]  }
 0x2dc   : > { %v11493_v7 = vpop.f32.mrb[84].mxu0  ;;  %8008 = vmatprep.subr.bf16.mxu0 %v9590_v57 }
 0x2dd   : > { %v6188_v55 = vpop.permute.xlu0 %6187  ;;  %v11497_v15 = vpop.f32.mrb[85].mxu0  ;;  %8009 = vmatpush3.bf16.msra.mxu0 %v9591_v33  ;;  %v9596_v33 = vld [vmem:[#allocation5 + $0x338] ss:$36 sps:$4 sm:$0xff]  }
 0x2de   : > { %7693 = vst.msk [vmem:[%s10512_s13 + $0x2a0] sm:$0xf] %vm3958_vm0, %v6188_v55  ;;  %13426 = vst [vmem:[#allocation31_spill] sm:$0xff] %v11497_v15  ;;  %v11499_v36 = vpop.f32.mrb[86].mxu0 }
 0x2df   : > { %v8768_v17 = vpack.i.bf16 %v11499_v36, %v11493_v7  ;;  %v11503_v40 = vpop.f32.mrb[87].mxu0 }
 0x2e0   : > { %13427 = vst [vmem:[#allocation32_spill] sm:$0xff] %v11503_v40  ;;  %v8773_v44 = vpack.i.bf16 %v11503_v40, %v11497_v15 }
 0x2e1   : > { %v11507_v6 = vpop.permute.xlu0 %8587  ;;  %8769 = vrot.lane.b32.xlu1 %v8768_v17, %s9870_s21 }
 0x2e2   : > { %13428 = vst [vmem:[#allocation33_spill] sm:$0xff] %v11507_v6  ;;  %v9592_v6 = vld [vmem:[#allocation5 + $0x2a8] ss:$36 sps:$4 sm:$0xff]  }
 0x2e3   : > { %8010 = vmatprep.subr.bf16.mxu0 %v9592_v6 }
 0x2e4   : > { %v11514_v9 = vpop.f32.mrb[88].mxu0  ;;  %8011 = vmatpush3.bf16.msra.mxu0 %v9593_v12 }
 0x2e5   : > { %v8623_v55 = vpop.permute.xlu1 %8622  ;;  %v6190_v8 = vpop.permute.xlu0 %6189  ;;  %8774 = vrot.lane.b32.xlu1 %v8773_v44, %s9870_s21 }
 0x2e6   : > { %v8625_v19 = vunpack.i.h.bf16 %v8623_v55  ;;  %v8624_v51 = vunpack.i.l.bf16 %v8623_v55  ;;  %7694 = vst.msk [vmem:[%s10512_s13 + $0x2a4] sm:$0xf] %vm3958_vm0, %v6190_v8  ;;  %v11517_v17 = vpop.f32.mrb[89].mxu0 }
 0x2e7   : > { %v11523_v49 = vpop.f32.mrb[90].mxu0 }
 0x2e8   : > { %v11519_v48 = vpack.i.bf16 %v8625_v19, %v8585_v21  ;;  %v11521_v57 = vpack.i.bf16 %v8624_v51, %v8584_v3  ;;  %v11527_v55 = vpop.f32.mrb[91].mxu0  ;;  %v9594_v19 = vld [vmem:[#allocation5 + $0x2f0] ss:$36 sps:$4 sm:$0xff]  }
 0x2e9   : > { %13431 = vst [vmem:[#allocation36_spill] sm:$0xff] %v11527_v55  ;;  %v6192_v39 = vpop.permute.xlu0 %6191  ;;  %v9595_v51 = vld [vmem:[#allocation5 + $0xb0] ss:$36 sps:$4 sm:$0xff]   ;;  %8012 = vmatprep.subr.bf16.mxu0 %v9594_v19  ;;  %v9598_v19 = vld [vmem:[#allocation5 + $0x380] ss:$36 sps:$4 sm:$0xff]  }
 0x2ea   : > { %13429 = vst [vmem:[#allocation34_spill] sm:$0xff] %v11519_v48  ;;  %13430 = vst [vmem:[#allocation35_spill] sm:$0xff] %v11521_v57  ;;  %8013 = vmatpush3.bf16.msra.mxu0 %v9595_v51  ;;  %v9597_v48 = vld [vmem:[#allocation5 + $0xf8] ss:$36 sps:$4 sm:$0xff]   ;;  %v9599_v51 = vld [vmem:[#allocation5 + $0x140] ss:$36 sps:$4 sm:$0xff]  }
 0x2eb   : > { %7695 = vst.msk [vmem:[%s10512_s13 + $0x2a8] sm:$0xf] %vm3958_vm0, %v6192_v39  ;;  %8014 = vmatprep.subr.bf16.mxu0 %v9596_v33 }
 0x2ec   : > { %v6222_v21 = vpop.permute.xlu1 %6221  ;;  %v11535_v44 = vpop.f32.mrb[92].mxu0 }
 0x2ed   : > { %7710 = vst.msk [vmem:[%s10512_s13 + $0x2e4] sm:$0xf] %vm3958_vm0, %v6222_v21  ;;  %v6194_v3 = vpop.permute.xlu0 %6193  ;;  %13432 = vst [vmem:[#allocation37_spill] sm:$0xff] %v11535_v44  ;;  %v11539_v8 = vpop.f32.mrb[93].mxu0 }
 0x2ee   : > { %7696 = vst.msk [vmem:[%s10512_s13 + $0x2ac] sm:$0xf] %vm3958_vm0, %v6194_v3  ;;  %13433 = vst [vmem:[#allocation38_spill] sm:$0xff] %v11539_v8  ;;  %v11541_v6 = vpop.f32.mrb[94].mxu0  ;;  %8015 = vmatpush3.bf16.msra.mxu0 %v9597_v48 }
 0x2ef   : > { %13434 = vst [vmem:[#allocation39_spill] sm:$0xff] %v11541_v6  ;;  %v8788_v39 = vpack.i.bf16 %v11541_v6, %v11535_v44  ;;  %v11545_v12 = vpop.f32.mrb[95].mxu0  ;;  %8016 = vmatprep.subr.bf16.mxu0 %v9598_v19  ;;  %v9601_v6 = vld [vmem:[#allocation5 + $0x188] ss:$36 sps:$4 sm:$0xff]   ;;  %v9602_v19 = vld [vmem:[#allocation5 + $0x410] ss:$36 sps:$4 sm:$0xff]  }
 0x2f0   : > { %13435 = vst [vmem:[#allocation40_spill] sm:$0xff] %v11545_v12  ;;  %v8793_v21 = vpack.i.bf16 %v11545_v12, %v11539_v8  ;;  %v13438_v12 = vpack.i.bf16 %v11033_v5, %v10734_v54  ;;  %v13463_v18 = vld [vmem:[#allocation36_spill] sm:$0xff]  ;;  %v9683_v44 = vld [vmem:[%s10051_s30 + $0x90] ss:$12 sps:$4 sm:$0xff]  }
 0x2f1   : > { %v6196_v57 = vpop.permute.xlu0 %6195  ;;  %8789 = vrot.lane.b32.xlu1 %v8788_v39, %s9870_s21  ;;  %v13471_v8 = vld [vmem:[#allocation12_spill] sm:$0xff] }
 0x2f2   : > { %7697 = vst.msk [vmem:[%s10512_s13 + $0x2b0] sm:$0xf] %vm3958_vm0, %v6196_v57  ;;  %8017 = vmatpush3.bf16.msra.mxu0 %v9599_v51  ;;  %v9600_v57 = vld [vmem:[#allocation5 + $0x3c8] ss:$36 sps:$4 sm:$0xff]  }
 0x2f3   : > { %8018 = vmatprep.subr.bf16.mxu0 %v9600_v57 }
 0x2f4   : > { %v11554_v55 = vpop.f32.mrb[96].mxu0 }
 0x2f5   : > { %v11552_v3 = vpop.permute.xlu0 %8597  ;;  %13437 = vst [vmem:[#allocation42_spill] sm:$0xff] %v11554_v55  ;;  %8794 = vrot.lane.b32.xlu1 %v8793_v21, %s9870_s21  ;;  %v11559_v33 = vpop.f32.mrb[97].mxu0  ;;  %v13439_v21 = vpack.i.bf16 %v11046_v13, %v10745_v14  ;;  %v9604_v14 = vld [vmem:[#allocation5 + $0x458] ss:$36 sps:$4 sm:$0xff]   ;;  %v13443_v13 = vpack.i.bf16 %v11085_v62, %v10783_v50 }
 0x2f6   : > { %13436 = vst [vmem:[#allocation41_spill] sm:$0xff] %v11552_v3  ;;  %v11563_v39 = vpop.f32.mrb[98].mxu0  ;;  %8019 = vmatpush3.bf16.msra.mxu0 %v9601_v6  ;;  %v13442_v6 = vpack.i.bf16 %v11072_v61, %v10771_v0  ;;  %v9672_v0 = vld [vmem:[%s10051_s30 + $0x1c] ss:$12 sps:$4 sm:$0xff]  }
 0x2f7   : > { %v11569_v51 = vpop.f32.mrb[99].mxu0  ;;  %8020 = vmatprep.subr.bf16.mxu0 %v9602_v19  ;;  %v9605_v19 = vld [vmem:[#allocation5 + $0x218] ss:$36 sps:$4 sm:$0xff]  }
 0x2f9   : > { %8647 = vxpose.xlu0.b32.start [1/16] (narrow) %v13438_v12, 64  ;;  %v6198_v3 = vpop.permute.xlu0 %6197 }
 0x2fa   : > { %7698 = vst.msk [vmem:[%s10512_s13 + $0x2b4] sm:$0xf] %vm3958_vm0, %v6198_v3  ;;  %8021 = vmatpush3.bf16.msra.mxu0 %v9603_v46  ;;  %v9671_v46 = vld [vmem:[%s10051_s30] ss:$12 sps:$4 sm:$0xff]  }
 0x2fb   : > { %8022 = vmatprep.subr.bf16.mxu0 %v9604_v14 }
 0x2fc   : > { %v11583_v54 = vpop.f32.mrb[100].mxu0 }
 0x2fd   : > { %8649 = vxpose.xlu0.b32.cont [2/16] (narrow) %v13439_v21, 64  ;;  %v6200_v55 = vpop.permute.xlu0 %6199  ;;  %v11589_v12 = vpop.f32.mrb[101].mxu0 }
 0x2fe   : > { %7699 = vst.msk [vmem:[%s10512_s13 + $0x2b8] sm:$0xf] %vm3958_vm0, %v6200_v55  ;;  %13440 = vst [vmem:[#allocation43_spill] sm:$0xff] %v11589_v12  ;;  %v11593_v3 = vpop.f32.mrb[102].mxu0  ;;  %8023 = vmatpush3.bf16.msra.mxu0 %v9605_v19 }
 0x2ff   : > { %v8808_v55 = vpack.i.bf16 %v11593_v3, %v11583_v54  ;;  %v11599_v57 = vpop.f32.mrb[103].mxu0 }
 0x300   : > { %13441 = vst [vmem:[#allocation44_spill] sm:$0xff] %v11599_v57  ;;  %v8813_v21 = vpack.i.bf16 %v11599_v57, %v11589_v12 }
 0x301   : > { %8651 = vxpose.xlu0.b32.cont [3/16] (narrow) %v13442_v6, 64  ;;  %v6202_v48 = vpop.permute.xlu0 %6201  ;;  %8809 = vrot.lane.b32.xlu1 %v8808_v55, %s9870_s21  ;;  %v9673_v6 = vld [vmem:[%s10051_s30 + $0x18] ss:$12 sps:$4 sm:$0xff]  }
 0x302   : > { %7700 = vst.msk [vmem:[%s10512_s13 + $0x2bc] sm:$0xf] %vm3958_vm0, %v6202_v48  ;;  %3541 = vmatmul.mubr.bf16.vlgmr.msra.gmra.mrb[128].mxu0 %v9671_v46 }
 0x303   : > { %3548 = vmatprep.mubr.bf16.mxu0 %v9672_v0 }
 0x304   : > { %v11617_v52 = vpop.f32.mrb[104].mxu0 }
 0x305   : > { %8653 = vxpose.xlu0.b32.cont [4/16] (narrow) %v13443_v13, 64  ;;  %v6204_v5 = vpop.permute.xlu0 %6203  ;;  %8814 = vrot.lane.b32.xlu1 %v8813_v21, %s9870_s21  ;;  %v11623_v48 = vpop.f32.mrb[105].mxu0  ;;  %v13446_v13 = vpack.i.bf16 %v11110_v60, %v10809_v32  ;;  %v13447_v21 = vpack.i.bf16 %v11123_v30, %v10821_v38  ;;  %v13450_v38 = vpack.i.bf16 %v11144_v20, %v10850_v43  ;;  %v9675_v20 = vld [vmem:[%s10051_s30 + $0x30] ss:$12 sps:$4 sm:$0xff]   ;;  %v9676_v32 = vld [vmem:[%s10051_s30 + $0x4c] ss:$12 sps:$4 sm:$0xff]  }
 0x306   : > { %7701 = vst.msk [vmem:[%s10512_s13 + $0x2c0] sm:$0xf] %vm3958_vm0, %v6204_v5  ;;  %13444 = vst [vmem:[#allocation45_spill] sm:$0xff] %v11623_v48  ;;  %v11627_v62 = vpop.f32.mrb[106].mxu0 }
 0x307   : > { %v11633_v14 = vpop.f32.mrb[107].mxu0 }
 0x308   : > { %13445 = vst [vmem:[#allocation46_spill] sm:$0xff] %v11633_v14  ;;  %v9684_v14 = vld [vmem:[%s10051_s30 + $0xac] ss:$12 sps:$4 sm:$0xff]  }
 0x309   : > { %8655 = vxpose.xlu0.b32.cont [5/16] (narrow) %v13446_v13, 64  ;;  %v11638_v55 = vpop.permute.xlu0 %8607  ;;  %v9674_v13 = vld [vmem:[%s10051_s30 + $0x34] ss:$12 sps:$4 sm:$0xff]  }
 0x30a   : > { %3549 = vmatmul.mubr.bf16.gmra.mrb[132].mxu0 %v9673_v6 }
 0x30b   : > { %3556 = vmatprep.mubr.bf16.mxu0 %v9674_v13 }
 0x30c   : > { %v11647_v50 = vpop.f32.mrb[108].mxu0 }
 0x30d   : > { %8657 = vxpose.xlu0.b32.cont [6/16] (narrow) %v13447_v21, 64  ;;  %v6206_v0 = vpop.permute.xlu0 %6205  ;;  %v11654_v60 = vpop.f32.mrb[109].mxu0  ;;  %v13451_v21 = vpack.i.bf16 %v11159_v22, %v10866_v37 }
 0x30e   : > { %7702 = vst.msk [vmem:[%s10512_s13 + $0x2c4] sm:$0xf] %vm3958_vm0, %v6206_v0  ;;  %13448 = vst [vmem:[#allocation47_spill] sm:$0xff] %v11654_v60  ;;  %v11659_v30 = vpop.f32.mrb[110].mxu0 }
 0x30f   : > { %v8900_v6 = vpack.i.bf16 %v11659_v30, %v11647_v50  ;;  %v11665_v0 = vpop.f32.mrb[111].mxu0 }
 0x310   : > { %13449 = vst [vmem:[#allocation48_spill] sm:$0xff] %v11665_v0  ;;  %v8905_v13 = vpack.i.bf16 %v11665_v0, %v11654_v60  ;;  %v13460_v60 = vld [vmem:[#allocation14_spill] sm:$0xff] }
 0x311   : > { %8659 = vxpose.xlu0.b32.cont [7/16] (narrow) %v13450_v38, 64  ;;  %v6208_v46 = vpop.permute.xlu0 %6207  ;;  %8901 = vrot.lane.b32.xlu1 %v8900_v6, %s9870_s21 }
 0x312   : > { %7703 = vst.msk [vmem:[%s10512_s13 + $0x2c8] sm:$0xf] %vm3958_vm0, %v6208_v46  ;;  %3557 = vmatmul.mubr.bf16.gmra.mrb[136].mxu0 %v9675_v20 }
 0x313   : > { %3564 = vmatprep.mubr.bf16.mxu0 %v9676_v32 }
 0x314   : > { %v11690_v46 = vpop.f32.mrb[112].mxu0 }
 0x315   : > { %v3349_v19 = vpop.f32.mrb[96].mxu1  ;;  %8661 = vxpose.xlu0.b32.cont [8/16] (narrow) %v13451_v21, 64  ;;  %v6210_v43 = vpop.permute.xlu0 %6209  ;;  %8906 = vrot.lane.b32.xlu1 %v8905_v13, %s9870_s21 }
 0x316   : > { %v7808_v38 = vpack.c.bf16 %v3349_v19, %v3349_v19  ;;  %7704 = vst.msk [vmem:[%s10512_s13 + $0x2cc] sm:$0xf] %vm3958_vm0, %v6210_v43  ;;  %v3351_v6 = vpop.f32.mrb[97].mxu1  ;;  %v11696_v22 = vpop.f32.mrb[113].mxu0  ;;  %v13454_v19 = vpack.i.bf16 %v11181_v31, %v10898_v47  ;;  %v13455_v47 = vpack.i.bf16 %v11192_v24, %v10908_v11 }
 0x317   : > { %v7888_v37 = vpack.c.bf16 %v3351_v6, %v3351_v6  ;;  %13452 = vst [vmem:[#allocation49_spill] sm:$0xff] %v11696_v22  ;;  %v3353_v21 = vpop.f32.mrb[98].mxu1  ;;  %v11702_v43 = vpop.f32.mrb[114].mxu0  ;;  %v9681_v22 = vld [vmem:[%s10051_s30 + $0x78] ss:$12 sps:$4 sm:$0xff]  }
 0x318   : > { %4239 = vst.msk [vmem:[%s11682_s24] sm:$0xf] %vm3958_vm0, %v7808_v38  ;;  %v7809_v13 = vpack.c.bf16 %v3353_v21, %v3353_v21  ;;  %v3355_v20 = vpop.f32.mrb[99].mxu1  ;;  %v11710_v5 = vpop.f32.mrb[115].mxu0 }
 0x319   : > { %7429 = vst.msk [vmem:[%s11682_s24 + $0x100] sm:$0xf] %vm3958_vm0, %v7888_v37  ;;  %13453 = vst [vmem:[#allocation50_spill] sm:$0xff] %v11710_v5  ;;  %v7889_v61 = vpack.c.bf16 %v3355_v20, %v3355_v20  ;;  %8663 = vxpose.xlu0.b32.cont [9/16] (narrow) %v13454_v19, 64  ;;  %v6212_v23 = vpop.permute.xlu0 %6211  ;;  %4649 = vrot.lane.b32.xlu1 %v7808_v38, %s9870_s21  ;;  %v9677_v19 = vld [vmem:[%s10051_s30 + $0x48] ss:$12 sps:$4 sm:$0xff]  }
 0x31a   : > { %4240 = vst.msk [vmem:[%s11682_s24 + $0x4] sm:$0xf] %vm3958_vm0, %v7809_v13  ;;  %7705 = vst.msk [vmem:[%s10512_s13 + $0x2d0] sm:$0xf] %vm3958_vm0, %v6212_v23  ;;  %3565 = vmatmul.mubr.bf16.gmra.mrb[140].mxu0 %v9677_v19  ;;  %v9678_v23 = vld [vmem:[%s10051_s30 + $0x64] ss:$12 sps:$4 sm:$0xff]  }
 0x31b   : > { %7430 = vst.msk [vmem:[%s11682_s24 + $0x104] sm:$0xf] %vm3958_vm0, %v7889_v61  ;;  %3572 = vmatprep.mubr.bf16.mxu0 %v9678_v23 }
 0x31c   : > { %v11732_v6 = vpop.f32.mrb[116].mxu0 }
 0x31d   : > { %v3359_v20 = vpop.f32.mrb[100].mxu1  ;;  %8665 = vxpose.xlu0.b32.cont [10/16] (narrow) %v13455_v47, 64  ;;  %v11729_v31 = vpop.permute.xlu0 %8617  ;;  %5599 = vrot.lane.b32.xlu1 %v7888_v37, %s9870_s21 }
 0x31e   : > { %v7810_v21 = vpack.c.bf16 %v3359_v20, %v3359_v20  ;;  %v3361_v32 = vpop.f32.mrb[101].mxu1  ;;  %v11740_v11 = vpop.f32.mrb[117].mxu0 }
 0x31f   : > { %v11738_v0 = vpack.c.bf16 %v3361_v32, %v3361_v32  ;;  %v3363_v24 = vpop.f32.mrb[102].mxu1  ;;  %v11746_v47 = vpop.f32.mrb[118].mxu0 }
 0x320   : > { %4241 = vst.msk [vmem:[%s11682_s24 + $0x8] sm:$0xf] %vm3958_vm0, %v7810_v21  ;;  %v11748_v37 = vpack.c.bf16 %v3363_v24, %v3363_v24  ;;  %v3365_v19 = vpop.f32.mrb[103].mxu1  ;;  %v8920_v23 = vpack.i.bf16 %v11746_v47, %v11732_v6  ;;  %v11757_v38 = vpop.f32.mrb[119].mxu0  ;;  %v13456_v24 = vpack.i.bf16 %v11213_v4, %v10930_v10  ;;  %v13457_v4 = vpack.i.bf16 %v11226_v59, %v10941_v27  ;;  %v9682_v27 = vld [vmem:[%s10051_s30 + $0x94] ss:$12 sps:$4 sm:$0xff]  }
 0x321   : > { %7431 = vst.msk [vmem:[%s11682_s24 + $0x108] sm:$0xf] %vm3958_vm0, %v11738_v0  ;;  %v11759_v20 = vpack.c.bf16 %v3365_v19, %v3365_v19  ;;  %v6214_v15 = vpop.permute.xlu0 %6213  ;;  %4651 = vrot.lane.b32.xlu1 %v7809_v13, %s9870_s21 }
 0x322   : > { %8667 = vxpose.xlu0.b32.cont [11/16] (narrow) %v13456_v24, 64  ;;  %4242 = vst.msk [vmem:[%s11682_s24 + $0xc] sm:$0xf] %vm3958_vm0, %v11748_v37  ;;  %7706 = vst.msk [vmem:[%s10512_s13 + $0x2d4] sm:$0xf] %vm3958_vm0, %v6214_v15 }
 0x323   : > { %7432 = vst.msk [vmem:[%s11682_s24 + $0x10c] sm:$0xf] %vm3958_vm0, %v11759_v20  ;;  %v9679_v24 = vld [vmem:[%s10051_s30 + $0x60] ss:$12 sps:$4 sm:$0xff]  }
 0x324   : > { %3573 = vmatmul.mubr.bf16.gmra.mrb[144].mxu0 %v9679_v24  ;;  %v11785_v15 = vpop.f32.mrb[120].mxu0 }
 0x325   : > { %v3369_v10 = vpop.f32.mrb[104].mxu1  ;;  %v6216_v19 = vpop.permute.xlu0 %6215  ;;  %5601 = vrot.lane.b32.xlu1 %v7889_v61, %s9870_s21  ;;  %3580 = vmatprep.mubr.bf16.mxu0 %v9680_v29 }
 0x326   : > { %8669 = vxpose.xlu0.b32.cont [12/16] (narrow) %v13457_v4, 64  ;;  %v11781_v32 = vpack.c.bf16 %v3369_v10, %v3369_v10  ;;  %7707 = vst.msk [vmem:[%s10512_s13 + $0x2d8] sm:$0xf] %vm3958_vm0, %v6216_v19  ;;  %v3371_v13 = vpop.f32.mrb[105].mxu1  ;;  %v11793_v4 = vpop.f32.mrb[121].mxu0 }
 0x327   : > { %v11791_v59 = vpack.c.bf16 %v3371_v13, %v3371_v13  ;;  %13458 = vst [vmem:[#allocation51_spill] sm:$0xff] %v11793_v4  ;;  %v3373_v10 = vpop.f32.mrb[106].mxu1  ;;  %v11800_v61 = vpop.f32.mrb[122].mxu0  ;;  %v13478_v4 = vpack.i.bf16 %v11757_v38, %v11740_v11 }
 0x328   : > { %4243 = vst.msk [vmem:[%s11682_s24 + $0x10] sm:$0xf] %vm3958_vm0, %v11781_v32  ;;  %v11802_v29 = vpack.c.bf16 %v3373_v10, %v3373_v10  ;;  %v3375_v24 = vpop.f32.mrb[107].mxu1  ;;  %v11811_v40 = vpop.f32.mrb[123].mxu0  ;;  %v13462_v10 = vpack.i.bf16 %v13460_v60, %v13461_v35  ;;  %v13464_v60 = vld [vmem:[#allocation15_spill] sm:$0xff] }
 0x329   : > { %7433 = vst.msk [vmem:[%s11682_s24 + $0x110] sm:$0xf] %vm3958_vm0, %v11791_v59  ;;  %13459 = vst [vmem:[#allocation52_spill] sm:$0xff] %v11811_v40  ;;  %v11813_v19 = vpack.c.bf16 %v3375_v24, %v3375_v24  ;;  %v6218_v57 = vpop.permute.xlu0 %6217  ;;  %4653 = vrot.lane.b32.xlu1 %v7810_v21, %s9870_s21  ;;  %v13465_v24 = vld [vmem:[#allocation11_spill] sm:$0xff] }
 0x32a   : > { %8671 = vxpose.xlu0.b32.cont [13/16] (narrow) %v13462_v10, 64  ;;  %4244 = vst.msk [vmem:[%s11682_s24 + $0x14] sm:$0xf] %vm3958_vm0, %v11802_v29  ;;  %7708 = vst.msk [vmem:[%s10512_s13 + $0x2dc] sm:$0xf] %vm3958_vm0, %v6218_v57  ;;  %v13466_v10 = vpack.i.bf16 %v13464_v60, %v13465_v24 }
 0x32b   : > { %7434 = vst.msk [vmem:[%s11682_s24 + $0x114] sm:$0xf] %vm3958_vm0, %v11813_v19 }
 0x32c   : > { %3581 = vmatmul.mubr.bf16.gmra.mrb[148].mxu0 %v9681_v22  ;;  %v11839_v57 = vpop.f32.mrb[124].mxu0 }
 0x32d   : > { %v3379_v35 = vpop.f32.mrb[108].mxu1  ;;  %v6220_v12 = vpop.permute.xlu0 %6219  ;;  %8921 = vrot.lane.b32.xlu1 %v8920_v23, %s9870_s21  ;;  %3588 = vmatprep.mubr.bf16.mxu0 %v9682_v27 }
 0x32e   : > { %8673 = vxpose.xlu0.b32.cont [14/16] (narrow) %v13466_v10, 64  ;;  %v11835_v13 = vpack.c.bf16 %v3379_v35, %v3379_v35  ;;  %7709 = vst.msk [vmem:[%s10512_s13 + $0x2e0] sm:$0xf] %vm3958_vm0, %v6220_v12  ;;  %v3381_v21 = vpop.f32.mrb[109].mxu1  ;;  %v11847_v10 = vpop.f32.mrb[125].mxu0  ;;  %v13470_v12 = vld [vmem:[#allocation16_spill] sm:$0xff] }
 0x32f   : > { %v11845_v24 = vpack.c.bf16 %v3381_v21, %v3381_v21  ;;  %13467 = vst [vmem:[#allocation14_spill] sm:$0xff] %v11847_v10  ;;  %v3383_v22 = vpop.f32.mrb[110].mxu1  ;;  %v11854_v35 = vpop.f32.mrb[126].mxu0 }
 0x330   : > { %4245 = vst.msk [vmem:[%s11682_s24 + $0x18] sm:$0xf] %vm3958_vm0, %v11835_v13  ;;  %v11856_v23 = vpack.c.bf16 %v3383_v22, %v3383_v22  ;;  %v3385_v27 = vpop.f32.mrb[111].mxu1  ;;  %v11865_v40 = vpop.f32.mrb[127].mxu0  ;;  %v13472_v22 = vpack.i.bf16 %v13470_v12, %v13471_v8  ;;  %v13474_v12 = vld [vmem:[#allocation17_spill] sm:$0xff] }
 0x331   : > { %7435 = vst.msk [vmem:[%s11682_s24 + $0x118] sm:$0xf] %vm3958_vm0, %v11845_v24  ;;  %13469 = vst [vmem:[#allocation19_spill] sm:$0xff] %v11865_v40  ;;  %v11867_v5 = vpack.c.bf16 %v3385_v27, %v3385_v27  ;;  %v11872_v48 = vpop.permute.xlu0 %8627  ;;  %5603 = vrot.lane.b32.xlu1 %v11738_v0, %s9870_s21  ;;  %v13475_v27 = vld [vmem:[#allocation13_spill] sm:$0xff] }
 0x332   : > { %8675 = vxpose.xlu0.b32.cont [15/16] (narrow) %v13472_v22, 64  ;;  %4246 = vst.msk [vmem:[%s11682_s24 + $0x1c] sm:$0xf] %vm3958_vm0, %v11856_v23  ;;  %v13476_v22 = vpack.i.bf16 %v13474_v12, %v13475_v27 }
 0x333   : > { %7436 = vst.msk [vmem:[%s11682_s24 + $0x11c] sm:$0xf] %vm3958_vm0, %v11867_v5 }
 0x334   : > { %3589 = vmatmul.mubr.bf16.gmra.mrb[152].mxu0 %v9683_v44 }
 0x335   : > { %v3389_v8 = vpop.f32.mrb[112].mxu1  ;;  %v6224_v21 = vpop.permute.xlu0 %6223  ;;  %8926 = vrot.lane.b32.xlu1 %v13478_v4, %s9870_s21  ;;  %3596 = vmatprep.mubr.bf16.mxu0 %v9684_v14 }
 0x336   : > { %8677 = vxpose.xlu0.b32.end [16/16] (narrow) %v13476_v22, 64  ;;  %v11890_v60 = vpack.c.bf16 %v3389_v8, %v3389_v8  ;;  %7711 = vst.msk [vmem:[%s10512_s13 + $0x2e8] sm:$0xf] %vm3958_vm0, %v6224_v21  ;;  %v3391_v0 = vpop.f32.mrb[113].mxu1 }
 0x337   : > { %v11899_v12 = vpack.c.bf16 %v3391_v0, %v3391_v0  ;;  %v3393_v27 = vpop.f32.mrb[114].mxu1  ;;  %v9685_v0 = vld [vmem:[%s10051_s30 + $0xa8] ss:$12 sps:$4 sm:$0xff]  }
 0x338   : > { %13477 = vst [vmem:[#allocation15_spill] sm:$0xff] %v11890_v60  ;;  %4247 = vst.msk [vmem:[%s11682_s24 + $0x20] sm:$0xf] %vm3958_vm0, %v11890_v60  ;;  %v11904_v44 = vpack.c.bf16 %v3393_v27, %v3393_v27  ;;  %v3395_v21 = vpop.f32.mrb[115].mxu1  ;;  %v9700_v60 = vld [vmem:[%s10051_s30 + $0x16c] ss:$12 sps:$4 sm:$0xff]  }
 0x339   : > { %13479 = vst [vmem:[#allocation11_spill] sm:$0xff] %v11899_v12  ;;  %7437 = vst.msk [vmem:[%s11682_s24 + $0x120] sm:$0xf] %vm3958_vm0, %v11899_v12  ;;  %v11909_v8 = vpack.c.bf16 %v3395_v21, %v3395_v21  ;;  %v6226_v4 = vpop.permute.xlu0 %6225  ;;  %4655 = vrot.lane.b32.xlu1 %v11748_v37, %s9870_s21  ;;  %v9686_v37 = vld [vmem:[%s10051_s30 + $0xc4] ss:$12 sps:$4 sm:$0xff]  }
 0x33a   : > { %13480 = vst [vmem:[#allocation16_spill] sm:$0xff] %v11904_v44  ;;  %4248 = vst.msk [vmem:[%s11682_s24 + $0x24] sm:$0xf] %vm3958_vm0, %v11904_v44  ;;  %v13527_v44 = vpack.i.bf16 %v11523_v49, %v11514_v9  ;;  %v9611_v12 = vld [vmem:[#allocation5 + $0x608] ss:$36 sps:$4 sm:$0xff]  }
 0x33b   : > { %13481 = vst [vmem:[#allocation12_spill] sm:$0xff] %v11909_v8  ;;  %7712 = vst.msk [vmem:[%s10512_s13 + $0x2ec] sm:$0xf] %vm3958_vm0, %v6226_v4 }
 0x33c   : > { %7438 = vst.msk [vmem:[%s11682_s24 + $0x124] sm:$0xf] %vm3958_vm0, %v11909_v8  ;;  %3597 = vmatmul.mubr.bf16.gmra.mrb[156].mxu0 %v9685_v0 }
 0x33d   : > { %v3399_v14 = vpop.f32.mrb[116].mxu1  ;;  %v6228_v22 = vpop.permute.xlu0 %6227  ;;  %5605 = vrot.lane.b32.xlu1 %v11759_v20, %s9870_s21  ;;  %3604 = vmatprep.mubr.bf16.mxu0 %v9686_v37  ;;  %v9687_v37 = vld [vmem:[%s10051_s30 + $0xc0] ss:$12 sps:$4 sm:$0xff]  }
 0x33e   : > { %v11922_v27 = vpack.c.bf16 %v3399_v14, %v3399_v14  ;;  %7713 = vst.msk [vmem:[%s10512_s13 + $0x2f0] sm:$0xf] %vm3958_vm0, %v6228_v22  ;;  %v3401_v21 = vpop.f32.mrb[117].mxu1 }
 0x33f   : > { %v11929_v4 = vpack.c.bf16 %v3401_v21, %v3401_v21  ;;  %v3403_v8 = vpop.f32.mrb[118].mxu1 }
 0x340   : > { %13482 = vst [vmem:[#allocation17_spill] sm:$0xff] %v11922_v27  ;;  %4249 = vst.msk [vmem:[%s11682_s24 + $0x28] sm:$0xf] %vm3958_vm0, %v11922_v27  ;;  %v11934_v0 = vpack.c.bf16 %v3403_v8, %v3403_v8  ;;  %v3405_v14 = vpop.f32.mrb[119].mxu1  ;;  %v9606_v27 = vld [vmem:[#allocation5 + $0x4a0] ss:$36 sps:$4 sm:$0xff]  }
 0x341   : > { %13483 = vst [vmem:[#allocation13_spill] sm:$0xff] %v11929_v4  ;;  %7439 = vst.msk [vmem:[%s11682_s24 + $0x128] sm:$0xf] %vm3958_vm0, %v11929_v4  ;;  %v11939_v22 = vpack.c.bf16 %v3405_v14, %v3405_v14  ;;  %v11941_v20 = vpop.permute.xlu0 %8637  ;;  %4657 = vrot.lane.b32.xlu1 %v11781_v32, %s9870_s21  ;;  %8208 = vmatprep.subr.bf16.mxu1 %v9606_v27 }
 0x342   : > { %13484 = vst [vmem:[#allocation53_spill] sm:$0xff] %v11934_v0  ;;  %4250 = vst.msk [vmem:[%s11682_s24 + $0x2c] sm:$0xf] %vm3958_vm0, %v11934_v0  ;;  %v9688_v0 = vld [vmem:[%s10051_s30 + $0xdc] ss:$12 sps:$4 sm:$0xff]   ;;  %8144 = vmatprep.subr.bf16.mxu0 %v9606_v27  ;;  %8216 = vmatpush3.bf16.msra.mxu1 %v9606_v27 }
 0x343   : > { %13485 = vst [vmem:[#allocation54_spill] sm:$0xff] %v11939_v22  ;;  %7440 = vst.msk [vmem:[%s11682_s24 + $0x12c] sm:$0xf] %vm3958_vm0, %v11939_v22  ;;  %8145 = vmatpush3.bf16.msra.mxu0 %v9606_v27 }
 0x344   : > { %3605 = vmatmul.mubr.bf16.gmra.mrb[160].mxu0 %v9687_v37 }
 0x345   : > { %v3409_v8 = vpop.f32.mrb[120].mxu1  ;;  %v6230_v21 = vpop.permute.xlu0 %6229  ;;  %5607 = vrot.lane.b32.xlu1 %v11791_v59, %s9870_s21  ;;  %3612 = vmatprep.mubr.bf16.mxu0 %v9688_v0 }
 0x346   : > { %v11952_v4 = vpack.c.bf16 %v3409_v8, %v3409_v8  ;;  %7714 = vst.msk [vmem:[%s10512_s13 + $0x2f4] sm:$0xf] %vm3958_vm0, %v6230_v21  ;;  %v3411_v14 = vpop.f32.mrb[121].mxu1  ;;  %v11971_v0 = vpop.permute.xlu1 %8632 }
 0x347   : > { %v11959_v32 = vpack.c.bf16 %v3411_v14, %v3411_v14  ;;  %v3413_v22 = vpop.f32.mrb[122].mxu1 }
 0x348   : > { %13486 = vst [vmem:[#allocation55_spill] sm:$0xff] %v11952_v4  ;;  %4251 = vst.msk [vmem:[%s11682_s24 + $0x30] sm:$0xf] %vm3958_vm0, %v11952_v4  ;;  %v11964_v8 = vpack.c.bf16 %v3413_v22, %v3413_v22  ;;  %v3415_v21 = vpop.f32.mrb[123].mxu1 }
 0x349   : > { %13487 = vst [vmem:[#allocation56_spill] sm:$0xff] %v11959_v32  ;;  %7441 = vst.msk [vmem:[%s11682_s24 + $0x130] sm:$0xf] %vm3958_vm0, %v11959_v32  ;;  %v11969_v37 = vpack.c.bf16 %v3415_v21, %v3415_v21  ;;  %v6232_v59 = vpop.permute.xlu0 %6231  ;;  %4659 = vrot.lane.b32.xlu1 %v11802_v29, %s9870_s21  ;;  %v9689_v21 = vld [vmem:[%s10051_s30 + $0xd8] ss:$12 sps:$4 sm:$0xff]  }
 0x34a   : > { %13488 = vst [vmem:[#allocation57_spill] sm:$0xff] %v11964_v8  ;;  %4252 = vst.msk [vmem:[%s11682_s24 + $0x34] sm:$0xf] %vm3958_vm0, %v11964_v8  ;;  %v11984_v32 = vpop.permute.xlu1 %8642 }
 0x34b   : > { %13489 = vst [vmem:[#allocation58_spill] sm:$0xff] %v11969_v37  ;;  %7715 = vst.msk [vmem:[%s10512_s13 + $0x2f8] sm:$0xf] %vm3958_vm0, %v6232_v59  ;;  %v9690_v59 = vld [vmem:[%s10051_s30 + $0xf4] ss:$12 sps:$4 sm:$0xff]  }
 0x34c   : > { %7442 = vst.msk [vmem:[%s11682_s24 + $0x134] sm:$0xf] %vm3958_vm0, %v11969_v37  ;;  %3613 = vmatmul.mubr.bf16.gmra.mrb[164].mxu0 %v9689_v21 }
 0x34d   : > { %v3419_v22 = vpop.f32.mrb[124].mxu1  ;;  %v6234_v14 = vpop.permute.xlu0 %6233  ;;  %5609 = vrot.lane.b32.xlu1 %v11813_v19, %s9870_s21  ;;  %3620 = vmatprep.mubr.bf16.mxu0 %v9690_v59 }
 0x34e   : > { %v11986_v8 = vpack.c.bf16 %v3419_v22, %v3419_v22  ;;  %7716 = vst.msk [vmem:[%s10512_s13 + $0x2fc] sm:$0xf] %vm3958_vm0, %v6234_v14  ;;  %v3421_v29 = vpop.f32.mrb[125].mxu1  ;;  %v12005_v4 = vpop.permute.xlu1 %8729 }
 0x34f   : > { %v11993_v27 = vpack.c.bf16 %v3421_v29, %v3421_v29  ;;  %v3423_v37 = vpop.f32.mrb[126].mxu1  ;;  %13494 = vst [vmem:[#allocation63_spill] sm:$0xff] %v12005_v4  ;;  %v9607_v29 = vld [vmem:[#allocation5 + $0x4e8] ss:$36 sps:$4 sm:$0xff]  }
 0x350   : > { %13490 = vst [vmem:[#allocation59_spill] sm:$0xff] %v11986_v8  ;;  %4253 = vst.msk [vmem:[%s11682_s24 + $0x38] sm:$0xf] %vm3958_vm0, %v11986_v8  ;;  %v11998_v21 = vpack.c.bf16 %v3423_v37, %v3423_v37  ;;  %v3425_v22 = vpop.f32.mrb[127].mxu1  ;;  %v9691_v37 = vld [vmem:[%s10051_s30 + $0xf0] ss:$12 sps:$4 sm:$0xff]   ;;  %8209 = vmatprep.subr.bf16.mxu1 %v9607_v29  ;;  %8146 = vmatprep.subr.bf16.mxu0 %v9607_v29 }
 0x351   : > { %13491 = vst [vmem:[#allocation60_spill] sm:$0xff] %v11993_v27  ;;  %7443 = vst.msk [vmem:[%s11682_s24 + $0x138] sm:$0xf] %vm3958_vm0, %v11993_v27  ;;  %v12003_v14 = vpack.c.bf16 %v3425_v22, %v3425_v22  ;;  %4661 = vrot.lane.b32.xlu1 %v11835_v13, %s9870_s21  ;;  %v13496_v27 = vpack.i.bf16 %v11854_v35, %v11839_v57  ;;  %8217 = vmatpush3.bf16.msra.mxu1 %v9607_v29 }
 0x352   : > { %13492 = vst [vmem:[#allocation61_spill] sm:$0xff] %v11998_v21  ;;  %4254 = vst.msk [vmem:[%s11682_s24 + $0x3c] sm:$0xf] %vm3958_vm0, %v11998_v21  ;;  %v9692_v21 = vld [vmem:[%s10051_s30 + $0x10c] ss:$12 sps:$4 sm:$0xff]   ;;  %8147 = vmatpush3.bf16.msra.mxu0 %v9607_v29 }
 0x353   : > { %13493 = vst [vmem:[#allocation62_spill] sm:$0xff] %v12003_v14  ;;  %7444 = vst.msk [vmem:[%s11682_s24 + $0x13c] sm:$0xf] %vm3958_vm0, %v12003_v14  ;;  %v9693_v29 = vld [vmem:[%s10051_s30 + $0x108] ss:$12 sps:$4 sm:$0xff]  }
 0x354   : > { %3621 = vmatmul.mubr.bf16.gmra.mrb[168].mxu0 %v9691_v37  ;;  %v12025_v37 = vpop.permute.xlu1 %8734 }
 0x355   : > { %v3429_v19 = vpop.f32.mrb[128].mxu1  ;;  %8941 = vrot.lane.b32.xlu1 %v13496_v27, %s9870_s21  ;;  %3628 = vmatprep.mubr.bf16.mxu0 %v9692_v21  ;;  %13498 = vst [vmem:[#allocation66_spill] sm:$0xff] %v12025_v37  ;;  %v13503_v37 = vld [vmem:[#allocation20_spill] sm:$0xff] }
 0x356   : > { %v12016_v59 = vpack.c.bf16 %v3429_v19, %v3429_v19  ;;  %v3431_v22 = vpop.f32.mrb[129].mxu1 }
 0x357   : > { %v12023_v13 = vpack.c.bf16 %v3431_v22, %v3431_v22  ;;  %v3433_v14 = vpop.f32.mrb[130].mxu1 }
 0x358   : > { %13495 = vst [vmem:[#allocation64_spill] sm:$0xff] %v12016_v59  ;;  %4255 = vst.msk [vmem:[%s11682_s24 + $0x40] sm:$0xf] %vm3958_vm0, %v12016_v59  ;;  %v12030_v19 = vpack.c.bf16 %v3433_v14, %v3433_v14  ;;  %v3435_v8 = vpop.f32.mrb[131].mxu1  ;;  %v12045_v21 = vpop.permute.xlu1 %8749  ;;  %v9694_v59 = vld [vmem:[%s10051_s30 + $0x124] ss:$12 sps:$4 sm:$0xff]  }
 0x359   : > { %13497 = vst [vmem:[#allocation65_spill] sm:$0xff] %v12023_v13  ;;  %7445 = vst.msk [vmem:[%s11682_s24 + $0x140] sm:$0xf] %vm3958_vm0, %v12023_v13  ;;  %v12035_v27 = vpack.c.bf16 %v3435_v8, %v3435_v8  ;;  %5611 = vrot.lane.b32.xlu1 %v11845_v24, %s9870_s21  ;;  %v13505_v24 = vpack.i.bf16 %v11865_v40, %v11847_v10 }
 0x35a   : > { %13499 = vst [vmem:[#allocation67_spill] sm:$0xff] %v12030_v19  ;;  %4256 = vst.msk [vmem:[%s11682_s24 + $0x44] sm:$0xf] %vm3958_vm0, %v12030_v19  ;;  %v13504_v19 = vpack.i.bf16 %v11381_v26, %v13503_v37 }
 0x35b   : > { %13500 = vst [vmem:[#allocation68_spill] sm:$0xff] %v12035_v27  ;;  %7446 = vst.msk [vmem:[%s11682_s24 + $0x144] sm:$0xf] %vm3958_vm0, %v12035_v27 }
 0x35c   : > { %13501 = vst [vmem:[#allocation69_spill] sm:$0xff] %v12045_v21  ;;  %3629 = vmatmul.mubr.bf16.gmra.mrb[172].mxu0 %v9693_v29  ;;  %v12071_v21 = vpop.permute.xlu1 %8754 }
 0x35d   : > { %v3439_v14 = vpop.f32.mrb[132].mxu1  ;;  %8946 = vrot.lane.b32.xlu1 %v13505_v24, %s9870_s21  ;;  %3636 = vmatprep.mubr.bf16.mxu0 %v9694_v59  ;;  %13509 = vst [vmem:[#allocation73_spill] sm:$0xff] %v12071_v21  ;;  %v13510_v59 = vld [vmem:[#allocation21_spill] sm:$0xff]  ;;  %v9695_v24 = vld [vmem:[%s10051_s30 + $0x120] ss:$12 sps:$4 sm:$0xff]  }
 0x35e   : > { %v12048_v22 = vpack.c.bf16 %v3439_v14, %v3439_v14  ;;  %v3441_v8 = vpop.f32.mrb[133].mxu1 }
 0x35f   : > { %8719 = vrot.lane.b32.xlu0 %v13504_v19, %s9870_s21  ;;  %v12058_v27 = vpack.c.bf16 %v3441_v8, %v3441_v8  ;;  %v3443_v13 = vpop.f32.mrb[134].mxu1  ;;  %v13511_v8 = vpack.i.bf16 %v11385_v58, %v13510_v59 }
 0x360   : > { %13502 = vst [vmem:[#allocation70_spill] sm:$0xff] %v12048_v22  ;;  %4257 = vst.msk [vmem:[%s11682_s24 + $0x48] sm:$0xf] %vm3958_vm0, %v12048_v22  ;;  %v12064_v14 = vpack.c.bf16 %v3443_v13, %v3443_v13  ;;  %v3445_v29 = vpop.f32.mrb[135].mxu1  ;;  %v12086_v21 = vpop.permute.xlu1 %8769 }
 0x361   : > { %13506 = vst [vmem:[#allocation20_spill] sm:$0xff] %v12058_v27  ;;  %7447 = vst.msk [vmem:[%s11682_s24 + $0x148] sm:$0xf] %vm3958_vm0, %v12058_v27  ;;  %v12069_v19 = vpack.c.bf16 %v3445_v29, %v3445_v29  ;;  %4663 = vrot.lane.b32.xlu1 %v11856_v23, %s9870_s21  ;;  %v9608_v29 = vld [vmem:[#allocation5 + $0x530] ss:$36 sps:$4 sm:$0xff]  }
 0x362   : > { %13507 = vst [vmem:[#allocation71_spill] sm:$0xff] %v12064_v14  ;;  %4258 = vst.msk [vmem:[%s11682_s24 + $0x4c] sm:$0xf] %vm3958_vm0, %v12064_v14  ;;  %v9696_v23 = vld [vmem:[%s10051_s30 + $0x13c] ss:$12 sps:$4 sm:$0xff]   ;;  %8210 = vmatprep.subr.bf16.mxu1 %v9608_v29  ;;  %8148 = vmatprep.subr.bf16.mxu0 %v9608_v29 }
 0x363   : > { %13508 = vst [vmem:[#allocation72_spill] sm:$0xff] %v12069_v19  ;;  %8724 = vrot.lane.b32.xlu0 %v13511_v8, %s9870_s21  ;;  %7448 = vst.msk [vmem:[%s11682_s24 + $0x14c] sm:$0xf] %vm3958_vm0, %v12069_v19  ;;  %v13514_v8 = vpack.i.bf16 %v11427_v28, %v11420_v16  ;;  %8218 = vmatpush3.bf16.msra.mxu1 %v9608_v29 }
 0x364   : > { %3637 = vmatmul.mubr.bf16.gmra.mrb[176].mxu0 %v9695_v24  ;;  %13512 = vst [vmem:[#allocation21_spill] sm:$0xff] %v12086_v21 }
 0x365   : > { %v3449_v13 = vpop.f32.mrb[136].mxu1  ;;  %3644 = vmatprep.mubr.bf16.mxu0 %v9696_v23  ;;  %8149 = vmatpush3.bf16.msra.mxu0 %v9608_v29  ;;  %v12117_v23 = vpop.permute.xlu1 %8774 }
 0x366   : > { %v12088_v14 = vpack.c.bf16 %v3449_v13, %v3449_v13  ;;  %v3451_v27 = vpop.f32.mrb[137].mxu1  ;;  %13519 = vst [vmem:[#allocation78_spill] sm:$0xff] %v12117_v23 }
 0x367   : > { %8739 = vrot.lane.b32.xlu0 %v13514_v8, %s9870_s21  ;;  %v12095_v19 = vpack.c.bf16 %v3451_v27, %v3451_v27  ;;  %v3453_v24 = vpop.f32.mrb[138].mxu1  ;;  %v13518_v27 = vpack.i.bf16 %v11431_v25, %v11423_v56 }
 0x368   : > { %13513 = vst [vmem:[#allocation74_spill] sm:$0xff] %v12088_v14  ;;  %4259 = vst.msk [vmem:[%s11682_s24 + $0x50] sm:$0xf] %vm3958_vm0, %v12088_v14  ;;  %v12100_v13 = vpack.c.bf16 %v3453_v24, %v3453_v24  ;;  %v3455_v22 = vpop.f32.mrb[139].mxu1  ;;  %v9697_v24 = vld [vmem:[%s10051_s30 + $0x138] ss:$12 sps:$4 sm:$0xff]  }
 0x369   : > { %13515 = vst [vmem:[#allocation75_spill] sm:$0xff] %v12095_v19  ;;  %7449 = vst.msk [vmem:[%s11682_s24 + $0x150] sm:$0xf] %vm3958_vm0, %v12095_v19  ;;  %v12105_v8 = vpack.c.bf16 %v3455_v22, %v3455_v22  ;;  %v9609_v19 = vld [vmem:[#allocation5 + $0x578] ss:$36 sps:$4 sm:$0xff]  }
 0x36a   : > { %13516 = vst [vmem:[#allocation76_spill] sm:$0xff] %v12100_v13  ;;  %4260 = vst.msk [vmem:[%s11682_s24 + $0x54] sm:$0xf] %vm3958_vm0, %v12100_v13  ;;  %v13520_v13 = vpack.i.bf16 %v11481_v1, %v11470_v63  ;;  %8150 = vmatprep.subr.bf16.mxu0 %v9609_v19  ;;  %8211 = vmatprep.subr.bf16.mxu1 %v9609_v19 }
 0x36b   : > { %13517 = vst [vmem:[#allocation77_spill] sm:$0xff] %v12105_v8  ;;  %8744 = vrot.lane.b32.xlu0 %v13518_v27, %s9870_s21  ;;  %7450 = vst.msk [vmem:[%s11682_s24 + $0x154] sm:$0xf] %vm3958_vm0, %v12105_v8  ;;  %v9698_v27 = vld [vmem:[%s10051_s30 + $0x154] ss:$12 sps:$4 sm:$0xff]   ;;  %8151 = vmatpush3.bf16.msra.mxu0 %v9609_v19 }
 0x36c   : > { %3645 = vmatmul.mubr.bf16.gmra.mrb[180].mxu0 %v9697_v24  ;;  %v12129_v24 = vpop.permute.xlu1 %8789  ;;  %8219 = vmatpush3.bf16.msra.mxu1 %v9609_v19  ;;  %v9699_v19 = vld [vmem:[%s10051_s30 + $0x150] ss:$12 sps:$4 sm:$0xff]  }
 0x36d   : > { %v3459_v29 = vpop.f32.mrb[140].mxu1  ;;  %3652 = vmatprep.mubr.bf16.mxu0 %v9698_v27  ;;  %13521 = vst [vmem:[#allocation79_spill] sm:$0xff] %v12129_v24 }
 0x36e   : > { %v12120_v22 = vpack.c.bf16 %v3459_v29, %v3459_v29  ;;  %v3461_v14 = vpop.f32.mrb[141].mxu1 }
 0x36f   : > { %8759 = vrot.lane.b32.xlu0 %v13520_v13, %s9870_s21  ;;  %v12127_v8 = vpack.c.bf16 %v3461_v14, %v3461_v14  ;;  %v3463_v23 = vpop.f32.mrb[142].mxu1  ;;  %v13524_v14 = vpack.i.bf16 %v11485_v41, %v11473_v45 }
 0x370   : > { %4261 = vst.msk [vmem:[%s11682_s24 + $0x58] sm:$0xf] %vm3958_vm0, %v12120_v22  ;;  %v12134_v29 = vpack.c.bf16 %v3463_v23, %v3463_v23  ;;  %v3465_v21 = vpop.f32.mrb[143].mxu1  ;;  %v9610_v23 = vld [vmem:[#allocation5 + $0x5c0] ss:$36 sps:$4 sm:$0xff]  }
 0x371   : > { %7451 = vst.msk [vmem:[%s11682_s24 + $0x158] sm:$0xf] %vm3958_vm0, %v12127_v8  ;;  %v12139_v13 = vpack.c.bf16 %v3465_v21, %v3465_v21  ;;  %8152 = vmatprep.subr.bf16.mxu0 %v9610_v23  ;;  %v12152_v21 = vpop.permute.xlu1 %8794  ;;  %8212 = vmatprep.subr.bf16.mxu1 %v9610_v23 }
 0x372   : > { %13522 = vst [vmem:[#allocation80_spill] sm:$0xff] %v12134_v29  ;;  %4262 = vst.msk [vmem:[%s11682_s24 + $0x5c] sm:$0xf] %vm3958_vm0, %v12134_v29  ;;  %8153 = vmatpush3.bf16.msra.mxu0 %v9610_v23  ;;  %8220 = vmatpush3.bf16.msra.mxu1 %v9610_v23 }
 0x373   : > { %13523 = vst [vmem:[#allocation81_spill] sm:$0xff] %v12139_v13  ;;  %8764 = vrot.lane.b32.xlu0 %v13524_v14, %s9870_s21  ;;  %7452 = vst.msk [vmem:[%s11682_s24 + $0x15c] sm:$0xf] %vm3958_vm0, %v12139_v13  ;;  %8154 = vmatprep.subr.bf16.mxu0 %v9611_v12 }
 0x374   : > { %3653 = vmatmul.mubr.bf16.gmra.mrb[184].mxu0 %v9699_v19  ;;  %13525 = vst [vmem:[#allocation82_spill] sm:$0xff] %v12152_v21  ;;  %v9612_v19 = vld [vmem:[#allocation5 + $0x650] ss:$36 sps:$4 sm:$0xff]   ;;  %8213 = vmatprep.subr.bf16.mxu1 %v9611_v12 }
 0x375   : > { %v3469_v27 = vpop.f32.mrb[144].mxu1  ;;  %3660 = vmatprep.mubr.bf16.mxu0 %v9700_v60  ;;  %v12173_v60 = vpop.permute.xlu1 %8809 }
 0x376   : > { %v12154_v24 = vpack.c.bf16 %v3469_v27, %v3469_v27  ;;  %v3471_v29 = vpop.f32.mrb[145].mxu1  ;;  %13531 = vst [vmem:[#allocation87_spill] sm:$0xff] %v12173_v60  ;;  %8155 = vmatpush3.bf16.msra.mxu0 %v9611_v12  ;;  %8221 = vmatpush3.bf16.msra.mxu1 %v9611_v12 }
 0x377   : > { %8779 = vrot.lane.b32.xlu0 %v13527_v44, %s9870_s21  ;;  %v12160_v14 = vpack.c.bf16 %v3471_v29, %v3471_v29  ;;  %v3473_v13 = vpop.f32.mrb[146].mxu1  ;;  %8156 = vmatprep.subr.bf16.mxu0 %v9612_v19 }
 0x378   : > { %13526 = vst [vmem:[#allocation83_spill] sm:$0xff] %v12154_v24  ;;  %4263 = vst.msk [vmem:[%s11682_s24 + $0x60] sm:$0xf] %vm3958_vm0, %v12154_v24  ;;  %v12166_v27 = vpack.c.bf16 %v3473_v13, %v3473_v13  ;;  %v3475_v21 = vpop.f32.mrb[147].mxu1  ;;  %v13532_v13 = vpack.i.bf16 %v13463_v18, %v11517_v17  ;;  %8214 = vmatprep.subr.bf16.mxu1 %v9612_v19 }
 0x379   : > { %13528 = vst [vmem:[#allocation84_spill] sm:$0xff] %v12160_v14  ;;  %7453 = vst.msk [vmem:[%s11682_s24 + $0x160] sm:$0xf] %vm3958_vm0, %v12160_v14  ;;  %v12171_v44 = vpack.c.bf16 %v3475_v21, %v3475_v21  ;;  %v9613_v21 = vld [vmem:[#allocation5 + $0x698] ss:$36 sps:$4 sm:$0xff]  }
 0x37a   : > { %13529 = vst [vmem:[#allocation85_spill] sm:$0xff] %v12166_v27  ;;  %v8678_v29 = vpop.trf.xlu0  ;;  %4264 = vst.msk [vmem:[%s11682_s24 + $0x64] sm:$0xf] %vm3958_vm0, %v12166_v27  ;;  %v9701_v27 = vld [vmem:[%s10051_s30 + $0x168] ss:$12 sps:$4 sm:$0xff]   ;;  %8157 = vmatpush3.bf16.msra.mxu0 %v9612_v19  ;;  %8222 = vmatpush3.bf16.msra.mxu1 %v9612_v19 }
 0x37b   : > { %13530 = vst [vmem:[#allocation86_spill] sm:$0xff] %v12171_v44  ;;  %8784 = vrot.lane.b32.xlu0 %v13532_v13, %s9870_s21  ;;  %v8682_v23 = vunpack.i.h.bf16 %v8678_v29  ;;  %v8679_v24 = vunpack.i.l.bf16 %v8678_v29  ;;  %7454 = vst.msk [vmem:[%s11682_s24 + $0x164] sm:$0xf] %vm3958_vm0, %v12171_v44  ;;  %v13534_v29 = vld [vmem:[#allocation42_spill] sm:$0xff]  ;;  %8158 = vmatprep.subr.bf16.mxu0 %v9613_v21  ;;  %v12200_v44 = vpop.permute.xlu1 %8814 }
 0x37c   : > { %3661 = vmatmul.mubr.bf16.gmra.mrb[188].mxu0 %v9701_v27  ;;  %v13535_v18 = vpack.i.bf16 %v11563_v39, %v13534_v29  ;;  %13537 = vst [vmem:[#allocation89_spill] sm:$0xff] %v12200_v44  ;;  %8215 = vmatprep.subr.bf16.mxu1 %v9613_v21  ;;  %v9704_v44 = vld [vmem:[%s10051_s30 + $0x38] ss:$12 sps:$4 sm:$0xff]  }
 0x37d   : > { %v7800_v14 = vpack.c.bf16 %v8682_v23, %v8679_v24  ;;  %v3479_v40 = vpop.f32.mrb[148].mxu1  ;;  %v9702_v23 = vld [vmem:[%s10051_s30 + $0x8] ss:$12 sps:$4 sm:$0xff]  }
 0x37e   : > { %v8683_v10 = vpop.trf.xlu0  ;;  %v12186_v4 = vpack.c.bf16 %v3479_v40, %v3479_v40  ;;  %v3481_v13 = vpop.f32.mrb[149].mxu1  ;;  %8160 = vmatprep.mubr.bf16.mxu0 %v9702_v23  ;;  %v13540_v23 = vpack.i.bf16 %v11569_v51, %v11559_v33  ;;  %8159 = vmatpush3.bf16.msra.mxu0 %v9613_v21 }
 0x37f   : > { %8799 = vrot.lane.b32.xlu0 %v13535_v18, %s9870_s21  ;;  %4103 = vst [vmem:[%s12194_s6] sm:$0xff] %v7800_v14  ;;  %v8687_v12 = vunpack.i.h.bf16 %v8683_v10  ;;  %v12197_v24 = vpack.c.bf16 %v3481_v13, %v3481_v13  ;;  %v3483_v27 = vpop.f32.mrb[150].mxu1  ;;  %v8684_v40 = vunpack.i.l.bf16 %v8683_v10  ;;  %8223 = vmatpush3.bf16.msra.mxu1 %v9613_v21  ;;  %v9705_v21 = vld [vmem:[%s10051_s30 + $0x80] ss:$12 sps:$4 sm:$0xff]  }
 0x380   : > { %13533 = vst [vmem:[#allocation88_spill] sm:$0xff] %v12186_v4  ;;  %4265 = vst.msk [vmem:[%s11682_s24 + $0x68] sm:$0xf] %vm3958_vm0, %v12186_v4  ;;  %v12205_v18 = vpack.c.bf16 %v3483_v27, %v3483_v27  ;;  %v3485_v14 = vpop.f32.mrb[151].mxu1 }
 0x381   : > { %13536 = vst [vmem:[#allocation42_spill] sm:$0xff] %v12197_v24  ;;  %7455 = vst.msk [vmem:[%s11682_s24 + $0x168] sm:$0xf] %vm3958_vm0, %v12197_v24  ;;  %v12210_v13 = vpack.c.bf16 %v3485_v14, %v3485_v14  ;;  %v7801_v10 = vpack.c.bf16 %v8687_v12, %v8684_v40  ;;  %v9703_v24 = vld [vmem:[%s10051_s30 + $0x20] ss:$12 sps:$4 sm:$0xff]  }
 0x382   : > { %13538 = vst [vmem:[#allocation90_spill] sm:$0xff] %v12205_v18  ;;  %v8688_v60 = vpop.trf.xlu0  ;;  %4266 = vst.msk [vmem:[%s11682_s24 + $0x6c] sm:$0xf] %vm3958_vm0, %v12205_v18  ;;  %8169 = vmatmul.mubr.bf16.vlgmr.msra.gmra.mrb[160].mxu1 %v9705_v21 }
 0x383   : > { %13539 = vst [vmem:[#allocation91_spill] sm:$0xff] %v12210_v13  ;;  %8804 = vrot.lane.b32.xlu0 %v13540_v23, %s9870_s21  ;;  %v8692_v27 = vunpack.i.h.bf16 %v8688_v60  ;;  %v8689_v19 = vunpack.i.l.bf16 %v8688_v60  ;;  %7456 = vst.msk [vmem:[%s11682_s24 + $0x16c] sm:$0xf] %vm3958_vm0, %v12210_v13  ;;  %v12223_v12 = vpop.permute.xlu1 %8901 }
 0x384   : > { %4104 = vst [vmem:[%s12194_s6 + $0x8] sm:$0xff] %v7801_v10  ;;  %8161 = vmatmul.mubr.bf16.vlgmr.msra.gmra.mrb[192].mxu0 %v9703_v24 }
 0x385   : > { %v7802_v40 = vpack.c.bf16 %v8692_v27, %v8689_v19  ;;  %v3489_v14 = vpop.f32.mrb[152].mxu1  ;;  %8164 = vmatprep.mubr.bf16.mxu0 %v9704_v44 }
 0x386   : > { %v8693_v18 = vpop.trf.xlu0  ;;  %v12226_v23 = vpack.c.bf16 %v3489_v14, %v3489_v14  ;;  %v3491_v4 = vpop.f32.mrb[153].mxu1  ;;  %v9706_v14 = vld [vmem:[%s10051_s30 + $0x98] ss:$12 sps:$4 sm:$0xff]  }
 0x387   : > { %4105 = vst [vmem:[%s12194_s6 + $0x10] sm:$0xff] %v7802_v40  ;;  %v8697_v60 = vunpack.i.h.bf16 %v8693_v18  ;;  %v12230_v10 = vpack.c.bf16 %v3491_v4, %v3491_v4  ;;  %v3493_v13 = vpop.f32.mrb[154].mxu1  ;;  %v8694_v27 = vunpack.i.l.bf16 %v8693_v18  ;;  %v12238_v40 = vpop.permute.xlu1 %8906  ;;  %8172 = vmatprep.mubr.bf16.mxu1 %v9706_v14  ;;  %v13544_v14 = vpack.i.bf16 %v13534_v29, %v13503_v37 }
 0x388   : > { %13541 = vst [vmem:[#allocation92_spill] sm:$0xff] %v12226_v23  ;;  %4267 = vst.msk [vmem:[%s11682_s24 + $0x70] sm:$0xf] %vm3958_vm0, %v12226_v23  ;;  %v12236_v24 = vpack.c.bf16 %v3493_v13, %v3493_v13  ;;  %v3495_v19 = vpop.f32.mrb[155].mxu1  ;;  %v9707_v23 = vld [vmem:[%s10051_s30 + $0x50] ss:$12 sps:$4 sm:$0xff]  }
 0x389   : > { %13542 = vst [vmem:[#allocation93_spill] sm:$0xff] %v12230_v10  ;;  %7457 = vst.msk [vmem:[%s11682_s24 + $0x170] sm:$0xf] %vm3958_vm0, %v12230_v10  ;;  %v12244_v4 = vpack.c.bf16 %v3495_v19, %v3495_v19  ;;  %v7803_v44 = vpack.c.bf16 %v8697_v60, %v8694_v27 }
 0x38a   : > { %v8698_v18 = vpop.trf.xlu0  ;;  %4268 = vst.msk [vmem:[%s11682_s24 + $0x74] sm:$0xf] %vm3958_vm0, %v12236_v24  ;;  %8951 = vxpose.xlu1.b32.start [1/16] (narrow) %v13544_v14, 64 }
 0x38b   : > { %13543 = vst [vmem:[#allocation94_spill] sm:$0xff] %v12244_v4  ;;  %v8702_v13 = vunpack.i.h.bf16 %v8698_v18  ;;  %v8699_v21 = vunpack.i.l.bf16 %v8698_v18  ;;  %7458 = vst.msk [vmem:[%s11682_s24 + $0x174] sm:$0xf] %vm3958_vm0, %v12244_v4  ;;  %v4650_v10 = vpop.permute.xlu1 %4649 }
 0x38c   : > { %4106 = vst [vmem:[%s12194_s6 + $0x18] sm:$0xff] %v7803_v44  ;;  %7285 = vst.msk [vmem:[%s11682_s24 + $0x80] sm:$0xf] %vm3958_vm0, %v4650_v10  ;;  %8165 = vmatmul.mubr.bf16.gmra.mrb[196].mxu0 %v9707_v23 }
 0x38d   : > { %v7804_v19 = vpack.c.bf16 %v8702_v13, %v8699_v21  ;;  %v3499_v60 = vpop.f32.mrb[156].mxu1  ;;  %v13545_v13 = vpack.i.bf16 %v11563_v39, %v11381_v26  ;;  %v9708_v21 = vld [vmem:[%s10051_s30 + $0xb0] ss:$12 sps:$4 sm:$0xff]  }
 0x38e   : > { %v8703_v27 = vpop.trf.xlu0  ;;  %v12259_v18 = vpack.c.bf16 %v3499_v60, %v3499_v60  ;;  %v3501_v4 = vpop.f32.mrb[157].mxu1  ;;  %8173 = vmatmul.mubr.bf16.gmra.mrb[164].mxu1 %v9708_v21 }
 0x38f   : > { %4107 = vst [vmem:[%s12194_s6 + $0x20] sm:$0xff] %v7804_v19  ;;  %v8707_v37 = vunpack.i.h.bf16 %v8703_v27  ;;  %v12262_v29 = vpack.c.bf16 %v3501_v4, %v3501_v4  ;;  %v3503_v44 = vpop.f32.mrb[158].mxu1  ;;  %8953 = vxpose.xlu1.b32.cont [2/16] (narrow) %v13545_v13, 64  ;;  %v8704_v10 = vunpack.i.l.bf16 %v8703_v27  ;;  %v5600_v19 = vpop.permute.xlu1 %5599  ;;  %v9709_v4 = vld [vmem:[%s10051_s30 + $0xc8] ss:$12 sps:$4 sm:$0xff]   ;;  %v13546_v13 = vpack.i.bf16 %v11583_v54, %v11397_v53 }
 0x390   : > { %4269 = vst.msk [vmem:[%s11682_s24 + $0x78] sm:$0xf] %vm3958_vm0, %v12259_v18  ;;  %v12271_v23 = vpack.c.bf16 %v3503_v44, %v3503_v44  ;;  %v3505_v14 = vpop.f32.mrb[159].mxu1  ;;  %8176 = vmatprep.mubr.bf16.mxu1 %v9709_v4  ;;  %7509 = vst.msk [vmem:[%s11682_s24 + $0x180] sm:$0xf] %vm3958_vm0, %v5600_v19  ;;  %v13547_v4 = vpack.i.bf16 %v11593_v3, %v11405_v42 }
 0x391   : > { %7459 = vst.msk [vmem:[%s11682_s24 + $0x178] sm:$0xf] %vm3958_vm0, %v12262_v29  ;;  %v12277_v26 = vpack.c.bf16 %v3505_v14, %v3505_v14  ;;  %v7805_v39 = vpack.c.bf16 %v8707_v37, %v8704_v10 }
 0x392   : > { %v8708_v60 = vpop.trf.xlu0  ;;  %4270 = vst.msk [vmem:[%s11682_s24 + $0x7c] sm:$0xf] %vm3958_vm0, %v12271_v23 }
 0x393   : > { %v8712_v27 = vunpack.i.h.bf16 %v8708_v60  ;;  %v8709_v44 = vunpack.i.l.bf16 %v8708_v60  ;;  %7460 = vst.msk [vmem:[%s11682_s24 + $0x17c] sm:$0xf] %vm3958_vm0, %v12277_v26  ;;  %8955 = vxpose.xlu1.b32.cont [3/16] (narrow) %v13546_v13, 64  ;;  %4108 = vst [vmem:[%s12194_s6 + $0x28] sm:$0xff] %v7805_v39  ;;  %v4652_v21 = vpop.permute.xlu1 %4651  ;;  %v9710_v60 = vld [vmem:[%s10051_s30 + $0xe0] ss:$12 sps:$4 sm:$0xff]  }
 0x394   : > { %7286 = vst.msk [vmem:[%s11682_s24 + $0x84] sm:$0xf] %vm3958_vm0, %v4652_v21  ;;  %v9711_v39 = vld [vmem:[%s10051_s30 + $0xf8] ss:$12 sps:$4 sm:$0xff]   ;;  %v8610_v21 = vunpack.i.h.bf16 %v11638_v55 }
 0x395   : > { %v7806_v37 = vpack.c.bf16 %v8712_v27, %v8709_v44  ;;  %v8609_v27 = vunpack.i.l.bf16 %v11638_v55  ;;  %v13548_v44 = vpack.i.bf16 %v11617_v52, %v11420_v16  ;;  %v13549_v13 = vld [vmem:[#allocation18_spill] sm:$0xff]  ;;  %v13551_v55 = vpack.i.bf16 %v11647_v50, %v11441_v34 }
 0x396   : > { %v8713_v10 = vpop.trf.xlu0  ;;  %8177 = vmatmul.mubr.bf16.gmra.mrb[168].mxu1 %v9710_v60  ;;  %v8569_v42 = vunpack.i.l.bf16 %v13549_v13  ;;  %v8570_v16 = vunpack.i.h.bf16 %v13549_v13  ;;  %v8619_v34 = vunpack.i.l.bf16 %v11729_v31  ;;  %v13554_v50 = vpack.i.bf16 %v11690_v46, %v11470_v63  ;;  %v13555_v13 = vld [vmem:[#allocation22_spill] sm:$0xff] }
 0x397   : > { %4109 = vst [vmem:[%s12194_s6 + $0x30] sm:$0xff] %v7806_v37  ;;  %v8717_v14 = vunpack.i.h.bf16 %v8713_v10  ;;  %v8714_v19 = vunpack.i.l.bf16 %v8713_v10  ;;  %8957 = vxpose.xlu1.b32.cont [4/16] (narrow) %v13547_v4, 64  ;;  %v5602_v53 = vpop.permute.xlu1 %5601  ;;  %8180 = vmatprep.mubr.bf16.mxu1 %v9711_v39  ;;  %v13550_v10 = vpack.i.bf16 %v11627_v62, %v11427_v28  ;;  %v9713_v4 = vld [vmem:[%s10051_s30 + $0x128] ss:$12 sps:$4 sm:$0xff]   ;;  %v13552_v28 = vpack.i.bf16 %v11659_v30, %v11451_v2  ;;  %v13553_v39 = vld [vmem:[#allocation30_spill] sm:$0xff] }
 0x398   : > { %7510 = vst.msk [vmem:[%s11682_s24 + $0x184] sm:$0xf] %vm3958_vm0, %v5602_v53  ;;  %v8818_v37 = vpack.i.bf16 %v8609_v27, %v8569_v42  ;;  %v8820_v60 = vpack.i.bf16 %v8610_v21, %v8570_v16  ;;  %v8579_v42 = vunpack.i.l.bf16 %v13555_v13  ;;  %v13556_v2 = vld [vmem:[#allocation29_spill] sm:$0xff]  ;;  %v8580_v63 = vunpack.i.h.bf16 %v13555_v13 }
 0x399   : > { %v7807_v54 = vpack.c.bf16 %v8717_v14, %v8714_v19  ;;  %v9712_v14 = vld [vmem:[%s10051_s30 + $0x110] ss:$12 sps:$4 sm:$0xff]  }
 0x39a   : > { %v8826_v21 = vpack.i.bf16 %v8619_v34, %v8579_v42  ;;  %v13565_v42 = vld [vmem:[#allocation37_spill] sm:$0xff] }
 0x39b   : > { %4110 = vst [vmem:[%s12194_s6 + $0x38] sm:$0xff] %v7807_v54  ;;  %8959 = vxpose.xlu1.b32.cont [5/16] (narrow) %v13548_v44, 64  ;;  %v4654_v3 = vpop.permute.xlu1 %4653  ;;  %v9714_v54 = vld [vmem:[%s10051_s30 + $0x140] ss:$12 sps:$4 sm:$0xff]   ;;  %v9715_v44 = vld [vmem:[%s10051_s30 + $0x158] ss:$12 sps:$4 sm:$0xff]  }
 0x39c   : > { %7287 = vst.msk [vmem:[%s11682_s24 + $0x88] sm:$0xf] %vm3958_vm0, %v4654_v3  ;;  %v8620_v3 = vunpack.i.h.bf16 %v11729_v31 }
 0x39e   : > { %8181 = vmatmul.mubr.bf16.gmra.mrb[172].mxu1 %v9712_v14  ;;  %v8828_v16 = vpack.i.bf16 %v8620_v3, %v8580_v63 }
 0x39f   : > { %8961 = vxpose.xlu1.b32.cont [6/16] (narrow) %v13550_v10, 64  ;;  %v12315_v19 = vpop.permute.xlu1 %8921  ;;  %8184 = vmatprep.mubr.bf16.mxu1 %v9713_v4  ;;  %v9716_v10 = vld [vmem:[%s10051_s30 + $0x170] ss:$12 sps:$4 sm:$0xff]   ;;  %v13558_v4 = vpack.i.bf16 %v11732_v6, %v11493_v7  ;;  %v13561_v7 = vpack.i.bf16 %v11785_v15, %v11514_v9  ;;  %s13121_s30 = scalar_lea.hbm %s13245_s3, %s8484_s28 }
 0x3a0   : > { %v13562_v6 = vld [vmem:[#allocation33_spill] sm:$0xff] }
 0x3a1   : > { %8819 = vxpose.xlu0.b32.start [1/16] (narrow) %v8818_v37, 64  ;;  %v13557_v37 = vpack.i.bf16 %v11702_v43, %v11481_v1  ;;  %v13559_v1 = vpack.i.bf16 %v11746_v47, %v11499_v36  ;;  %v8630_v36 = vunpack.i.h.bf16 %v11872_v48  ;;  %v8590_v34 = vunpack.i.h.bf16 %v13562_v6 }
 0x3a3   : > { %8963 = vxpose.xlu1.b32.cont [7/16] (narrow) %v13551_v55, 64  ;;  %v5604_v53 = vpop.permute.xlu1 %5603  ;;  %v8836_v13 = vpack.i.bf16 %v8630_v36, %v8590_v34 }
 0x3a4   : > { %7511 = vst.msk [vmem:[%s11682_s24 + $0x188] sm:$0xf] %vm3958_vm0, %v5604_v53  ;;  %v8629_v53 = vunpack.i.l.bf16 %v11872_v48 }
 0x3a5   : > { %8821 = vxpose.xlu0.b32.cont [2/16] (narrow) %v8820_v60, 64  ;;  %v13560_v60 = vld [vmem:[#allocation35_spill] sm:$0xff] }
 0x3a6   : > { %8185 = vmatmul.mubr.bf16.gmra.mrb[176].mxu1 %v9714_v54  ;;  %v13563_v54 = vld [vmem:[#allocation34_spill] sm:$0xff] }
 0x3a7   : > { %8965 = vxpose.xlu1.b32.cont [8/16] (narrow) %v13552_v28, 64  ;;  %v12328_v27 = vpop.permute.xlu1 %8926  ;;  %8188 = vmatprep.mubr.bf16.mxu1 %v9715_v44  ;;  %v8589_v28 = vunpack.i.l.bf16 %v13562_v6  ;;  %v13564_v44 = vpack.i.bf16 %v11800_v61, %v11523_v49  ;;  %v8635_v49 = vunpack.i.h.bf16 %v11971_v0 }
 0x3a9   : > { %8823 = vxpose.xlu0.b32.cont [3/16] (narrow) %v13553_v39, 64  ;;  %v8834_v47 = vpack.i.bf16 %v8629_v53, %v8589_v28  ;;  %v13571_v28 = vld [vmem:[#allocation28_spill] sm:$0xff] }
 0x3ab   : > { %8967 = vxpose.xlu1.b32.cont [9/16] (narrow) %v13554_v50, 64  ;;  %v4656_v30 = vpop.permute.xlu1 %4655  ;;  %v8634_v50 = vunpack.i.l.bf16 %v11971_v0  ;;  %v8640_v0 = vunpack.i.h.bf16 %v11941_v20 }
 0x3ac   : > { %7288 = vst.msk [vmem:[%s11682_s24 + $0x8c] sm:$0xf] %vm3958_vm0, %v4656_v30  ;;  %v13567_v30 = vld [vmem:[#allocation25_spill] sm:$0xff] }
 0x3ad   : > { %8825 = vxpose.xlu0.b32.cont [4/16] (narrow) %v13556_v2, 64  ;;  %v13566_v2 = vpack.i.bf16 %v11839_v57, %v13565_v42  ;;  %v8594_v48 = vunpack.i.l.bf16 %v13567_v30  ;;  %v8595_v63 = vunpack.i.h.bf16 %v13567_v30 }
 0x3ae   : > { %8189 = vmatmul.mubr.bf16.gmra.mrb[180].mxu1 %v9716_v10 }
 0x3af   : > { %8969 = vxpose.xlu1.b32.cont [10/16] (narrow) %v13557_v37, 64  ;;  %v5606_v14 = vpop.permute.xlu1 %5605  ;;  %v13568_v37 = vld [vmem:[#allocation39_spill] sm:$0xff]  ;;  %v8840_v57 = vpack.i.bf16 %v8635_v49, %v8595_v63 }
 0x3b0   : > { %7512 = vst.msk [vmem:[%s11682_s24 + $0x18c] sm:$0xf] %vm3958_vm0, %v5606_v14  ;;  %v13569_v10 = vpack.i.bf16 %v11854_v35, %v13568_v37 }
 0x3b1   : > { %8827 = vxpose.xlu0.b32.cont [5/16] (narrow) %v8826_v21, 64  ;;  %v8838_v21 = vpack.i.bf16 %v8634_v50, %v8594_v48 }
 0x3b3   : > { %8971 = vxpose.xlu1.b32.cont [11/16] (narrow) %v13558_v4, 64  ;;  %v4658_v31 = vpop.permute.xlu1 %4657  ;;  %v13570_v4 = vld [vmem:[#allocation41_spill] sm:$0xff] }
 0x3b4   : > { %7289 = vst.msk [vmem:[%s11682_s24 + $0x90] sm:$0xf] %vm3958_vm0, %v4658_v31  ;;  %v8599_v31 = vunpack.i.l.bf16 %v13570_v4  ;;  %v8600_v35 = vunpack.i.h.bf16 %v13570_v4 }
 0x3b5   : > { %8829 = vxpose.xlu0.b32.cont [6/16] (narrow) %v8828_v16, 64  ;;  %v8639_v16 = vunpack.i.l.bf16 %v11941_v20  ;;  %v8645_v20 = vunpack.i.h.bf16 %v11984_v32 }
 0x3b6   : > { %v8844_v6 = vpack.i.bf16 %v8640_v0, %v8600_v35  ;;  %v13577_v35 = vpack.i.bf16 %v11559_v33, %v13510_v59 }
 0x3b7   : > { %8973 = vxpose.xlu1.b32.cont [12/16] (narrow) %v13559_v1, 64  ;;  %v5608_v55 = vpop.permute.xlu1 %5607 }
 0x3b8   : > { %7513 = vst.msk [vmem:[%s11682_s24 + $0x190] sm:$0xf] %vm3958_vm0, %v5608_v55 }
 0x3b9   : > { %8831 = vxpose.xlu0.b32.cont [7/16] (narrow) %v13560_v60, 64  ;;  %v8842_v60 = vpack.i.bf16 %v8639_v16, %v8599_v31  ;;  %v13574_v16 = vld [vmem:[#allocation45_spill] sm:$0xff] }
 0x3bb   : > { %8975 = vxpose.xlu1.b32.cont [13/16] (narrow) %v13561_v7, 64  ;;  %v4660_v39 = vpop.permute.xlu1 %4659  ;;  %v8644_v7 = vunpack.i.l.bf16 %v11984_v32 }
 0x3bc   : > { %7290 = vst.msk [vmem:[%s11682_s24 + $0x94] sm:$0xf] %vm3958_vm0, %v4660_v39 }
 0x3bd   : > { %8833 = vxpose.xlu0.b32.cont [8/16] (narrow) %v13563_v54, 64  ;;  %v8604_v54 = vunpack.i.l.bf16 %v13571_v28 }
 0x3bf   : > { %8977 = vxpose.xlu1.b32.cont [14/16] (narrow) %v13564_v44, 64  ;;  %v5610_v9 = vpop.permute.xlu1 %5609  ;;  %v8605_v44 = vunpack.i.h.bf16 %v13571_v28  ;;  %v13578_v28 = vld [vmem:[#allocation50_spill] sm:$0xff] }
 0x3c0   : > { %7514 = vst.msk [vmem:[%s11682_s24 + $0x194] sm:$0xf] %vm3958_vm0, %v5610_v9 }
 0x3c1   : > { %8835 = vxpose.xlu0.b32.cont [9/16] (narrow) %v8834_v47, 64  ;;  %v8846_v47 = vpack.i.bf16 %v8644_v7, %v8604_v54  ;;  %v8848_v9 = vpack.i.bf16 %v8645_v20, %v8605_v44  ;;  %v13579_v54 = vld [vmem:[#allocation49_spill] sm:$0xff]  ;;  %v13583_v44 = vld [vmem:[#allocation43_spill] sm:$0xff] }
 0x3c3   : > { %8979 = vxpose.xlu1.b32.cont [15/16] (narrow) %v13566_v2, 64  ;;  %v4662_v3 = vpop.permute.xlu1 %4661 }
 0x3c4   : > { %7291 = vst.msk [vmem:[%s11682_s24 + $0x98] sm:$0xf] %vm3958_vm0, %v4662_v3 }
 0x3c5   : > { %8837 = vxpose.xlu0.b32.cont [10/16] (narrow) %v8836_v13, 64 }
 0x3c7   : > { %8981 = vxpose.xlu1.b32.end [16/16] (narrow) %v13569_v10, 64  ;;  %v12385_v14 = vpop.permute.xlu1 %8941 }
 0x3c9   : > { %8839 = vxpose.xlu0.b32.cont [11/16] (narrow) %v8838_v21, 64 }
 0x3cb   : > { %v5612_v1 = vpop.permute.xlu1 %5611 }
 0x3cc   : > { %7515 = vst.msk [vmem:[%s11682_s24 + $0x198] sm:$0xf] %vm3958_vm0, %v5612_v1 }
 0x3cd   : > { %8841 = vxpose.xlu0.b32.cont [12/16] (narrow) %v8840_v57, 64  ;;  %v13573_v57 = vld [vmem:[#allocation46_spill] sm:$0xff] }
 0x3ce   : > { %v13575_v4 = vpack.i.bf16 %v13573_v57, %v13574_v16 }
 0x3cf   : > { %v12395_v53 = vpop.permute.xlu1 %8946 }
 0x3d1   : > { %v12393_v55 = vpop.permute.xlu0 %8719  ;;  %8843 = vxpose.xlu0.b32.cont [13/16] (narrow) %v8842_v60, 64  ;;  %v13576_v60 = vpack.i.bf16 %v11702_v43, %v11690_v46 }
 0x3d3   : > { %v4664_v36 = vpop.permute.xlu1 %4663 }
 0x3d4   : > { %7292 = vst.msk [vmem:[%s11682_s24 + $0x9c] sm:$0xf] %vm3958_vm0, %v4664_v36  ;;  %v13581_v36 = vpack.i.bf16 %v11569_v51, %v11385_v58 }
 0x3d5   : > { %v8725_v39 = vpop.permute.xlu0 %8724  ;;  %8845 = vxpose.xlu0.b32.cont [14/16] (narrow) %v8844_v6, 64  ;;  %v8024_v20 = vpop.f32.mrb[128].mxu0 }
 0x3d6   : > { %v8727_v3 = vunpack.i.h.bf16 %v8725_v39  ;;  %v8726_v49 = vunpack.i.l.bf16 %v8725_v39  ;;  %v13580_v39 = vpack.i.bf16 %v13578_v28, %v13579_v54 }
 0x3d9   : > { %v12403_v34 = vpop.permute.xlu0 %8739  ;;  %8847 = vxpose.xlu0.b32.cont [15/16] (narrow) %v8846_v47, 64  ;;  %v13582_v47 = vpack.i.bf16 %v11800_v61, %v11785_v15  ;;  %v13589_v61 = vld [vmem:[#allocation44_spill] sm:$0xff] }
 0x3dd   : > { %v12405_v50 = vpop.permute.xlu0 %8744  ;;  %8849 = vxpose.xlu0.b32.end [16/16] (narrow) %v8848_v9, 64  ;;  %v13584_v9 = vld [vmem:[#allocation23_spill] sm:$0xff] }
 0x3e1   : > { %v12407_v13 = vpop.permute.xlu0 %8759 }
 0x3e5   : > { %v12409_v42 = vpop.permute.xlu0 %8764  ;;  %5613 = vrot.lane.b32.xlu1 %v11867_v5, %s9870_s21  ;;  %v13572_v5 = vpack.i.bf16 %v11627_v62, %v11617_v52 }
 0x3e9   : > { %v12413_v2 = vpop.permute.xlu0 %8779 }
 0x3ed   : > { %v12415_v32 = vpop.permute.xlu0 %8784 }
 0x3f1   : > { %v12417_v30 = vpop.permute.xlu0 %8799 }
 0x3f5   : > { %v8805_v48 = vpop.permute.xlu0 %8804 }
 0x3f6   : > { %v8807_v21 = vunpack.i.h.bf16 %v8805_v48  ;;  %v8806_v37 = vunpack.i.l.bf16 %v8805_v48  ;;  %v13585_v48 = vpack.i.bf16 %v13583_v44, %v13584_v9 }
 0x3f8   : > { %v12419_v10 = vpack.i.bf16 %v8807_v21, %v8727_v3  ;;  %v12421_v63 = vpack.i.bf16 %v8806_v37, %v8726_v49  ;;  %v8025_v21 = vpop.f32.mrb[129].mxu0  ;;  %v13586_v37 = vld [vmem:[#allocation52_spill] sm:$0xff] }
 0x3f9   : > { %v8027_v15 = vpop.f32.mrb[130].mxu0 }
 0x406   : > { %8891 = vrot.lane.b32.xlu0 %v13572_v5, %s9870_s21  ;;  %v13587_v5 = vld [vmem:[#allocation51_spill] sm:$0xff] }
 0x40a   : > { %8896 = vrot.lane.b32.xlu0 %v13575_v4, %s9870_s21  ;;  %v13588_v4 = vpack.i.bf16 %v13586_v37, %v13587_v5 }
 0x40b   : > { %v8982_v31 = vpop.trf.xlu1 }
 0x40c   : > { %v8986_v1 = vunpack.i.h.bf16 %v8982_v31  ;;  %v8983_v0 = vunpack.i.l.bf16 %v8982_v31  ;;  %v12459_v31 = vadd.f32 %v8025_v21, %v8024_v20 }
 0x40e   : > { %8911 = vrot.lane.b32.xlu0 %v13576_v60, %s9870_s21  ;;  %9023 = vxpose.xlu1.b32.start [1/16] (narrow) %v13577_v35, 64  ;;  %v7880_v52 = vpack.c.bf16 %v8986_v1, %v8983_v0  ;;  %v13590_v1 = vld [vmem:[#allocation24_spill] sm:$0xff]  ;;  %v8028_v35 = vpop.f32.mrb[131].mxu0 }
 0x40f   : > { %v8987_v62 = vpop.trf.xlu1  ;;  %v13591_v0 = vpack.i.bf16 %v13589_v61, %v13590_v1 }
 0x410   : > { %7389 = vst [vmem:[%s12194_s6 + $0x80] sm:$0xff] %v7880_v52  ;;  %v8991_v7 = vunpack.i.h.bf16 %v8987_v62  ;;  %v8988_v6 = vunpack.i.l.bf16 %v8987_v62  ;;  %v12464_v62 = vadd.f32 %v8028_v35, %v8027_v15 }
 0x412   : > { %8916 = vrot.lane.b32.xlu0 %v13580_v39, %s9870_s21  ;;  %9025 = vxpose.xlu1.b32.cont [2/16] (narrow) %v13581_v36, 64  ;;  %v7881_v46 = vpack.c.bf16 %v8991_v7, %v8988_v6  ;;  %v8030_v7 = vpop.f32.mrb[132].mxu0 }
 0x413   : > { %v8992_v43 = vpop.trf.xlu1  ;;  %v8031_v36 = vpop.f32.mrb[133].mxu0 }
 0x414   : > { %7390 = vst [vmem:[%s12194_s6 + $0x88] sm:$0xff] %v7881_v46  ;;  %v8996_v33 = vunpack.i.h.bf16 %v8992_v43  ;;  %v8993_v59 = vunpack.i.l.bf16 %v8992_v43  ;;  %v12469_v46 = vadd.f32 %v8031_v36, %v8030_v7  ;;  %v8033_v43 = vpop.f32.mrb[134].mxu0  ;;  %v13595_v36 = vld [vmem:[#allocation26_spill] sm:$0xff] }
 0x415   : > { %v8034_v20 = vpop.f32.mrb[135].mxu0 }
 0x416   : > { %8931 = vrot.lane.b32.xlu0 %v13582_v47, %s9870_s21  ;;  %9027 = vxpose.xlu1.b32.cont [3/16] (narrow) %v13585_v48, 64  ;;  %v7882_v3 = vpack.c.bf16 %v8996_v33, %v8993_v59  ;;  %v13592_v33 = vpack.i.bf16 %v13574_v16, %v11423_v56  ;;  %v12474_v44 = vadd.f32 %v8034_v20, %v8033_v43  ;;  %v8036_v9 = vpop.f32.mrb[136].mxu0 }
 0x417   : > { %v8997_v49 = vpop.trf.xlu1  ;;  %v13593_v16 = vpack.i.bf16 %v13573_v57, %v11431_v25 }
 0x418   : > { %7391 = vst [vmem:[%s12194_s6 + $0x90] sm:$0xff] %v7882_v3  ;;  %v9001_v58 = vunpack.i.h.bf16 %v8997_v49  ;;  %v8998_v51 = vunpack.i.l.bf16 %v8997_v49 }
 0x41a   : > { %8936 = vrot.lane.b32.xlu0 %v13588_v4, %s9870_s21  ;;  %9029 = vxpose.xlu1.b32.cont [4/16] (narrow) %v13591_v0, 64  ;;  %v7883_v60 = vpack.c.bf16 %v9001_v58, %v8998_v51  ;;  %v8037_v58 = vpop.f32.mrb[137].mxu0 }
 0x41b   : > { %v9002_v52 = vpop.trf.xlu1  ;;  %v8039_v56 = vpop.f32.mrb[138].mxu0  ;;  %v12482_v4 = vadd.f32 %v8037_v58, %v8036_v9 }
 0x41c   : > { %7392 = vst [vmem:[%s12194_s6 + $0x98] sm:$0xff] %v7883_v60  ;;  %v9006_v6 = vunpack.i.h.bf16 %v9002_v52  ;;  %v9003_v39 = vunpack.i.l.bf16 %v9002_v52  ;;  %v8040_v15 = vpop.f32.mrb[139].mxu0 }
 0x41d   : > { %v12484_v0 = vadd.f32 %v8040_v15, %v8039_v56  ;;  %v8042_v60 = vpop.f32.mrb[140].mxu0  ;;  %v13597_v15 = vld [vmem:[#allocation48_spill] sm:$0xff] }
 0x41e   : > { %4693 = vrot.lane.b32.xlu0 %v12120_v22, %s9870_s21  ;;  %9031 = vxpose.xlu1.b32.cont [5/16] (narrow) %v13592_v33, 64  ;;  %v7884_v59 = vpack.c.bf16 %v9006_v6, %v9003_v39  ;;  %v8043_v7 = vpop.f32.mrb[141].mxu0  ;;  %v13594_v39 = vld [vmem:[#allocation47_spill] sm:$0xff] }
 0x41f   : > { %v9007_v47 = vpop.trf.xlu1  ;;  %v8045_v57 = vpop.f32.mrb[142].mxu0  ;;  %v13596_v43 = vpack.i.bf16 %v13594_v39, %v13595_v36 }
 0x420   : > { %7393 = vst [vmem:[%s12194_s6 + $0xa0] sm:$0xff] %v7884_v59  ;;  %v9011_v48 = vunpack.i.h.bf16 %v9007_v47  ;;  %v9008_v3 = vunpack.i.l.bf16 %v9007_v47  ;;  %v12491_v59 = vadd.f32 %v8043_v7, %v8042_v60  ;;  %v8046_v20 = vpop.f32.mrb[143].mxu0 }
 0x421   : > { %v8850_v49 = vpop.trf.xlu0 }
 0x422   : > { %5643 = vrot.lane.b32.xlu0 %v12127_v8, %s9870_s21  ;;  %v8854_v22 = vunpack.i.h.bf16 %v8850_v49  ;;  %v8851_v51 = vunpack.i.l.bf16 %v8850_v49  ;;  %9033 = vxpose.xlu1.b32.cont [6/16] (narrow) %v13593_v16, 64  ;;  %v7885_v21 = vpack.c.bf16 %v9011_v48, %v9008_v3  ;;  %v12493_v48 = vadd.f32 %v8046_v20, %v8045_v57  ;;  %v8048_v3 = vpop.f32.mrb[144].mxu0 }
 0x423   : > { %v9012_v61 = vpop.trf.xlu1 }
 0x424   : > { %v7840_v1 = vpack.c.bf16 %v8854_v22, %v8851_v51  ;;  %7394 = vst [vmem:[%s12194_s6 + $0xa8] sm:$0xff] %v7885_v21  ;;  %v9016_v35 = vunpack.i.h.bf16 %v9012_v61  ;;  %v9013_v8 = vunpack.i.l.bf16 %v9012_v61  ;;  %v8049_v51 = vpop.f32.mrb[145].mxu0  ;;  %v13598_v61 = vld [vmem:[#allocation27_spill] sm:$0xff] }
 0x425   : > { %v8855_v52 = vpop.trf.xlu0  ;;  %v8051_v21 = vpop.f32.mrb[146].mxu0 }
 0x426   : > { %7277 = vst [vmem:[%s12194_s6 + $0x40] sm:$0xff] %v7840_v1  ;;  %v8859_v6 = vunpack.i.h.bf16 %v8855_v52  ;;  %v8856_v25 = vunpack.i.l.bf16 %v8855_v52  ;;  %9035 = vxpose.xlu1.b32.cont [7/16] (narrow) %v13596_v43, 64  ;;  %v7886_v33 = vpack.c.bf16 %v9016_v35, %v9013_v8  ;;  %v13599_v1 = vpack.i.bf16 %v13597_v15, %v13598_v61  ;;  %v8052_v8 = vpop.f32.mrb[147].mxu0 }
 0x427   : > { %v9017_v47 = vpop.trf.xlu1  ;;  %v12500_v35 = vadd.f32 %v8049_v51, %v8048_v3  ;;  %v12502_v7 = vadd.f32 %v8052_v8, %v8051_v21  ;;  %v13601_v21 = vpack.i.bf16 %v13578_v28, %v11485_v41 }
 0x428   : > { %v7841_v9 = vpack.c.bf16 %v8859_v6, %v8856_v25  ;;  %7395 = vst [vmem:[%s12194_s6 + $0xb0] sm:$0xff] %v7886_v33  ;;  %v9021_v49 = vunpack.i.h.bf16 %v9017_v47  ;;  %v9018_v58 = vunpack.i.l.bf16 %v9017_v47  ;;  %v8054_v6 = vpop.f32.mrb[148].mxu0  ;;  %v13600_v33 = vpack.i.bf16 %v13579_v54, %v11473_v45 }
 0x429   : > { %v8860_v22 = vpop.trf.xlu0  ;;  %v8055_v57 = vpop.f32.mrb[149].mxu0 }
 0x42a   : > { %7278 = vst [vmem:[%s12194_s6 + $0x48] sm:$0xff] %v7841_v9  ;;  %v8864_v56 = vunpack.i.h.bf16 %v8860_v22  ;;  %v8861_v16 = vunpack.i.l.bf16 %v8860_v22  ;;  %9037 = vxpose.xlu1.b32.cont [8/16] (narrow) %v13599_v1, 64  ;;  %v7887_v60 = vpack.c.bf16 %v9021_v49, %v9018_v58  ;;  %v8057_v43 = vpop.f32.mrb[150].mxu0  ;;  %v12509_v20 = vadd.f32 %v8055_v57, %v8054_v6  ;;  %v13602_v57 = vld [vmem:[#allocation31_spill] sm:$0xff] }
 0x42b   : > { %v8058_v47 = vpop.f32.mrb[151].mxu0 }
 0x42c   : > { %v7842_v52 = vpack.c.bf16 %v8864_v56, %v8861_v16  ;;  %7396 = vst [vmem:[%s12194_s6 + $0xb8] sm:$0xff] %v7887_v60  ;;  %v12511_v3 = vadd.f32 %v8058_v47, %v8057_v43  ;;  %v8060_v49 = vpop.f32.mrb[152].mxu0  ;;  %v8801_v47 = vunpack.i.l.bf16 %v12417_v30 }
 0x42d   : > { %v8865_v25 = vpop.trf.xlu0  ;;  %v8061_v22 = vpop.f32.mrb[153].mxu0 }
 0x42e   : > { %7279 = vst [vmem:[%s12194_s6 + $0x50] sm:$0xff] %v7842_v52  ;;  %v8869_v39 = vunpack.i.h.bf16 %v8865_v25  ;;  %v8866_v36 = vunpack.i.l.bf16 %v8865_v25  ;;  %9039 = vxpose.xlu1.b32.cont [9/16] (narrow) %v13600_v33, 64  ;;  %v8063_v16 = vpop.f32.mrb[154].mxu0  ;;  %v12517_v45 = vadd.f32 %v8061_v22, %v8060_v49 }
 0x42f   : > { %v8064_v54 = vpop.f32.mrb[155].mxu0 }
 0x430   : > { %v7843_v9 = vpack.c.bf16 %v8869_v39, %v8866_v36  ;;  %v12519_v61 = vadd.f32 %v8064_v54, %v8063_v16  ;;  %v8066_v1 = vpop.f32.mrb[156].mxu0  ;;  %v13603_v39 = vpack.i.bf16 %v11740_v11, %v13602_v57  ;;  %v13604_v11 = vld [vmem:[#allocation32_spill] sm:$0xff] }
 0x431   : > { %v8870_v58 = vpop.trf.xlu0  ;;  %v8067_v8 = vpop.f32.mrb[157].mxu0  ;;  %v13605_v16 = vpack.i.bf16 %v11757_v38, %v13604_v11  ;;  %v13606_v38 = vpack.i.bf16 %v13587_v5, %v11517_v17  ;;  %v13608_v17 = vld [vmem:[#allocation36_spill] sm:$0xff] }
 0x432   : > { %7280 = vst [vmem:[%s12194_s6 + $0x58] sm:$0xff] %v7843_v9  ;;  %v8874_v51 = vunpack.i.h.bf16 %v8870_v58  ;;  %v8871_v56 = vunpack.i.l.bf16 %v8870_v58  ;;  %9041 = vxpose.xlu1.b32.cont [10/16] (narrow) %v13601_v21, 64  ;;  %v8069_v25 = vpop.f32.mrb[158].mxu0  ;;  %v12525_v41 = vadd.f32 %v8067_v8, %v8066_v1  ;;  %v8802_v8 = vunpack.i.h.bf16 %v12417_v30 }
 0x433   : > { %v8070_v28 = vpop.f32.mrb[159].mxu0  ;;  %v13609_v5 = vpack.i.bf16 %v13586_v37, %v13608_v17  ;;  %v13615_v17 = vld [vmem:[#allocation40_spill] sm:$0xff] }
 0x434   : > { %v7844_v15 = vpack.c.bf16 %v8874_v51, %v8871_v56  ;;  %v12527_v43 = vadd.f32 %v8070_v28, %v8069_v25  ;;  %v8072_v33 = vpop.f32.mrb[160].mxu0  ;;  %v8721_v56 = vunpack.i.l.bf16 %v12393_v55 }
 0x435   : > { %v8875_v60 = vpop.trf.xlu0  ;;  %v8073_v49 = vpop.f32.mrb[161].mxu0 }
 0x436   : > { %7281 = vst [vmem:[%s12194_s6 + $0x60] sm:$0xff] %v7844_v15  ;;  %v8879_v52 = vunpack.i.h.bf16 %v8875_v60  ;;  %v8876_v6 = vunpack.i.l.bf16 %v8875_v60  ;;  %9043 = vxpose.xlu1.b32.cont [11/16] (narrow) %v13603_v39, 64  ;;  %v8075_v51 = vpop.f32.mrb[162].mxu0  ;;  %v12535_v21 = vadd.f32 %v8073_v49, %v8072_v33 }
 0x437   : > { %v8076_v54 = vpop.f32.mrb[163].mxu0 }
 0x438   : > { %v7845_v36 = vpack.c.bf16 %v8879_v52, %v8876_v6  ;;  %v12537_v1 = vadd.f32 %v8076_v54, %v8075_v51  ;;  %v8078_v60 = vpop.f32.mrb[164].mxu0  ;;  %v9094_v52 = vpack.i.bf16 %v8801_v47, %v8721_v56 }
 0x439   : > { %v8880_v9 = vpop.trf.xlu0  ;;  %v8079_v25 = vpop.f32.mrb[165].mxu0 }
 0x43a   : > { %7282 = vst [vmem:[%s12194_s6 + $0x68] sm:$0xff] %v7845_v36  ;;  %v8884_v58 = vunpack.i.h.bf16 %v8880_v9  ;;  %v8881_v22 = vunpack.i.l.bf16 %v8880_v9  ;;  %9045 = vxpose.xlu1.b32.cont [12/16] (narrow) %v13605_v16, 64  ;;  %v8081_v28 = vpop.f32.mrb[166].mxu0  ;;  %v12544_v36 = vadd.f32 %v8079_v25, %v8078_v60  ;;  %v8722_v9 = vunpack.i.h.bf16 %v12393_v55 }
 0x43b   : > { %v8082_v33 = vpop.f32.mrb[167].mxu0 }
 0x43c   : > { %v7846_v15 = vpack.c.bf16 %v8884_v58, %v8881_v22  ;;  %v12547_v30 = vadd.f32 %v8082_v33, %v8081_v28  ;;  %v8084_v47 = vpop.f32.mrb[168].mxu0  ;;  %v13607_v22 = vld [vmem:[#allocation87_spill] sm:$0xff]  ;;  %v9096_v56 = vpack.i.bf16 %v8802_v8, %v8722_v9  ;;  %v13611_v28 = vld [vmem:[#allocation14_spill] sm:$0xff] }
 0x43d   : > { %v8885_v6 = vpop.trf.xlu0  ;;  %v8085_v58 = vpop.f32.mrb[169].mxu0  ;;  %v8811_v51 = vunpack.i.l.bf16 %v13607_v22  ;;  %v8812_v25 = vunpack.i.h.bf16 %v13607_v22 }
 0x43e   : > { %7283 = vst [vmem:[%s12194_s6 + $0x70] sm:$0xff] %v7846_v15  ;;  %v8889_v57 = vunpack.i.h.bf16 %v8885_v6  ;;  %v8886_v39 = vunpack.i.l.bf16 %v8885_v6  ;;  %9047 = vxpose.xlu1.b32.cont [13/16] (narrow) %v13606_v38, 64  ;;  %v12551_v11 = vadd.f32 %v8085_v58, %v8084_v47  ;;  %v8087_v16 = vpop.f32.mrb[170].mxu0  ;;  %v13610_v15 = vld [vmem:[#allocation63_spill] sm:$0xff]  ;;  %v13612_v38 = vld [vmem:[#allocation38_spill] sm:$0xff] }
 0x43f   : > { %v8088_v54 = vpop.f32.mrb[171].mxu0  ;;  %v8731_v55 = vunpack.i.l.bf16 %v13610_v15  ;;  %v13613_v33 = vpack.i.bf16 %v13611_v28, %v13612_v38  ;;  %v8732_v9 = vunpack.i.h.bf16 %v13610_v15 }
 0x440   : > { %9095 = vxpose.xlu0.b32.start [1/16] (narrow) %v9094_v52, 64  ;;  %v7847_v49 = vpack.c.bf16 %v8889_v57, %v8886_v39  ;;  %v12557_v60 = vadd.f32 %v8088_v54, %v8087_v16  ;;  %v8090_v52 = vpop.f32.mrb[172].mxu0 }
 0x441   : > { %v8091_v6 = vpop.f32.mrb[173].mxu0  ;;  %v9098_v57 = vpack.i.bf16 %v8811_v51, %v8731_v55  ;;  %v13614_v51 = vld [vmem:[#allocation19_spill] sm:$0xff] }
 0x442   : > { %7284 = vst [vmem:[%s12194_s6 + $0x78] sm:$0xff] %v7847_v49  ;;  %9049 = vxpose.xlu1.b32.cont [14/16] (narrow) %v13609_v5, 64  ;;  %v12560_v8 = vadd.f32 %v8091_v6, %v8090_v52  ;;  %v8093_v39 = vpop.f32.mrb[174].mxu0  ;;  %v13616_v5 = vpack.i.bf16 %v13614_v51, %v13615_v17 }
 0x443   : > { %v8094_v37 = vpop.f32.mrb[175].mxu0 }
 0x444   : > { %9097 = vxpose.xlu0.b32.cont [2/16] (narrow) %v9096_v56, 64  ;;  %v12566_v49 = vadd.f32 %v8094_v37, %v8093_v39  ;;  %v8096_v47 = vpop.f32.mrb[176].mxu0  ;;  %v9100_v56 = vpack.i.bf16 %v8812_v25, %v8732_v9 }
 0x445   : > { %v8097_v58 = vpop.f32.mrb[177].mxu0 }
 0x446   : > { %9051 = vxpose.xlu1.b32.cont [15/16] (narrow) %v13613_v33, 64  ;;  %v12568_v16 = vadd.f32 %v8097_v58, %v8096_v47  ;;  %v8099_v22 = vpop.f32.mrb[178].mxu0 }
 0x447   : > { %v8100_v54 = vpop.f32.mrb[179].mxu0 }
 0x448   : > { %9099 = vxpose.xlu0.b32.cont [3/16] (narrow) %v9098_v57, 64  ;;  %v12573_v55 = vadd.f32 %v8100_v54, %v8099_v22  ;;  %v8102_v52 = vpop.f32.mrb[180].mxu0 }
 0x449   : > { %v8103_v6 = vpop.f32.mrb[181].mxu0 }
 0x44a   : > { %9053 = vxpose.xlu1.b32.end [16/16] (narrow) %v13616_v5, 64  ;;  %v12575_v15 = vadd.f32 %v8103_v6, %v8102_v52  ;;  %v8105_v57 = vpop.f32.mrb[182].mxu0 }
 0x44b   : > { %v8106_v39 = vpop.f32.mrb[183].mxu0 }
 0x44c   : > { %9101 = vxpose.xlu0.b32.cont [4/16] (narrow) %v9100_v56, 64  ;;  %v12577_v28 = vadd.f32 %v8106_v39, %v8105_v57  ;;  %v8108_v25 = vpop.f32.mrb[184].mxu0 }
 0x44d   : > { %v8109_v38 = vpop.f32.mrb[185].mxu0 }
 0x44e   : > { %v12579_v33 = vadd.f32 %v8109_v38, %v8108_v25  ;;  %v8111_v37 = vpop.f32.mrb[186].mxu0 }
 0x44f   : > { %v8112_v9 = vpop.f32.mrb[187].mxu0 }
 0x450   : > { %v12581_v47 = vadd.f32 %v8112_v9, %v8111_v37  ;;  %v8114_v58 = vpop.f32.mrb[188].mxu0 }
 0x451   : > { %v8115_v56 = vpop.f32.mrb[189].mxu0 }
 0x452   : > { %v12583_v22 = vadd.f32 %v8115_v56, %v8114_v58  ;;  %v8117_v51 = vpop.f32.mrb[190].mxu0 }
 0x453   : > { %v8118_v17 = vpop.f32.mrb[191].mxu0 }
 0x454   : > { %v12585_v54 = vadd.f32 %v8118_v17, %v8117_v51 }
 0x457   : > { %v5614_v5 = vpop.permute.xlu1 %5613  ;;  %v8162_v52 = vpop.f32.mrb[192].mxu0 }
 0x458   : > { %7516 = vst.msk [vmem:[%s11682_s24 + $0x19c] sm:$0xf] %vm3958_vm0, %v5614_v5  ;;  %v3712_v6 = vadd.f32 %v8162_v52, %v12469_v46  ;;  %v3703_v57 = vpop.f32.mrb[193].mxu0  ;;  %v13619_v46 = vld [vmem:[#allocation15_spill] sm:$0xff] }
 0x459   : > { %v3704_v39 = vadd.f32 %v12459_v31, %v3703_v57  ;;  %v8163_v25 = vpop.f32.mrb[194].mxu0 }
 0x45a   : > { %v12591_v38 = vpack.c.bf16 %v3712_v6, %v3712_v6  ;;  %v3715_v37 = vadd.f32 %v8163_v25, %v12474_v44  ;;  %v3706_v9 = vpop.f32.mrb[195].mxu0 }
 0x45b   : > { %v12594_v58 = vpack.c.bf16 %v3704_v39, %v3704_v39  ;;  %v3707_v56 = vadd.f32 %v12464_v62, %v3706_v9 }
 0x45c   : > { %7655 = vst.msk [vmem:[%s11682_s24 + $0x208] sm:$0xf] %vm3958_vm0, %v12591_v38  ;;  %v12600_v51 = vpack.c.bf16 %v3715_v37, %v3715_v37  ;;  %v13622_v37 = vld [vmem:[#allocation11_spill] sm:$0xff] }
 0x45d   : > { %7653 = vst.msk [vmem:[%s11682_s24 + $0x200] sm:$0xf] %vm3958_vm0, %v12594_v58  ;;  %v12605_v31 = vpack.c.bf16 %v3707_v56, %v3707_v56  ;;  %v13626_v56 = vld [vmem:[#allocation12_spill] sm:$0xff] }
 0x45e   : > { %13617 = vst [vmem:[#allocation18_spill] sm:$0xff] %v12600_v51  ;;  %7656 = vst.msk [vmem:[%s11682_s24 + $0x20c] sm:$0xf] %vm3958_vm0, %v12600_v51 }
 0x45f   : > { %13618 = vst [vmem:[#allocation30_spill] sm:$0xff] %v12605_v31  ;;  %7654 = vst.msk [vmem:[%s11682_s24 + $0x204] sm:$0xf] %vm3958_vm0, %v12605_v31  ;;  %v8166_v62 = vpop.f32.mrb[196].mxu0 }
 0x460   : > { %v3728_v44 = vadd.f32 %v8166_v62, %v12491_v59  ;;  %v3719_v17 = vpop.f32.mrb[197].mxu0 }
 0x461   : > { %v3720_v5 = vadd.f32 %v12482_v4, %v3719_v17  ;;  %v8167_v52 = vpop.f32.mrb[198].mxu0  ;;  %v13627_v17 = vld [vmem:[#allocation17_spill] sm:$0xff] }
 0x462   : > { %v12617_v6 = vpack.c.bf16 %v3728_v44, %v3728_v44  ;;  %v3731_v57 = vadd.f32 %v8167_v52, %v12493_v48  ;;  %v3722_v25 = vpop.f32.mrb[199].mxu0  ;;  %v13625_v48 = vld [vmem:[#allocation16_spill] sm:$0xff] }
 0x463   : > { %v12620_v39 = vpack.c.bf16 %v3720_v5, %v3720_v5  ;;  %v3723_v59 = vadd.f32 %v12484_v0, %v3722_v25  ;;  %v8741_v0 = vunpack.i.l.bf16 %v12403_v34 }
 0x464   : > { %13620 = vst [vmem:[#allocation22_spill] sm:$0xff] %v12617_v6  ;;  %7659 = vst.msk [vmem:[%s11682_s24 + $0x218] sm:$0xf] %vm3958_vm0, %v12617_v6  ;;  %v12627_v9 = vpack.c.bf16 %v3731_v57, %v3731_v57 }
 0x465   : > { %13621 = vst [vmem:[#allocation29_spill] sm:$0xff] %v12620_v39  ;;  %7657 = vst.msk [vmem:[%s11682_s24 + $0x210] sm:$0xf] %vm3958_vm0, %v12620_v39  ;;  %v12636_v4 = vpack.c.bf16 %v3723_v59, %v3723_v59 }
 0x466   : > { %13623 = vst [vmem:[#allocation35_spill] sm:$0xff] %v12627_v9  ;;  %7660 = vst.msk [vmem:[%s11682_s24 + $0x21c] sm:$0xf] %vm3958_vm0, %v12627_v9 }
 0x467   : > { %13624 = vst [vmem:[#allocation33_spill] sm:$0xff] %v12636_v4  ;;  %7658 = vst.msk [vmem:[%s11682_s24 + $0x214] sm:$0xf] %vm3958_vm0, %v12636_v4 }
 0x468   : > { %4665 = vrot.lane.b32.xlu1 %v13619_v46, %s9870_s21  ;;  %v8170_v46 = vpop.f32.mrb[160].mxu1 }
 0x469   : > { %v3744_v5 = vadd.f32 %v8170_v46, %v12509_v20  ;;  %v3735_v52 = vpop.f32.mrb[161].mxu1  ;;  %v8742_v46 = vunpack.i.h.bf16 %v12403_v34  ;;  %v8903_v34 = vunpack.i.l.bf16 %v12223_v12 }
 0x46a   : > { %v3736_v57 = vadd.f32 %v12500_v35, %v3735_v52  ;;  %v8171_v25 = vpop.f32.mrb[162].mxu1  ;;  %v8747_v35 = vunpack.i.h.bf16 %v12405_v50 }
 0x46b   : > { %v3738_v4 = vpop.f32.mrb[163].mxu1 }
 0x46c   : > { %5615 = vrot.lane.b32.xlu1 %v13622_v37, %s9870_s21  ;;  %v12655_v39 = vpack.c.bf16 %v3736_v57, %v3736_v57  ;;  %v3739_v20 = vadd.f32 %v12502_v7, %v3738_v4  ;;  %v13630_v57 = vld [vmem:[#allocation53_spill] sm:$0xff] }
 0x46e   : > { %7661 = vst.msk [vmem:[%s11682_s24 + $0x220] sm:$0xf] %vm3958_vm0, %v12655_v39 }
 0x470   : > { %4667 = vrot.lane.b32.xlu1 %v13625_v48, %s9870_s21  ;;  %v12650_v48 = vpack.c.bf16 %v3744_v5, %v3744_v5  ;;  %v13629_v5 = vld [vmem:[#allocation69_spill] sm:$0xff] }
 0x471   : > { %v8751_v52 = vunpack.i.l.bf16 %v13629_v5 }
 0x472   : > { %7663 = vst.msk [vmem:[%s11682_s24 + $0x228] sm:$0xf] %vm3958_vm0, %v12650_v48 }
 0x474   : > { %5617 = vrot.lane.b32.xlu1 %v13626_v56, %s9870_s21  ;;  %v3747_v56 = vadd.f32 %v8171_v25, %v12511_v3  ;;  %v8904_v25 = vunpack.i.h.bf16 %v12223_v12 }
 0x476   : > { %v12666_v3 = vpack.c.bf16 %v3747_v56, %v3747_v56 }
 0x478   : > { %v8892_v62 = vpop.permute.xlu0 %8891  ;;  %4669 = vrot.lane.b32.xlu1 %v13627_v17, %s9870_s21  ;;  %7664 = vst.msk [vmem:[%s11682_s24 + $0x22c] sm:$0xf] %vm3958_vm0, %v12666_v3 }
 0x479   : > { %v8893_v44 = vunpack.i.l.bf16 %v8892_v62  ;;  %v8894_v37 = vunpack.i.h.bf16 %v8892_v62 }
 0x47b   : > { %v9102_v59 = vpack.i.bf16 %v8893_v44, %v8741_v0  ;;  %v13628_v0 = vld [vmem:[#allocation13_spill] sm:$0xff]  ;;  %v12671_v44 = vpack.c.bf16 %v3739_v20, %v3739_v20  ;;  %v9104_v7 = vpack.i.bf16 %v8894_v37, %v8742_v46  ;;  %v8752_v37 = vunpack.i.h.bf16 %v13629_v5 }
 0x47c   : > { %v12653_v9 = vpop.permute.xlu0 %8896  ;;  %5619 = vrot.lane.b32.xlu1 %v13628_v0, %s9870_s21  ;;  %v8767_v20 = vunpack.i.h.bf16 %v12409_v42  ;;  %v8766_v46 = vunpack.i.l.bf16 %v12409_v42  ;;  %v13631_v0 = vld [vmem:[#allocation54_spill] sm:$0xff]  ;;  %v8761_v5 = vunpack.i.l.bf16 %v12407_v13  ;;  %v13632_v42 = vld [vmem:[#allocation55_spill] sm:$0xff] }
 0x47d   : > { %v8899_v62 = vunpack.i.h.bf16 %v12653_v9  ;;  %9103 = vxpose.xlu0.b32.cont [5/16] (narrow) %v9102_v59, 64  ;;  %7662 = vst.msk [vmem:[%s11682_s24 + $0x224] sm:$0xf] %vm3958_vm0, %v12671_v44  ;;  %v9106_v59 = vpack.i.bf16 %v8903_v34, %v8751_v52  ;;  %v8174_v34 = vpop.f32.mrb[164].mxu1 }
 0x47e   : > { %v3760_v52 = vadd.f32 %v8174_v34, %v12525_v41  ;;  %v8786_v41 = vunpack.i.l.bf16 %v12415_v32  ;;  %v13633_v34 = vld [vmem:[#allocation56_spill] sm:$0xff] }
 0x47f   : > { %v12674_v4 = vpack.i.bf16 %v8899_v62, %v8747_v35 }
 0x480   : > { %v8912_v17 = vpop.permute.xlu0 %8911  ;;  %4671 = vrot.lane.b32.xlu1 %v13630_v57, %s9870_s21 }
 0x481   : > { %9105 = vxpose.xlu0.b32.cont [6/16] (narrow) %v9104_v7, 64  ;;  %v9108_v7 = vpack.i.bf16 %v8904_v25, %v8752_v37  ;;  %v8913_v6 = vunpack.i.l.bf16 %v8912_v17  ;;  %v8914_v37 = vunpack.i.h.bf16 %v8912_v17 }
 0x484   : > { %v8917_v56 = vpop.permute.xlu0 %8916  ;;  %5621 = vrot.lane.b32.xlu1 %v13631_v0, %s9870_s21  ;;  %v8762_v0 = vunpack.i.h.bf16 %v12407_v13 }
 0x485   : > { %v8919_v35 = vunpack.i.h.bf16 %v8917_v56  ;;  %v8918_v62 = vunpack.i.l.bf16 %v8917_v56  ;;  %9107 = vxpose.xlu0.b32.cont [7/16] (narrow) %v9106_v59, 64  ;;  %v3751_v59 = vpop.f32.mrb[165].mxu1 }
 0x486   : > { %v3752_v56 = vadd.f32 %v12517_v45, %v3751_v59  ;;  %v8175_v25 = vpop.f32.mrb[166].mxu1 }
 0x487   : > { %v12691_v31 = vpack.i.bf16 %v8919_v35, %v8767_v20  ;;  %v12693_v57 = vpack.i.bf16 %v8918_v62, %v8766_v46  ;;  %v9110_v20 = vpack.i.bf16 %v8913_v6, %v8761_v5  ;;  %v12702_v46 = vpack.c.bf16 %v3760_v52, %v3760_v52  ;;  %v3754_v62 = vpop.f32.mrb[167].mxu1 }
 0x488   : > { %v12695_v12 = vpop.permute.xlu0 %8931  ;;  %4673 = vrot.lane.b32.xlu1 %v13632_v42, %s9870_s21  ;;  %v3763_v35 = vadd.f32 %v8175_v25, %v12527_v43  ;;  %v12707_v51 = vpack.c.bf16 %v3752_v56, %v3752_v56  ;;  %v3755_v45 = vadd.f32 %v12519_v61, %v3754_v62  ;;  %v9112_v61 = vpack.i.bf16 %v8914_v37, %v8762_v0  ;;  %v13635_v37 = vld [vmem:[#allocation57_spill] sm:$0xff] }
 0x489   : > { %9109 = vxpose.xlu0.b32.cont [8/16] (narrow) %v9108_v7, 64  ;;  %v8787_v7 = vunpack.i.h.bf16 %v12415_v32  ;;  %7667 = vst.msk [vmem:[%s11682_s24 + $0x238] sm:$0xf] %vm3958_vm0, %v12702_v46  ;;  %v8923_v32 = vunpack.i.l.bf16 %v12315_v19 }
 0x48a   : > { %v12716_v13 = vpack.c.bf16 %v3763_v35, %v3763_v35  ;;  %7665 = vst.msk [vmem:[%s11682_s24 + $0x230] sm:$0xf] %vm3958_vm0, %v12707_v51  ;;  %v12721_v43 = vpack.c.bf16 %v3755_v45, %v3755_v45  ;;  %v13634_v35 = vld [vmem:[#allocation21_spill] sm:$0xff] }
 0x48b   : > { %v8771_v62 = vunpack.i.l.bf16 %v13634_v35 }
 0x48c   : > { %v8937_v42 = vpop.permute.xlu0 %8936  ;;  %5623 = vrot.lane.b32.xlu1 %v13633_v34, %s9870_s21  ;;  %7668 = vst.msk [vmem:[%s11682_s24 + $0x23c] sm:$0xf] %vm3958_vm0, %v12716_v13  ;;  %7666 = vst.msk [vmem:[%s11682_s24 + $0x234] sm:$0xf] %vm3958_vm0, %v12721_v43  ;;  %v8772_v34 = vunpack.i.h.bf16 %v13634_v35  ;;  %v13637_v35 = vld [vmem:[#allocation59_spill] sm:$0xff] }
 0x48d   : > { %v8939_v17 = vunpack.i.h.bf16 %v8937_v42  ;;  %v8938_v6 = vunpack.i.l.bf16 %v8937_v42  ;;  %9111 = vxpose.xlu0.b32.cont [9/16] (narrow) %v9110_v20, 64  ;;  %v9114_v42 = vpack.i.bf16 %v8923_v32, %v8771_v62  ;;  %v8178_v62 = vpop.f32.mrb[168].mxu1 }
 0x48e   : > { %v9054_v59 = vpop.trf.xlu1 }
 0x48f   : > { %v12724_v5 = vpack.i.bf16 %v8939_v17, %v8787_v7  ;;  %v12726_v52 = vpack.i.bf16 %v8938_v6, %v8786_v41  ;;  %v9058_v25 = vunpack.i.h.bf16 %v9054_v59  ;;  %v9055_v20 = vunpack.i.l.bf16 %v9054_v59 }
 0x490   : > { %v4694_v56 = vpop.permute.xlu0 %4693  ;;  %4675 = vrot.lane.b32.xlu1 %v13635_v37, %s9870_s21  ;;  %v8924_v7 = vunpack.i.h.bf16 %v12315_v19  ;;  %v8781_v37 = vunpack.i.l.bf16 %v12413_v2 }
 0x491   : > { %7307 = vst.msk [vmem:[%s11682_s24 + $0xd8] sm:$0xf] %vm3958_vm0, %v4694_v56  ;;  %9113 = vxpose.xlu0.b32.cont [10/16] (narrow) %v9112_v61, 64  ;;  %v7960_v0 = vpack.c.bf16 %v9058_v25, %v9055_v20  ;;  %v13636_v61 = vld [vmem:[#allocation58_spill] sm:$0xff]  ;;  %v8933_v25 = vunpack.i.l.bf16 %v12695_v12 }
 0x492   : > { %v9059_v45 = vpop.trf.xlu1  ;;  %v9116_v56 = vpack.i.bf16 %v8924_v7, %v8772_v34 }
 0x493   : > { %7613 = vst [vmem:[%s12194_s6 + $0x100] sm:$0xff] %v7960_v0  ;;  %v9063_v17 = vunpack.i.h.bf16 %v9059_v45  ;;  %v9060_v6 = vunpack.i.l.bf16 %v9059_v45  ;;  %v3776_v0 = vadd.f32 %v8178_v62, %v12544_v36  ;;  %v8943_v62 = vunpack.i.l.bf16 %v12385_v14 }
 0x494   : > { %v5644_v41 = vpop.permute.xlu0 %5643  ;;  %5625 = vrot.lane.b32.xlu1 %v13636_v61, %s9870_s21 }
 0x495   : > { %7531 = vst.msk [vmem:[%s11682_s24 + $0x1d8] sm:$0xf] %vm3958_vm0, %v5644_v41  ;;  %9115 = vxpose.xlu0.b32.cont [11/16] (narrow) %v9114_v42, 64  ;;  %v7961_v59 = vpack.c.bf16 %v9063_v17, %v9060_v6  ;;  %v3767_v42 = vpop.f32.mrb[169].mxu1  ;;  %v8934_v17 = vunpack.i.h.bf16 %v12695_v12  ;;  %v9118_v6 = vpack.i.bf16 %v8933_v25, %v8781_v37  ;;  %v12754_v61 = vpack.c.bf16 %v3776_v0, %v3776_v0 }
 0x496   : > { %v9064_v20 = vpop.trf.xlu1  ;;  %v3768_v7 = vadd.f32 %v12535_v21, %v3767_v42  ;;  %v8179_v41 = vpop.f32.mrb[170].mxu1  ;;  %v13638_v21 = vld [vmem:[#allocation60_spill] sm:$0xff] }
 0x497   : > { %7614 = vst [vmem:[%s12194_s6 + $0x108] sm:$0xff] %v7961_v59  ;;  %v9068_v19 = vunpack.i.h.bf16 %v9064_v20  ;;  %v9065_v32 = vunpack.i.l.bf16 %v9064_v20  ;;  %v3779_v59 = vadd.f32 %v8179_v41, %v12547_v30  ;;  %7671 = vst.msk [vmem:[%s11682_s24 + $0x248] sm:$0xf] %vm3958_vm0, %v12754_v61 }
 0x498   : > { %4677 = vrot.lane.b32.xlu1 %v13637_v35, %s9870_s21  ;;  %v12764_v12 = vpack.c.bf16 %v3768_v7, %v3768_v7 }
 0x499   : > { %9117 = vxpose.xlu0.b32.cont [12/16] (narrow) %v9116_v56, 64  ;;  %v7962_v45 = vpack.c.bf16 %v9068_v19, %v9065_v32  ;;  %v3770_v56 = vpop.f32.mrb[171].mxu1  ;;  %v8782_v19 = vunpack.i.h.bf16 %v12413_v2  ;;  %v12766_v30 = vpack.c.bf16 %v3779_v59, %v3779_v59 }
 0x49a   : > { %v9069_v34 = vpop.trf.xlu1  ;;  %v3771_v25 = vadd.f32 %v12537_v1, %v3770_v56  ;;  %7669 = vst.msk [vmem:[%s11682_s24 + $0x240] sm:$0xf] %vm3958_vm0, %v12764_v12  ;;  %v13640_v1 = vld [vmem:[#allocation61_spill] sm:$0xff] }
 0x49b   : > { %7615 = vst [vmem:[%s12194_s6 + $0x110] sm:$0xff] %v7962_v45  ;;  %v9073_v20 = vunpack.i.h.bf16 %v9069_v34  ;;  %v9070_v36 = vunpack.i.l.bf16 %v9069_v34  ;;  %v9120_v37 = vpack.i.bf16 %v8934_v17, %v8782_v19  ;;  %7672 = vst.msk [vmem:[%s11682_s24 + $0x24c] sm:$0xf] %vm3958_vm0, %v12766_v30  ;;  %v13639_v45 = vld [vmem:[#allocation79_spill] sm:$0xff]  ;;  %v8944_v17 = vunpack.i.h.bf16 %v12385_v14  ;;  %v13642_v14 = vld [vmem:[#allocation64_spill] sm:$0xff] }
 0x49c   : > { %5627 = vrot.lane.b32.xlu1 %v13638_v21, %s9870_s21  ;;  %v12776_v35 = vpack.c.bf16 %v3771_v25, %v3771_v25  ;;  %v8791_v7 = vunpack.i.l.bf16 %v13639_v45 }
 0x49d   : > { %9119 = vxpose.xlu0.b32.cont [13/16] (narrow) %v9118_v6, 64  ;;  %v7963_v32 = vpack.c.bf16 %v9073_v20, %v9070_v36  ;;  %v8792_v20 = vunpack.i.h.bf16 %v13639_v45  ;;  %v13641_v36 = vld [vmem:[#allocation62_spill] sm:$0xff] }
 0x49e   : > { %v9074_v2 = vpop.trf.xlu1  ;;  %7670 = vst.msk [vmem:[%s11682_s24 + $0x244] sm:$0xf] %vm3958_vm0, %v12776_v35  ;;  %v9122_v6 = vpack.i.bf16 %v8943_v62, %v8791_v7 }
 0x49f   : > { %7616 = vst [vmem:[%s12194_s6 + $0x118] sm:$0xff] %v7963_v32  ;;  %v9078_v0 = vunpack.i.h.bf16 %v9074_v2  ;;  %v9075_v42 = vunpack.i.l.bf16 %v9074_v2  ;;  %v9124_v21 = vpack.i.bf16 %v8944_v17, %v8792_v20  ;;  %v8182_v2 = vpop.f32.mrb[172].mxu1 }
 0x4a0   : > { %4679 = vrot.lane.b32.xlu1 %v13640_v1, %s9870_s21  ;;  %v3792_v62 = vadd.f32 %v8182_v2, %v12560_v8  ;;  %v13643_v8 = vld [vmem:[#allocation65_spill] sm:$0xff] }
 0x4a1   : > { %9121 = vxpose.xlu0.b32.cont [14/16] (narrow) %v9120_v37, 64  ;;  %v7964_v41 = vpack.c.bf16 %v9078_v0, %v9075_v42  ;;  %v3783_v0 = vpop.f32.mrb[173].mxu1 }
 0x4a2   : > { %v9079_v34 = vpop.trf.xlu1  ;;  %v3784_v45 = vadd.f32 %v12551_v11, %v3783_v0  ;;  %v8183_v7 = vpop.f32.mrb[174].mxu1 }
 0x4a3   : > { %7617 = vst [vmem:[%s12194_s6 + $0x120] sm:$0xff] %v7964_v41  ;;  %v9083_v59 = vunpack.i.h.bf16 %v9079_v34  ;;  %v9080_v56 = vunpack.i.l.bf16 %v9079_v34  ;;  %v12795_v41 = vpack.c.bf16 %v3792_v62, %v3792_v62  ;;  %v3795_v17 = vadd.f32 %v8183_v7, %v12566_v49 }
 0x4a4   : > { %5629 = vrot.lane.b32.xlu1 %v13641_v36, %s9870_s21  ;;  %v12805_v11 = vpack.c.bf16 %v3784_v45, %v3784_v45  ;;  %v13644_v36 = vld [vmem:[#allocation89_spill] sm:$0xff]  ;;  %v8898_v62 = vunpack.i.l.bf16 %v12653_v9  ;;  %v13648_v45 = vld [vmem:[#allocation70_spill] sm:$0xff] }
 0x4a5   : > { %9123 = vxpose.xlu0.b32.cont [15/16] (narrow) %v9122_v6, 64  ;;  %v7965_v19 = vpack.c.bf16 %v9083_v59, %v9080_v56  ;;  %v3786_v6 = vpop.f32.mrb[175].mxu1  ;;  %7675 = vst.msk [vmem:[%s11682_s24 + $0x258] sm:$0xf] %vm3958_vm0, %v12795_v41  ;;  %v12807_v56 = vpack.c.bf16 %v3795_v17, %v3795_v17 }
 0x4a6   : > { %v9084_v25 = vpop.trf.xlu1  ;;  %v3787_v49 = vadd.f32 %v12557_v60, %v3786_v6  ;;  %7673 = vst.msk [vmem:[%s11682_s24 + $0x250] sm:$0xf] %vm3958_vm0, %v12805_v11  ;;  %v8817_v60 = vunpack.i.h.bf16 %v13644_v36 }
 0x4a7   : > { %7618 = vst [vmem:[%s12194_s6 + $0x128] sm:$0xff] %v7965_v19  ;;  %v9088_v32 = vunpack.i.h.bf16 %v9084_v25  ;;  %v9085_v37 = vunpack.i.l.bf16 %v9084_v25  ;;  %v8816_v19 = vunpack.i.l.bf16 %v13644_v36  ;;  %7676 = vst.msk [vmem:[%s11682_s24 + $0x25c] sm:$0xf] %vm3958_vm0, %v12807_v56 }
 0x4a8   : > { %4681 = vrot.lane.b32.xlu1 %v13642_v14, %s9870_s21  ;;  %v13647_v14 = vld [vmem:[#allocation68_spill] sm:$0xff] }
 0x4a9   : > { %9125 = vxpose.xlu0.b32.end [16/16] (narrow) %v9124_v21, 64  ;;  %v7966_v42 = vpack.c.bf16 %v9088_v32, %v9085_v37  ;;  %v13645_v21 = vld [vmem:[#allocation66_spill] sm:$0xff]  ;;  %v13646_v32 = vld [vmem:[#allocation67_spill] sm:$0xff] }
 0x4aa   : > { %v9089_v1 = vpop.trf.xlu1  ;;  %v8736_v25 = vunpack.i.l.bf16 %v13645_v21  ;;  %v8737_v2 = vunpack.i.h.bf16 %v13645_v21  ;;  %v8909_v21 = vunpack.i.h.bf16 %v12238_v40 }
 0x4ab   : > { %7619 = vst [vmem:[%s12194_s6 + $0x130] sm:$0xff] %v7966_v42  ;;  %v9093_v34 = vunpack.i.h.bf16 %v9089_v1  ;;  %v9090_v59 = vunpack.i.l.bf16 %v9089_v1  ;;  %v8186_v42 = vpop.f32.mrb[176].mxu1 }
 0x4ac   : > { %5631 = vrot.lane.b32.xlu1 %v13643_v8, %s9870_s21  ;;  %v9170_v37 = vpack.i.bf16 %v8816_v19, %v8736_v25  ;;  %v9172_v0 = vpack.i.bf16 %v8817_v60, %v8737_v2  ;;  %v3808_v7 = vadd.f32 %v8186_v42, %v12575_v15  ;;  %v3799_v1 = vpop.f32.mrb[177].mxu1  ;;  %v13651_v19 = vld [vmem:[#allocation71_spill] sm:$0xff]  ;;  %v13652_v60 = vld [vmem:[#allocation72_spill] sm:$0xff] }
 0x4ad   : > { %9167 = vxpose.xlu0.b32.start [1/16] (narrow) %v12421_v63, 64  ;;  %v7967_v20 = vpack.c.bf16 %v9093_v34, %v9090_v59  ;;  %v12817_v63 = vpack.c.bf16 %v3787_v49, %v3787_v49  ;;  %v3800_v17 = vadd.f32 %v12568_v16, %v3799_v1  ;;  %v8187_v6 = vpop.f32.mrb[178].mxu1 }
 0x4ae   : > { %v12837_v9 = vpack.c.bf16 %v3808_v7, %v3808_v7  ;;  %v3811_v59 = vadd.f32 %v8187_v6, %v12577_v28  ;;  %v3802_v8 = vpop.f32.mrb[179].mxu1  ;;  %v8908_v28 = vunpack.i.l.bf16 %v12238_v40  ;;  %v13656_v6 = vld [vmem:[#allocation76_spill] sm:$0xff] }
 0x4af   : > { %7620 = vst [vmem:[%s12194_s6 + $0x138] sm:$0xff] %v7967_v20  ;;  %7674 = vst.msk [vmem:[%s11682_s24 + $0x254] sm:$0xf] %vm3958_vm0, %v12817_v63  ;;  %v3803_v49 = vadd.f32 %v12573_v55, %v3802_v8  ;;  %v13649_v20 = vld [vmem:[#allocation20_spill] sm:$0xff]  ;;  %v13650_v55 = vld [vmem:[#allocation73_spill] sm:$0xff]  ;;  %v8190_v2 = vpop.f32.mrb[180].mxu1 }
 0x4b0   : > { %4683 = vrot.lane.b32.xlu1 %v13646_v32, %s9870_s21  ;;  %7679 = vst.msk [vmem:[%s11682_s24 + $0x268] sm:$0xf] %vm3958_vm0, %v12837_v9  ;;  %v12848_v16 = vpack.c.bf16 %v3811_v59, %v3811_v59  ;;  %v8756_v36 = vunpack.i.l.bf16 %v13650_v55  ;;  %v8757_v32 = vunpack.i.h.bf16 %v13650_v55  ;;  %v8948_v55 = vunpack.i.l.bf16 %v12395_v53 }
 0x4b1   : > { %9169 = vxpose.xlu0.b32.cont [2/16] (narrow) %v12419_v10, 64  ;;  %v8746_v10 = vunpack.i.l.bf16 %v12405_v50  ;;  %v12840_v50 = vpack.c.bf16 %v3800_v17, %v3800_v17  ;;  %v12853_v15 = vpack.c.bf16 %v3803_v49, %v3803_v49  ;;  %v13654_v17 = vld [vmem:[#allocation75_spill] sm:$0xff]  ;;  %v13657_v49 = vld [vmem:[#allocation77_spill] sm:$0xff] }
 0x4b2   : > { %7680 = vst.msk [vmem:[%s11682_s24 + $0x26c] sm:$0xf] %vm3958_vm0, %v12848_v16  ;;  %v9178_v25 = vpack.i.bf16 %v8908_v28, %v8756_v36  ;;  %v13658_v28 = vld [vmem:[#allocation80_spill] sm:$0xff] }
 0x4b3   : > { %v9174_v34 = vpack.i.bf16 %v8898_v62, %v8746_v10  ;;  %7677 = vst.msk [vmem:[%s11682_s24 + $0x260] sm:$0xf] %vm3958_vm0, %v12840_v50  ;;  %7678 = vst.msk [vmem:[%s11682_s24 + $0x264] sm:$0xf] %vm3958_vm0, %v12853_v15  ;;  %v3815_v62 = vpop.f32.mrb[181].mxu1 }
 0x4b4   : > { %5633 = vrot.lane.b32.xlu1 %v13647_v14, %s9870_s21  ;;  %v13653_v14 = vld [vmem:[#allocation74_spill] sm:$0xff]  ;;  %v3816_v40 = vadd.f32 %v12579_v33, %v3815_v62 }
 0x4b5   : > { %9171 = vxpose.xlu0.b32.cont [3/16] (narrow) %v9170_v37, 64  ;;  %v9180_v37 = vpack.i.bf16 %v8909_v21, %v8757_v32  ;;  %v8949_v32 = vunpack.i.h.bf16 %v12395_v53  ;;  %v13664_v62 = vld [vmem:[#allocation86_spill] sm:$0xff] }
 0x4b6   : > { %v12877_v7 = vpack.c.bf16 %v3816_v40, %v3816_v40 }
 0x4b8   : > { %4685 = vrot.lane.b32.xlu1 %v13648_v45, %s9870_s21  ;;  %7681 = vst.msk [vmem:[%s11682_s24 + $0x270] sm:$0xf] %vm3958_vm0, %v12877_v7 }
 0x4b9   : > { %9173 = vxpose.xlu0.b32.cont [4/16] (narrow) %v9172_v0, 64  ;;  %v8191_v0 = vpop.f32.mrb[182].mxu1 }
 0x4ba   : > { %v3827_v10 = vadd.f32 %v8191_v0, %v12585_v54  ;;  %v3818_v45 = vpop.f32.mrb[183].mxu1  ;;  %v8928_v54 = vunpack.i.l.bf16 %v12328_v27 }
 0x4bb   : > { %v3819_v1 = vadd.f32 %v12581_v47, %v3818_v45  ;;  %v13655_v47 = vld [vmem:[#allocation78_spill] sm:$0xff] }
 0x4bc   : > { %5635 = vrot.lane.b32.xlu1 %v13649_v20, %s9870_s21  ;;  %v8777_v8 = vunpack.i.h.bf16 %v13655_v47 }
 0x4bd   : > { %9175 = vxpose.xlu0.b32.cont [5/16] (narrow) %v9174_v34, 64  ;;  %v12891_v33 = vpack.c.bf16 %v3819_v1, %v3819_v1  ;;  %v8929_v34 = vunpack.i.h.bf16 %v12328_v27  ;;  %v13659_v27 = vld [vmem:[#allocation81_spill] sm:$0xff] }
 0x4bf   : > { %7682 = vst.msk [vmem:[%s11682_s24 + $0x274] sm:$0xf] %vm3958_vm0, %v12891_v33  ;;  %v9188_v20 = vpack.i.bf16 %v8929_v34, %v8777_v8 }
 0x4c0   : > { %4687 = vrot.lane.b32.xlu1 %v13651_v19, %s9870_s21  ;;  %v13660_v19 = vld [vmem:[#allocation82_spill] sm:$0xff] }
 0x4c1   : > { %9177 = vxpose.xlu0.b32.cont [6/16] (narrow) %v12674_v4, 64  ;;  %v3824_v4 = vadd.f32 %v8190_v2, %v12583_v22  ;;  %v12886_v22 = vpack.c.bf16 %v3827_v10, %v3827_v10  ;;  %v8796_v21 = vunpack.i.l.bf16 %v13660_v19  ;;  %v13662_v2 = vld [vmem:[#allocation84_spill] sm:$0xff] }
 0x4c3   : > { %v12874_v42 = vpack.c.bf16 %v3824_v4, %v3824_v4  ;;  %7684 = vst.msk [vmem:[%s11682_s24 + $0x27c] sm:$0xf] %vm3958_vm0, %v12886_v22 }
 0x4c4   : > { %5637 = vrot.lane.b32.xlu1 %v13652_v60, %s9870_s21  ;;  %v9194_v60 = vpack.i.bf16 %v8948_v55, %v8796_v21 }
 0x4c5   : > { %9179 = vxpose.xlu0.b32.cont [7/16] (narrow) %v9178_v25, 64  ;;  %7683 = vst.msk [vmem:[%s11682_s24 + $0x278] sm:$0xf] %vm3958_vm0, %v12874_v42  ;;  %v13661_v25 = vld [vmem:[#allocation83_spill] sm:$0xff] }
 0x4c8   : > { %4689 = vrot.lane.b32.xlu1 %v13653_v14, %s9870_s21 }
 0x4c9   : > { %9181 = vxpose.xlu0.b32.cont [8/16] (narrow) %v9180_v37, 64  ;;  %v8797_v37 = vunpack.i.h.bf16 %v13660_v19 }
 0x4cb   : > { %v9196_v4 = vpack.i.bf16 %v8949_v32, %v8797_v37  ;;  %v13668_v32 = vld [vmem:[#allocation91_spill] sm:$0xff] }
 0x4cc   : > { %5639 = vrot.lane.b32.xlu1 %v13654_v17, %s9870_s21  ;;  %v13665_v17 = vld [vmem:[#allocation88_spill] sm:$0xff] }
 0x4cd   : > { %9183 = vxpose.xlu0.b32.cont [9/16] (narrow) %v12693_v57, 64  ;;  %v8776_v57 = vunpack.i.l.bf16 %v13655_v47 }
 0x4cf   : > { %v9186_v59 = vpack.i.bf16 %v8928_v54, %v8776_v57 }
 0x4d0   : > { %4691 = vrot.lane.b32.xlu1 %v13656_v6, %s9870_s21 }
 0x4d1   : > { %9185 = vxpose.xlu0.b32.cont [10/16] (narrow) %v12691_v31, 64 }
 0x4d4   : > { %5641 = vrot.lane.b32.xlu1 %v13657_v49, %s9870_s21 }
 0x4d5   : > { %9187 = vxpose.xlu0.b32.cont [11/16] (narrow) %v9186_v59, 64  ;;  %v13666_v59 = vld [vmem:[#allocation42_spill] sm:$0xff] }
 0x4d8   : > { %4695 = vrot.lane.b32.xlu1 %v13658_v28, %s9870_s21 }
 0x4d9   : > { %9189 = vxpose.xlu0.b32.cont [12/16] (narrow) %v9188_v20, 64 }
 0x4da   : > { %v4666_v31 = vpop.permute.xlu1 %4665 }
 0x4db   : > { %7293 = vst.msk [vmem:[%s11682_s24 + $0xa0] sm:$0xf] %vm3958_vm0, %v4666_v31 }
 0x4dc   : > { %5645 = vrot.lane.b32.xlu1 %v13659_v27, %s9870_s21  ;;  %v13667_v27 = vld [vmem:[#allocation90_spill] sm:$0xff] }
 0x4dd   : > { %9191 = vxpose.xlu0.b32.cont [13/16] (narrow) %v12726_v52, 64 }
 0x4de   : > { %v5616_v36 = vpop.permute.xlu1 %5615 }
 0x4df   : > { %7517 = vst.msk [vmem:[%s11682_s24 + $0x1a0] sm:$0xf] %vm3958_vm0, %v5616_v36 }
 0x4e0   : > { %4697 = vrot.lane.b32.xlu1 %v13661_v25, %s9870_s21 }
 0x4e1   : > { %9193 = vxpose.xlu0.b32.cont [14/16] (narrow) %v12724_v5, 64  ;;  %v13663_v5 = vld [vmem:[#allocation85_spill] sm:$0xff] }
 0x4e2   : > { %v4668_v52 = vpop.permute.xlu1 %4667 }
 0x4e3   : > { %7294 = vst.msk [vmem:[%s11682_s24 + $0xa4] sm:$0xf] %vm3958_vm0, %v4668_v52 }
 0x4e4   : > { %5647 = vrot.lane.b32.xlu1 %v13662_v2, %s9870_s21 }
 0x4e5   : > { %9195 = vxpose.xlu0.b32.cont [15/16] (narrow) %v9194_v60, 64 }
 0x4e6   : > { %v5618_v14 = vpop.permute.xlu1 %5617 }
 0x4e7   : > { %7518 = vst.msk [vmem:[%s11682_s24 + $0x1a4] sm:$0xf] %vm3958_vm0, %v5618_v14 }
 0x4e8   : > { %4699 = vrot.lane.b32.xlu1 %v13663_v5, %s9870_s21 }
 0x4e9   : > { %9197 = vxpose.xlu0.b32.end [16/16] (narrow) %v9196_v4, 64  ;;  %v13669_v4 = vld [vmem:[#allocation92_spill] sm:$0xff] }
 0x4ea   : > { %v4670_v53 = vpop.permute.xlu1 %4669 }
 0x4eb   : > { %7295 = vst.msk [vmem:[%s11682_s24 + $0xa8] sm:$0xf] %vm3958_vm0, %v4670_v53 }
 0x4ec   : > { %5649 = vrot.lane.b32.xlu1 %v13664_v62, %s9870_s21 }
 0x4ed   : > { %v9126_v40 = vpop.trf.xlu0 }
 0x4ee   : > { %v9130_v0 = vunpack.i.h.bf16 %v9126_v40  ;;  %v9127_v10 = vunpack.i.l.bf16 %v9126_v40  ;;  %v5620_v45 = vpop.permute.xlu1 %5619 }
 0x4ef   : > { %7519 = vst.msk [vmem:[%s11682_s24 + $0x1a8] sm:$0xf] %vm3958_vm0, %v5620_v45 }
 0x4f0   : > { %v7920_v1 = vpack.c.bf16 %v9130_v0, %v9127_v10  ;;  %4701 = vrot.lane.b32.xlu1 %v13665_v17, %s9870_s21  ;;  %v13670_v10 = vld [vmem:[#allocation93_spill] sm:$0xff] }
 0x4f1   : > { %v9131_v54 = vpop.trf.xlu0 }
 0x4f2   : > { %7501 = vst [vmem:[%s12194_s6 + $0xc0] sm:$0xff] %v7920_v1  ;;  %v9135_v47 = vunpack.i.h.bf16 %v9131_v54  ;;  %v9132_v57 = vunpack.i.l.bf16 %v9131_v54  ;;  %v4672_v6 = vpop.permute.xlu1 %4671 }
 0x4f3   : > { %7296 = vst.msk [vmem:[%s11682_s24 + $0xac] sm:$0xf] %vm3958_vm0, %v4672_v6 }
 0x4f4   : > { %v7921_v34 = vpack.c.bf16 %v9135_v47, %v9132_v57  ;;  %5651 = vrot.lane.b32.xlu1 %v13666_v59, %s9870_s21 }
 0x4f5   : > { %v9136_v8 = vpop.trf.xlu0 }
 0x4f6   : > { %7502 = vst [vmem:[%s12194_s6 + $0xc8] sm:$0xff] %v7921_v34  ;;  %v9140_v49 = vunpack.i.h.bf16 %v9136_v8  ;;  %v9137_v20 = vunpack.i.l.bf16 %v9136_v8  ;;  %v5622_v28 = vpop.permute.xlu1 %5621 }
 0x4f7   : > { %7520 = vst.msk [vmem:[%s11682_s24 + $0x1ac] sm:$0xf] %vm3958_vm0, %v5622_v28 }
 0x4f8   : > { %v7922_v31 = vpack.c.bf16 %v9140_v49, %v9137_v20  ;;  %4703 = vrot.lane.b32.xlu1 %v13667_v27, %s9870_s21  ;;  %v13671_v49 = vld [vmem:[#allocation94_spill] sm:$0xff] }
 0x4f9   : > { %v9141_v55 = vpop.trf.xlu0 }
 0x4fa   : > { %7503 = vst [vmem:[%s12194_s6 + $0xd0] sm:$0xff] %v7922_v31  ;;  %v9145_v36 = vunpack.i.h.bf16 %v9141_v55  ;;  %v9142_v19 = vunpack.i.l.bf16 %v9141_v55  ;;  %v4674_v21 = vpop.permute.xlu1 %4673 }
 0x4fb   : > { %7297 = vst.msk [vmem:[%s11682_s24 + $0xb0] sm:$0xf] %vm3958_vm0, %v4674_v21 }
 0x4fc   : > { %v7923_v25 = vpack.c.bf16 %v9145_v36, %v9142_v19  ;;  %5653 = vrot.lane.b32.xlu1 %v13668_v32, %s9870_s21 }
 0x4fd   : > { %v9146_v52 = vpop.trf.xlu0 }
 0x4fe   : > { %7504 = vst [vmem:[%s12194_s6 + $0xd8] sm:$0xff] %v7923_v25  ;;  %v9150_v60 = vunpack.i.h.bf16 %v9146_v52  ;;  %v9147_v37 = vunpack.i.l.bf16 %v9146_v52  ;;  %v5624_v2 = vpop.permute.xlu1 %5623 }
 0x4ff   : > { %7521 = vst.msk [vmem:[%s11682_s24 + $0x1b0] sm:$0xf] %vm3958_vm0, %v5624_v2 }
 0x500   : > { %v7924_v14 = vpack.c.bf16 %v9150_v60, %v9147_v37  ;;  %4705 = vrot.lane.b32.xlu1 %v13669_v4, %s9870_s21 }
 0x501   : > { %v9151_v5 = vpop.trf.xlu0 }
 0x502   : > { %7505 = vst [vmem:[%s12194_s6 + $0xe0] sm:$0xff] %v7924_v14  ;;  %v9155_v53 = vunpack.i.h.bf16 %v9151_v5  ;;  %v9152_v62 = vunpack.i.l.bf16 %v9151_v5  ;;  %v4676_v40 = vpop.permute.xlu1 %4675 }
 0x503   : > { %7298 = vst.msk [vmem:[%s11682_s24 + $0xb4] sm:$0xf] %vm3958_vm0, %v4676_v40 }
 0x504   : > { %v7925_v0 = vpack.c.bf16 %v9155_v53, %v9152_v62  ;;  %5655 = vrot.lane.b32.xlu1 %v13670_v10, %s9870_s21 }
 0x505   : > { %v9156_v45 = vpop.trf.xlu0 }
 0x506   : > { %7506 = vst [vmem:[%s12194_s6 + $0xe8] sm:$0xff] %v7925_v0  ;;  %v9160_v1 = vunpack.i.h.bf16 %v9156_v45  ;;  %v9157_v17 = vunpack.i.l.bf16 %v9156_v45  ;;  %v5626_v54 = vpop.permute.xlu1 %5625 }
 0x507   : > { %7522 = vst.msk [vmem:[%s11682_s24 + $0x1b4] sm:$0xf] %vm3958_vm0, %v5626_v54 }
 0x508   : > { %v7926_v47 = vpack.c.bf16 %v9160_v1, %v9157_v17  ;;  %4707 = vrot.lane.b32.xlu1 %v12236_v24, %s9870_s21 }
 0x509   : > { %v9161_v57 = vpop.trf.xlu0 }
 0x50a   : > { %7507 = vst [vmem:[%s12194_s6 + $0xf0] sm:$0xff] %v7926_v47  ;;  %v9165_v6 = vunpack.i.h.bf16 %v9161_v57  ;;  %v9162_v34 = vunpack.i.l.bf16 %v9161_v57  ;;  %v4678_v59 = vpop.permute.xlu1 %4677 }
 0x50b   : > { %7299 = vst.msk [vmem:[%s11682_s24 + $0xb8] sm:$0xf] %vm3958_vm0, %v4678_v59 }
 0x50c   : > { %v7927_v8 = vpack.c.bf16 %v9165_v6, %v9162_v34  ;;  %5657 = vrot.lane.b32.xlu1 %v13671_v49, %s9870_s21 }
 0x50e   : > { %7508 = vst [vmem:[%s12194_s6 + $0xf8] sm:$0xff] %v7927_v8  ;;  %v5628_v20 = vpop.permute.xlu1 %5627 }
 0x50f   : > { %7523 = vst.msk [vmem:[%s11682_s24 + $0x1b8] sm:$0xf] %vm3958_vm0, %v5628_v20 }
 0x510   : > { %4709 = vrot.lane.b32.xlu1 %v12259_v18, %s9870_s21 }
 0x512   : > { %6593 = vrot.lane.b32.xlu0 %v12795_v41, %s9870_s21  ;;  %v4680_v24 = vpop.permute.xlu1 %4679 }
 0x513   : > { %7300 = vst.msk [vmem:[%s11682_s24 + $0xbc] sm:$0xf] %vm3958_vm0, %v4680_v24 }
 0x514   : > { %5659 = vrot.lane.b32.xlu1 %v12262_v29, %s9870_s21 }
 0x516   : > { %v5630_v28 = vpop.permute.xlu1 %5629 }
 0x517   : > { %7524 = vst.msk [vmem:[%s11682_s24 + $0x1bc] sm:$0xf] %vm3958_vm0, %v5630_v28 }
 0x518   : > { %4711 = vrot.lane.b32.xlu1 %v12271_v23, %s9870_s21 }
 0x51a   : > { %v4682_v31 = vpop.permute.xlu1 %4681 }
 0x51b   : > { %7301 = vst.msk [vmem:[%s11682_s24 + $0xc0] sm:$0xf] %vm3958_vm0, %v4682_v31 }
 0x51c   : > { %5661 = vrot.lane.b32.xlu1 %v12277_v26, %s9870_s21 }
 0x51e   : > { %v5632_v18 = vpop.permute.xlu1 %5631 }
 0x51f   : > { %7525 = vst.msk [vmem:[%s11682_s24 + $0x1c0] sm:$0xf] %vm3958_vm0, %v5632_v18 }
 0x520   : > { %6569 = vrot.lane.b32.xlu1 %v12650_v48, %s9870_s21 }
 0x522   : > { %v4684_v29 = vpop.permute.xlu1 %4683 }
 0x523   : > { %7302 = vst.msk [vmem:[%s11682_s24 + $0xc4] sm:$0xf] %vm3958_vm0, %v4684_v29 }
 0x524   : > { %6565 = vrot.lane.b32.xlu1 %v12655_v39, %s9870_s21 }
 0x526   : > { %v5634_v23 = vpop.permute.xlu1 %5633 }
 0x527   : > { %7526 = vst.msk [vmem:[%s11682_s24 + $0x1c4] sm:$0xf] %vm3958_vm0, %v5634_v23  ;;  %v13675_v23 = vld [vmem:[#allocation29_spill] sm:$0xff] }
 0x528   : > { %6571 = vrot.lane.b32.xlu1 %v12666_v3, %s9870_s21 }
 0x52a   : > { %v4686_v26 = vpop.permute.xlu1 %4685 }
 0x52b   : > { %7303 = vst.msk [vmem:[%s11682_s24 + $0xc8] sm:$0xf] %vm3958_vm0, %v4686_v26 }
 0x52c   : > { %6567 = vrot.lane.b32.xlu1 %v12671_v44, %s9870_s21 }
 0x52d   : > { %v9198_v48 = vpop.trf.xlu0 }
 0x52e   : > { %v9202_v41 = vunpack.i.h.bf16 %v9198_v48  ;;  %v9199_v27 = vunpack.i.l.bf16 %v9198_v48  ;;  %v5636_v55 = vpop.permute.xlu1 %5635 }
 0x52f   : > { %7527 = vst.msk [vmem:[%s11682_s24 + $0x1c8] sm:$0xf] %vm3958_vm0, %v5636_v55 }
 0x530   : > { %v8000_v39 = vpack.c.bf16 %v9202_v41, %v9199_v27  ;;  %6577 = vrot.lane.b32.xlu1 %v12702_v46, %s9870_s21 }
 0x531   : > { %v9203_v3 = vpop.trf.xlu0 }
 0x532   : > { %7725 = vst [vmem:[%s12194_s6 + $0x140] sm:$0xff] %v8000_v39  ;;  %v9207_v36 = vunpack.i.h.bf16 %v9203_v3  ;;  %v9204_v19 = vunpack.i.l.bf16 %v9203_v3  ;;  %v4688_v21 = vpop.permute.xlu1 %4687 }
 0x533   : > { %7304 = vst.msk [vmem:[%s11682_s24 + $0xcc] sm:$0xf] %vm3958_vm0, %v4688_v21 }
 0x534   : > { %v8001_v44 = vpack.c.bf16 %v9207_v36, %v9204_v19  ;;  %6573 = vrot.lane.b32.xlu1 %v12707_v51, %s9870_s21 }
 0x535   : > { %v9208_v25 = vpop.trf.xlu0 }
 0x536   : > { %7726 = vst [vmem:[%s12194_s6 + $0x148] sm:$0xff] %v8001_v44  ;;  %v9212_v32 = vunpack.i.h.bf16 %v9208_v25  ;;  %v9209_v52 = vunpack.i.l.bf16 %v9208_v25  ;;  %v5638_v60 = vpop.permute.xlu1 %5637 }
 0x537   : > { %7528 = vst.msk [vmem:[%s11682_s24 + $0x1cc] sm:$0xf] %vm3958_vm0, %v5638_v60 }
 0x538   : > { %v8002_v46 = vpack.c.bf16 %v9212_v32, %v9209_v52  ;;  %6579 = vrot.lane.b32.xlu1 %v12716_v13, %s9870_s21 }
 0x539   : > { %v9213_v37 = vpop.trf.xlu0 }
 0x53a   : > { %7727 = vst [vmem:[%s12194_s6 + $0x150] sm:$0xff] %v8002_v46  ;;  %v9217_v2 = vunpack.i.h.bf16 %v9213_v37  ;;  %v9214_v14 = vunpack.i.l.bf16 %v9213_v37  ;;  %v4690_v4 = vpop.permute.xlu1 %4689 }
 0x53b   : > { %7305 = vst.msk [vmem:[%s11682_s24 + $0xd0] sm:$0xf] %vm3958_vm0, %v4690_v4 }
 0x53c   : > { %v8003_v51 = vpack.c.bf16 %v9217_v2, %v9214_v14  ;;  %6575 = vrot.lane.b32.xlu1 %v12721_v43, %s9870_s21 }
 0x53d   : > { %v9218_v5 = vpop.trf.xlu0 }
 0x53e   : > { %7728 = vst [vmem:[%s12194_s6 + $0x158] sm:$0xff] %v8003_v51  ;;  %v9222_v53 = vunpack.i.h.bf16 %v9218_v5  ;;  %v9219_v62 = vunpack.i.l.bf16 %v9218_v5  ;;  %v5640_v40 = vpop.permute.xlu1 %5639 }
 0x53f   : > { %7529 = vst.msk [vmem:[%s11682_s24 + $0x1d0] sm:$0xf] %vm3958_vm0, %v5640_v40 }
 0x540   : > { %v8004_v13 = vpack.c.bf16 %v9222_v53, %v9219_v62  ;;  %6585 = vrot.lane.b32.xlu1 %v12754_v61, %s9870_s21 }
 0x541   : > { %v9223_v0 = vpop.trf.xlu0 }
 0x542   : > { %7729 = vst [vmem:[%s12194_s6 + $0x160] sm:$0xff] %v8004_v13  ;;  %v9227_v10 = vunpack.i.h.bf16 %v9223_v0  ;;  %v9224_v45 = vunpack.i.l.bf16 %v9223_v0  ;;  %v4692_v1 = vpop.permute.xlu1 %4691 }
 0x543   : > { %7306 = vst.msk [vmem:[%s11682_s24 + $0xd4] sm:$0xf] %vm3958_vm0, %v4692_v1 }
 0x544   : > { %v8005_v43 = vpack.c.bf16 %v9227_v10, %v9224_v45  ;;  %6581 = vrot.lane.b32.xlu1 %v12764_v12, %s9870_s21 }
 0x545   : > { %v9228_v17 = vpop.trf.xlu0 }
 0x546   : > { %7730 = vst [vmem:[%s12194_s6 + $0x168] sm:$0xff] %v8005_v43  ;;  %v9232_v54 = vunpack.i.h.bf16 %v9228_v17  ;;  %v9229_v47 = vunpack.i.l.bf16 %v9228_v17  ;;  %v5642_v61 = vpop.permute.xlu1 %5641 }
 0x547   : > { %7530 = vst.msk [vmem:[%s11682_s24 + $0x1d4] sm:$0xf] %vm3958_vm0, %v5642_v61 }
 0x548   : > { %v8006_v57 = vpack.c.bf16 %v9232_v54, %v9229_v47  ;;  %6587 = vrot.lane.b32.xlu1 %v12766_v30, %s9870_s21 }
 0x549   : > { %v9233_v6 = vpop.trf.xlu0 }
 0x54a   : > { %7731 = vst [vmem:[%s12194_s6 + $0x170] sm:$0xff] %v8006_v57  ;;  %v9237_v34 = vunpack.i.h.bf16 %v9233_v6  ;;  %v9234_v59 = vunpack.i.l.bf16 %v9233_v6  ;;  %v4696_v12 = vpop.permute.xlu1 %4695 }
 0x54b   : > { %7308 = vst.msk [vmem:[%s11682_s24 + $0xdc] sm:$0xf] %vm3958_vm0, %v4696_v12 }
 0x54c   : > { %v8007_v8 = vpack.c.bf16 %v9237_v34, %v9234_v59  ;;  %6583 = vrot.lane.b32.xlu1 %v12776_v35, %s9870_s21 }
 0x54e   : > { %7732 = vst [vmem:[%s12194_s6 + $0x178] sm:$0xff] %v8007_v8  ;;  %v5646_v49 = vpop.permute.xlu1 %5645 }
 0x54f   : > { %7532 = vst.msk [vmem:[%s11682_s24 + $0x1dc] sm:$0xf] %vm3958_vm0, %v5646_v49 }
 0x550   : > { %6589 = vrot.lane.b32.xlu1 %v12805_v11, %s9870_s21 }
 0x552   : > { %v4698_v30 = vpop.permute.xlu1 %4697 }
 0x553   : > { %7309 = vst.msk [vmem:[%s11682_s24 + $0xe0] sm:$0xf] %vm3958_vm0, %v4698_v30 }
 0x554   : > { %6595 = vrot.lane.b32.xlu1 %v12807_v56, %s9870_s21 }
 0x556   : > { %v5648_v20 = vpop.permute.xlu1 %5647 }
 0x557   : > { %7533 = vst.msk [vmem:[%s11682_s24 + $0x1e0] sm:$0xf] %vm3958_vm0, %v5648_v20 }
 0x558   : > { %6591 = vrot.lane.b32.xlu1 %v12817_v63, %s9870_s21 }
 0x55a   : > { %v4700_v35 = vpop.permute.xlu1 %4699 }
 0x55b   : > { %7310 = vst.msk [vmem:[%s11682_s24 + $0xe4] sm:$0xf] %vm3958_vm0, %v4700_v35 }
 0x55c   : > { %6553 = vrot.lane.b32.xlu1 %v12591_v38, %s9870_s21 }
 0x55e   : > { %v5650_v11 = vpop.permute.xlu1 %5649 }
 0x55f   : > { %7534 = vst.msk [vmem:[%s11682_s24 + $0x1e4] sm:$0xf] %vm3958_vm0, %v5650_v11 }
 0x560   : > { %6601 = vrot.lane.b32.xlu1 %v12837_v9, %s9870_s21  ;;  %v13672_v9 = vld [vmem:[#allocation18_spill] sm:$0xff] }
 0x562   : > { %v4702_v56 = vpop.permute.xlu1 %4701 }
 0x563   : > { %7311 = vst.msk [vmem:[%s11682_s24 + $0xe8] sm:$0xf] %vm3958_vm0, %v4702_v56 }
 0x564   : > { %6549 = vrot.lane.b32.xlu1 %v12594_v58, %s9870_s21 }
 0x566   : > { %v5652_v63 = vpop.permute.xlu1 %5651 }
 0x567   : > { %7535 = vst.msk [vmem:[%s11682_s24 + $0x1e8] sm:$0xf] %vm3958_vm0, %v5652_v63 }
 0x568   : > { %6597 = vrot.lane.b32.xlu1 %v12840_v50, %s9870_s21  ;;  %v13673_v50 = vld [vmem:[#allocation30_spill] sm:$0xff] }
 0x56a   : > { %v4704_v38 = vpop.permute.xlu1 %4703 }
 0x56b   : > { %7312 = vst.msk [vmem:[%s11682_s24 + $0xec] sm:$0xf] %vm3958_vm0, %v4704_v38 }
 0x56c   : > { %6555 = vrot.lane.b32.xlu1 %v13672_v9, %s9870_s21 }
 0x56e   : > { %v5654_v24 = vpop.permute.xlu1 %5653 }
 0x56f   : > { %7536 = vst.msk [vmem:[%s11682_s24 + $0x1ec] sm:$0xf] %vm3958_vm0, %v5654_v24 }
 0x570   : > { %6603 = vrot.lane.b32.xlu1 %v12848_v16, %s9870_s21  ;;  %v13674_v16 = vld [vmem:[#allocation22_spill] sm:$0xff] }
 0x572   : > { %v4706_v58 = vpop.permute.xlu1 %4705 }
 0x573   : > { %7313 = vst.msk [vmem:[%s11682_s24 + $0xf0] sm:$0xf] %vm3958_vm0, %v4706_v58 }
 0x574   : > { %6551 = vrot.lane.b32.xlu1 %v13673_v50, %s9870_s21 }
 0x576   : > { %v5656_v28 = vpop.permute.xlu1 %5655 }
 0x577   : > { %7537 = vst.msk [vmem:[%s11682_s24 + $0x1f0] sm:$0xf] %vm3958_vm0, %v5656_v28 }
 0x578   : > { %6599 = vrot.lane.b32.xlu1 %v12853_v15, %s9870_s21 }
 0x57a   : > { %v4708_v31 = vpop.permute.xlu1 %4707 }
 0x57b   : > { %7314 = vst.msk [vmem:[%s11682_s24 + $0xf4] sm:$0xf] %vm3958_vm0, %v4708_v31 }
 0x57c   : > { %6561 = vrot.lane.b32.xlu1 %v13674_v16, %s9870_s21 }
 0x57e   : > { %v5658_v18 = vpop.permute.xlu1 %5657 }
 0x57f   : > { %7538 = vst.msk [vmem:[%s11682_s24 + $0x1f4] sm:$0xf] %vm3958_vm0, %v5658_v18 }
 0x580   : > { %6609 = vrot.lane.b32.xlu1 %v12874_v42, %s9870_s21  ;;  %v13676_v42 = vld [vmem:[#allocation35_spill] sm:$0xff] }
 0x582   : > { %v4710_v29 = vpop.permute.xlu1 %4709 }
 0x583   : > { %7315 = vst.msk [vmem:[%s11682_s24 + $0xf8] sm:$0xf] %vm3958_vm0, %v4710_v29 }
 0x584   : > { %v6594_v15 = vpop.permute.xlu0 %6593  ;;  %6557 = vrot.lane.b32.xlu1 %v13675_v23, %s9870_s21 }
 0x585   : > { %7755 = vst.msk [vmem:[%s11682_s24 + $0x2d8] sm:$0xf] %vm3958_vm0, %v6594_v15 }
 0x586   : > { %v5660_v26 = vpop.permute.xlu1 %5659 }
 0x587   : > { %7539 = vst.msk [vmem:[%s11682_s24 + $0x1f8] sm:$0xf] %vm3958_vm0, %v5660_v26 }
 0x588   : > { %6605 = vrot.lane.b32.xlu1 %v12877_v7, %s9870_s21 }
 0x58a   : > { %v4712_v48 = vpop.permute.xlu1 %4711 }
 0x58b   : > { %7316 = vst.msk [vmem:[%s11682_s24 + $0xfc] sm:$0xf] %vm3958_vm0, %v4712_v48 }
 0x58c   : > { %6563 = vrot.lane.b32.xlu1 %v13676_v42, %s9870_s21 }
 0x58e   : > { %v5662_v41 = vpop.permute.xlu1 %5661 }
 0x58f   : > { %9788 = shalt.err (!%p9785_p9)
}
 0x590   : > { %s9789_s13 = scalar_lea.hbm %s13121_s30, 6144  ;;  %s9793_s6 = scalar_lea.hbm %s13245_s3, 12288 }
 0x591   : > { %p9790_p1 = scmp.ne.s32.totalorder %s13121_s30, %s9789_s13  ;;  %p9794_p7 = scmp.lt.u32.totalorder %s13121_s30, %s13245_s3 }
 0x592   : > { %p9795_p11 = scmp.lt.u32.totalorder %s9793_s6, %s9789_s13  ;;  %p9797_p6 = scmp.lt.u32.totalorder %s9789_s13, %s13121_s30 }
 0x593   : > { %p9791_p2 = pnand %p9790_p1, %p9991_p10 }
 0x594   : > { %p9796_p4 = por %p9795_p11, %p9794_p7 }
 0x595   : > { %p9792_p3 = pneg %p9791_p2 }
 0x596   : > { %p9798_p8 = por %p9797_p6, %p9796_p4 }
 0x598   : > { %p9799_p12 = pnand %p9798_p8, %p9792_p3 }
 0x59a   : > { %9802 = shalt.err (!%p9799_p12)
}
 0x59b   : > { %s9872_s11 = smov 128   ;;  %s9873_s25 = smov 8   ;;  %7540 = vst.msk [vmem:[%s11682_s24 + $0x1fc] sm:$0xf] %vm3958_vm0, %v5662_v41  ;;  %v13677_v7 = vld [vmem:[#allocation33_spill] sm:$0xff]  ;;  %v6570_v27 = vpop.permute.xlu1 %6569 }
 0x59c   : > { %8491 = dma.vmem_to_hbm [thread:$0]  (%p9991_p10), %s13123_s8, 6144, %s13121_s30, %s6688_s23, %s9872_s11, %s9872_s11, %s9873_s25  }
 0x59d   : > { %6559 = vrot.lane.b32.xlu1 %v13677_v7, %s9870_s21  ;;  %7743 = vst.msk [vmem:[%s11682_s24 + $0x2a8] sm:$0xf] %vm3958_vm0, %v6570_v27 }
 0x59f   : > { %v6566_v55 = vpop.permute.xlu1 %6565 }
 0x5a0   : > { %7741 = vst.msk [vmem:[%s11682_s24 + $0x2a0] sm:$0xf] %vm3958_vm0, %v6566_v55 }
 0x5a1   : > { %6607 = vrot.lane.b32.xlu1 %v12891_v33, %s9870_s21 }
 0x5a3   : > { %v6572_v39 = vpop.permute.xlu1 %6571 }
 0x5a4   : > { %7744 = vst.msk [vmem:[%s11682_s24 + $0x2ac] sm:$0xf] %vm3958_vm0, %v6572_v39 }
 0x5a5   : > { %6611 = vrot.lane.b32.xlu1 %v12886_v22, %s9870_s21 }
 0x5a7   : > { %v6568_v3 = vpop.permute.xlu1 %6567 }
 0x5a8   : > { %7742 = vst.msk [vmem:[%s11682_s24 + $0x2a4] sm:$0xf] %vm3958_vm0, %v6568_v3 }
 0x5ab   : > { %v6578_v36 = vpop.permute.xlu1 %6577 }
 0x5ac   : > { %7747 = vst.msk [vmem:[%s11682_s24 + $0x2b8] sm:$0xf] %vm3958_vm0, %v6578_v36 }
 0x5af   : > { %v6574_v33 = vpop.permute.xlu1 %6573 }
 0x5b0   : > { %7745 = vst.msk [vmem:[%s11682_s24 + $0x2b0] sm:$0xf] %vm3958_vm0, %v6574_v33 }
 0x5b3   : > { %v6580_v19 = vpop.permute.xlu1 %6579 }
 0x5b4   : > { %7748 = vst.msk [vmem:[%s11682_s24 + $0x2bc] sm:$0xf] %vm3958_vm0, %v6580_v19 }
 0x5b7   : > { %v6576_v22 = vpop.permute.xlu1 %6575 }
 0x5b8   : > { %7746 = vst.msk [vmem:[%s11682_s24 + $0x2b4] sm:$0xf] %vm3958_vm0, %v6576_v22 }
 0x5bb   : > { %v6586_v21 = vpop.permute.xlu1 %6585 }
 0x5bc   : > { %7751 = vst.msk [vmem:[%s11682_s24 + $0x2c8] sm:$0xf] %vm3958_vm0, %v6586_v21 }
 0x5bf   : > { %v6582_v44 = vpop.permute.xlu1 %6581 }
 0x5c0   : > { %7749 = vst.msk [vmem:[%s11682_s24 + $0x2c0] sm:$0xf] %vm3958_vm0, %v6582_v44 }
 0x5c3   : > { %v6588_v25 = vpop.permute.xlu1 %6587 }
 0x5c4   : > { %7752 = vst.msk [vmem:[%s11682_s24 + $0x2cc] sm:$0xf] %vm3958_vm0, %v6588_v25 }
 0x5c7   : > { %v6584_v32 = vpop.permute.xlu1 %6583 }
 0x5c8   : > { %7750 = vst.msk [vmem:[%s11682_s24 + $0x2c4] sm:$0xf] %vm3958_vm0, %v6584_v32 }
 0x5cb   : > { %v6590_v52 = vpop.permute.xlu1 %6589 }
 0x5cc   : > { %7753 = vst.msk [vmem:[%s11682_s24 + $0x2d0] sm:$0xf] %vm3958_vm0, %v6590_v52 }
 0x5cf   : > { %v6596_v60 = vpop.permute.xlu1 %6595 }
 0x5d0   : > { %7756 = vst.msk [vmem:[%s11682_s24 + $0x2dc] sm:$0xf] %vm3958_vm0, %v6596_v60 }
 0x5d3   : > { %v6592_v46 = vpop.permute.xlu1 %6591 }
 0x5d4   : > { %7754 = vst.msk [vmem:[%s11682_s24 + $0x2d4] sm:$0xf] %vm3958_vm0, %v6592_v46 }
 0x5d7   : > { %v6554_v37 = vpop.permute.xlu1 %6553 }
 0x5d8   : > { %7735 = vst.msk [vmem:[%s11682_s24 + $0x288] sm:$0xf] %vm3958_vm0, %v6554_v37 }
 0x5db   : > { %v6602_v2 = vpop.permute.xlu1 %6601 }
 0x5dc   : > { %7759 = vst.msk [vmem:[%s11682_s24 + $0x2e8] sm:$0xf] %vm3958_vm0, %v6602_v2 }
 0x5df   : > { %v6550_v14 = vpop.permute.xlu1 %6549 }
 0x5e0   : > { %7733 = vst.msk [vmem:[%s11682_s24 + $0x280] sm:$0xf] %vm3958_vm0, %v6550_v14 }
 0x5e3   : > { %v6598_v4 = vpop.permute.xlu1 %6597 }
 0x5e4   : > { %7757 = vst.msk [vmem:[%s11682_s24 + $0x2e0] sm:$0xf] %vm3958_vm0, %v6598_v4 }
 0x5e7   : > { %v6556_v51 = vpop.permute.xlu1 %6555 }
 0x5e8   : > { %7736 = vst.msk [vmem:[%s11682_s24 + $0x28c] sm:$0xf] %vm3958_vm0, %v6556_v51 }
 0x5eb   : > { %v6604_v5 = vpop.permute.xlu1 %6603 }
 0x5ec   : > { %7760 = vst.msk [vmem:[%s11682_s24 + $0x2ec] sm:$0xf] %vm3958_vm0, %v6604_v5 }
 0x5ef   : > { %v6552_v53 = vpop.permute.xlu1 %6551 }
 0x5f0   : > { %7734 = vst.msk [vmem:[%s11682_s24 + $0x284] sm:$0xf] %vm3958_vm0, %v6552_v53 }
 0x5f3   : > { %v6600_v62 = vpop.permute.xlu1 %6599 }
 0x5f4   : > { %7758 = vst.msk [vmem:[%s11682_s24 + $0x2e4] sm:$0xf] %vm3958_vm0, %v6600_v62 }
 0x5f7   : > { %v6562_v40 = vpop.permute.xlu1 %6561 }
 0x5f8   : > { %7739 = vst.msk [vmem:[%s11682_s24 + $0x298] sm:$0xf] %vm3958_vm0, %v6562_v40 }
 0x5fb   : > { %v6610_v13 = vpop.permute.xlu1 %6609 }
 0x5fc   : > { %7763 = vst.msk [vmem:[%s11682_s24 + $0x2f8] sm:$0xf] %vm3958_vm0, %v6610_v13 }
 0x5ff   : > { %v6558_v0 = vpop.permute.xlu1 %6557 }
 0x600   : > { %7737 = vst.msk [vmem:[%s11682_s24 + $0x290] sm:$0xf] %vm3958_vm0, %v6558_v0 }
 0x603   : > { %v6606_v10 = vpop.permute.xlu1 %6605 }
 0x604   : > { %7761 = vst.msk [vmem:[%s11682_s24 + $0x2f0] sm:$0xf] %vm3958_vm0, %v6606_v10 }
 0x607   : > { %v6564_v45 = vpop.permute.xlu1 %6563 }
 0x608   : > { %7740 = vst.msk [vmem:[%s11682_s24 + $0x29c] sm:$0xf] %vm3958_vm0, %v6564_v45 }
 0x60f   : > { %v6560_v1 = vpop.permute.xlu1 %6559 }
 0x610   : > { %7738 = vst.msk [vmem:[%s11682_s24 + $0x294] sm:$0xf] %vm3958_vm0, %v6560_v1 }
 0x613   : > { %v6608_v43 = vpop.permute.xlu1 %6607 }
 0x614   : > { %7762 = vst.msk [vmem:[%s11682_s24 + $0x2f4] sm:$0xf] %vm3958_vm0, %v6608_v43 }
 0x617   : > { %v6612_v17 = vpop.permute.xlu1 %6611 }
 0x618   : > { %7764 = vst.msk [vmem:[%s11682_s24 + $0x2fc] sm:$0xf] %vm3958_vm0, %v6612_v17 }
 0x619 PF: > { %s6747_s7 = sand.u32 1, %s9841_s15   ;;  %p13678_p10 = scmp.ne.s32.totalorder %s13376_s26, 0 }
 0x61a   : > { %p13679_p13 = scmp.ge.s32.totalorder %s9861_s20, 2  ;;  %s6748_s9 = scalar_lea.sflag [#allocation4], %s6747_s7 }
 0x61c   : > { %p8502_p0 = pnand %p13679_p13, %p13678_p10 }
 0x61e   : > { %9836 = dma.done.wait (!%p8502_p0), %s6748_s9, 6144  }
 0x61f   : > { %9838 = vsyncadd (!%p8502_p0), %s6748_s9, 4294961152  ;;  %s22_s20 = sadd.s32 1, %s9861_s20   ;;  %s13680_s15 = smov %s9845_s16 }
 0x620   : > { %p19_p5 = scmp.ge.s32.totalorder %s22_s20, 4   ;;  %s13681_s16 = smov %s9849_s17 }
 0x621   : > { %s13682_s17 = smov %s10000_s10  ;;  %s13683_s18 = smov %s9857_s19 }
 0x622   : > { %s13684_s19 = smov %s13686_s5  ;;  %21 = sbr.rel (!%p19_p5) target bundleno = 7 (0x7), region = 116 }
 0x629   :  { %6765 = vsyncpa [#allocation3], 1 }
 0x62a   :  { %6767 = vsyncpa [#allocation3 + $0x1], 1 }
 0x62b   :  { %6768 = vsyncpa [#allocation6], 1 }
 0x62c   :  { %6769 = vsyncpa [#allocation4], 1 }
 0x62d   :  { %6771 = vsyncpa [#allocation4 + $0x1], 1 }

</bundles_post_ra>
